<compile_context>
chip_gen: v6e
topology: v6e:2x2x1
jax: 0.10.0
libtpu: 0.0.40
codegen_flags: <defaults>
</compile_context>

<pallas_src>
import jax
import jax.numpy as jnp
from jax.experimental import pallas as pl
from jax.experimental.pallas import tpu as pltpu  # noqa: F401  (TPU backend)


# ---------------------------------------------------------------------------
# Fused Pallas kernel: whole forward pass in one call.
# ---------------------------------------------------------------------------

def _fused_forward_kernel(p1_ref, w1_ref, b1_ref, w2_ref, b2_ref,
                          wl1_ref, bl1_ref, wl2_ref, bl2_ref, out_ref):
    f32 = jnp.float32
    B = out_ref.shape[0]

    # ---- conv1 (3x3, 1->32) + ReLU -------------------------------------
    # p1 rows are (b, oh, ow_pad) with ow_pad in [0, 16); cols are (kh, kw).
    y1 = jnp.dot(p1_ref[...], w1_ref[...], preferred_element_type=f32)
    y1 = jnp.maximum(y1 + b1_ref[...], 0.0)            # (B*192, 32)
    y1 = y1.reshape(B, 12, 16, 32)                     # (b, oh, ow_pad, c); ow_pad>=12 unused

    # ---- conv2 (5x5, 32->64) as 25 accumulated K=32 matmuls ------------
    acc = jnp.zeros((B * 64, 64), dtype=f32)
    for j in range(5):                                 # kw
        yj = y1[:, :, j:j + 8, :]                      # (B, 12, 8, 32)
        for i in range(5):                             # kh
            slab = yj[:, i:i + 8].reshape(B * 64, 32)  # rows (b, oh, ow), oh/ow in [0,8)
            acc = acc + jnp.dot(slab, w2_ref[5 * i + j],
                                preferred_element_type=f32)
    y2 = acc + b2_ref[...]                             # (B*64, 64)
    y2 = y2.reshape(B, 8, 8, 64)                       # (b, oh, ow, c)

    # ---- max_pool2d(kernel=4, stride=4) + ReLU (lane-dense, channel-last)
    h0 = jnp.maximum(jnp.maximum(y2[:, 0], y2[:, 1]),
                     jnp.maximum(y2[:, 2], y2[:, 3]))  # (B, 8, 64)  (ph = 0)
    h1 = jnp.maximum(jnp.maximum(y2[:, 4], y2[:, 5]),
                     jnp.maximum(y2[:, 6], y2[:, 7]))  # (B, 8, 64)  (ph = 1)
    p00 = jnp.maximum(jnp.max(h0[:, 0:4, :], axis=1), 0.0)   # (B, 64) window (0,0)
    p01 = jnp.maximum(jnp.max(h0[:, 4:8, :], axis=1), 0.0)   # (B, 64) window (0,1)
    p10 = jnp.maximum(jnp.max(h1[:, 0:4, :], axis=1), 0.0)   # (B, 64) window (1,0)
    p11 = jnp.maximum(jnp.max(h1[:, 4:8, :], axis=1), 0.0)   # (B, 64) window (1,1)

    # ---- lin1 (256->200) as sum of 4 blocked matmuls + ReLU -------------
    h = (jnp.dot(p00, wl1_ref[0], preferred_element_type=f32)
         + jnp.dot(p01, wl1_ref[1], preferred_element_type=f32)
         + jnp.dot(p10, wl1_ref[2], preferred_element_type=f32)
         + jnp.dot(p11, wl1_ref[3], preferred_element_type=f32))
    h = jnp.maximum(h + bl1_ref[...], 0.0)             # (B, 200)

    # ---- lin2 (200->5) ---------------------------------------------------
    out_ref[...] = jnp.dot(h, wl2_ref[...],
                           preferred_element_type=f32) + bl2_ref[...]


# ---------------------------------------------------------------------------
# Wrapper glue
# ---------------------------------------------------------------------------

def conv1_im2col_padded(x):
    """x: (B, 1, 14, 14) -> (B*12*16, 9). Rows (b, oh, ow_pad), cols (kh, kw)."""
    B = x.shape[0]
    x2 = x[:, 0]                                          # (B, 14, 14)
    cols = [x2[:, i:i + 12, j:j + 12] for i in range(3) for j in range(3)]
    p1 = jnp.stack(cols, axis=-1)                         # (B, 12, 12, 9)
    p1 = jnp.pad(p1, ((0, 0), (0, 0), (0, 4), (0, 0)))    # pad ow 12 -> 16
    return p1.reshape(B * 12 * 16, 9)


def prep_params(params):
    """One-time weight repack into kernel-friendly layouts (hoisted, free)."""
    w1 = params["conv1_w"].reshape(32, 9).T                          # (9, 32)
    b1 = params["conv1_b"].reshape(1, 32)
    w2 = params["conv2_w"].transpose(2, 3, 1, 0).reshape(25, 32, 64)  # (kh*5+kw, cin, cout)
    b2 = params["conv2_b"].reshape(1, 64)
    # PyTorch flattens pooled (B, 64, 2, 2) NCHW as c*4 + ph*2 + pw; split the
    # lin1 weight into 4 (64, 200) blocks indexed by (ph, pw) instead.
    wl1 = params["lin1_w"].reshape(200, 64, 2, 2).transpose(2, 3, 1, 0).reshape(4, 64, 200)
    bl1 = params["lin1_b"].reshape(1, 200)
    wl2 = params["lin2_w"].T                                          # (200, 5)
    bl2 = params["lin2_b"].reshape(1, 5)
    return dict(w1=w1, b1=b1, w2=w2, b2=b2, wl1=wl1, bl1=bl1, wl2=wl2, bl2=bl2)


def shared_weight_net_binary_forward(x, prepped):
    """SharedWeight_Net_Binary.forward.  x: (B, 1, 14, 14) -> (B, 5)."""
    B = x.shape[0]
    p1 = conv1_im2col_padded(x)
    return pl.pallas_call(
        _fused_forward_kernel,
        out_shape=jax.ShapeDtypeStruct((B, 5), jnp.float32),
    )(p1, prepped["w1"], prepped["b1"], prepped["w2"], prepped["b2"],
      prepped["wl1"], prepped["bl1"], prepped["wl2"], prepped["bl2"])


# ---------------------------------------------------------------------------
# Pure-JAX reference (for in-script correctness check only)
# ---------------------------------------------------------------------------

def reference_forward(x, params):
    B = x.shape[0]
    x2 = x[:, 0]
    y1 = jnp.zeros((B, 12, 12, 32), jnp.float32)
    for i in range(3):
        for j in range(3):
            y1 = y1 + x2[:, i:i + 12, j:j + 12, None] * params["conv1_w"][:, 0, i, j]
    y1 = jax.nn.relu(y1 + params["conv1_b"])
    y2 = jnp.zeros((B, 8, 8, 64), jnp.float32)
    for i in range(5):
        for j in range(5):
            y2 = y2 + jnp.einsum("bhwc,dc->bhwd",
                                 y1[:, i:i + 8, j:j + 8, :],
                                 params["conv2_w"][:, :, i, j])
    y2 = y2 + params["conv2_b"]
    pooled = jax.nn.relu(y2.reshape(B, 2, 4, 2, 4, 64).max(axis=(2, 4)))  # (B,2,2,64)
    feat = pooled.transpose(0, 3, 1, 2).reshape(B, 256)                    # NCHW view
    h = jax.nn.relu(feat @ params["lin1_w"].T + params["lin1_b"])
    return h @ params["lin2_w"].T + params["lin2_b"]


# ---------------------------------------------------------------------------
# Deterministic parameter init (PyTorch default U(-1/sqrt(fan_in), +))
# ---------------------------------------------------------------------------

def init_params(key):
    def uni(k, shape, fan_in):
        bound = 1.0 / float(fan_in) ** 0.5
        return jax.random.uniform(k, shape, jnp.float32, -bound, bound)

    ks = jax.random.split(key, 8)
    return dict(
        conv1_w=uni(ks[0], (32, 1, 3, 3), 1 * 3 * 3),
        conv1_b=uni(ks[1], (32,), 1 * 3 * 3),
        conv2_w=uni(ks[2], (64, 32, 5, 5), 32 * 5 * 5),
        conv2_b=uni(ks[3], (64,), 32 * 5 * 5),
        lin1_w=uni(ks[4], (200, 256), 256),
        lin1_b=uni(ks[5], (200,), 256),
        lin2_w=uni(ks[6], (5, 200), 200),
        lin2_b=uni(ks[7], (5,), 200),
    )


if __name__ == "__main__":
    root = jax.random.PRNGKey(0)
    k_params, k_x = jax.random.split(root)
    params = init_params(k_params)
    prepped = prep_params(params)   # one-time weight repack, outside jit

    # Input shape implied by the module: 14x14 single-channel images
    # (conv1 -> 12, conv2 -> 8, pool/4 -> 2, 64*2*2 = 256 == lin1 fan-in).
    x = jax.random.normal(k_x, (2, 1, 14, 14), jnp.float32)

    fwd = jax.jit(lambda xx: shared_weight_net_binary_forward(xx, prepped))
    out = fwd(x)
    jax.block_until_ready(out)

    assert out.shape == (2, 5) and out.dtype == jnp.float32
    assert bool(jnp.all(jnp.isfinite(out)))

    # Numerical check against a pure-JAX reference of the PyTorch forward.
    ref = jax.jit(lambda xx: reference_forward(xx, params))(x)
    jax.block_until_ready(ref)
    max_diff = float(jnp.max(jnp.abs(out - ref)))
    assert max_diff < 5e-2, f"mismatch vs reference: {max_diff}"

    print("KERNEL_OK")
</pallas_src>

<mosaic_0001>
module attributes {stable_mosaic.version = 11 : i64} {
  func.func @_fused_forward_kernel(%arg0: memref<384x9xf32, #tpu.memory_space<vmem>>, %arg1: memref<9x32xf32, #tpu.memory_space<vmem>>, %arg2: memref<1x32xf32, #tpu.memory_space<vmem>>, %arg3: memref<25x32x64xf32, #tpu.memory_space<vmem>>, %arg4: memref<1x64xf32, #tpu.memory_space<vmem>>, %arg5: memref<4x64x200xf32, #tpu.memory_space<vmem>>, %arg6: memref<1x200xf32, #tpu.memory_space<vmem>>, %arg7: memref<200x5xf32, #tpu.memory_space<vmem>>, %arg8: memref<1x5xf32, #tpu.memory_space<vmem>>, %arg9: memref<2x5xf32, #tpu.memory_space<vmem>>) attributes {dimension_semantics = [], scalar_prefetch = 0 : i64, scratch_operands = 0 : i64, tpu.core_type = #tpu.core_type<tc>} {
    %c0 = arith.constant 0 : index
    %c0_0 = arith.constant 0 : index
    %0 = vector.load %arg0[%c0, %c0_0] : memref<384x9xf32, #tpu.memory_space<vmem>>, vector<384x9xf32>
    %c0_1 = arith.constant 0 : index
    %c0_2 = arith.constant 0 : index
    %1 = vector.load %arg1[%c0_1, %c0_2] : memref<9x32xf32, #tpu.memory_space<vmem>>, vector<9x32xf32>
    %cst = arith.constant dense<0.000000e+00> : vector<384x32xf32>
    %2 = tpu.matmul %0, %1, %cst {dimension_numbers = #tpu.dot_dimension_numbers<[1], [0], [0], [1], [0, 0, 1, 1], [], []>} : vector<384x9xf32>, vector<9x32xf32>, vector<384x32xf32> -> vector<384x32xf32>
    %c0_3 = arith.constant 0 : index
    %c0_4 = arith.constant 0 : index
    %3 = vector.load %arg2[%c0_3, %c0_4] : memref<1x32xf32, #tpu.memory_space<vmem>>, vector<1x32xf32>
    %4 = vector.broadcast %3 : vector<1x32xf32> to vector<384x32xf32>
    %5 = arith.addf %2, %4 : vector<384x32xf32>
    %cst_5 = arith.constant 0.000000e+00 : f32
    %6 = vector.broadcast %cst_5 : f32 to vector<384x32xf32>
    %7 = arith.maximumf %5, %6 : vector<384x32xf32>
    %8 = vector.shape_cast %7 : vector<384x32xf32> to vector<2x12x16x32xf32>
    %cst_6 = arith.constant 0.000000e+00 : f32
    %9 = vector.broadcast %cst_6 : f32 to vector<128x64xf32>
    %10 = vector.extract_strided_slice %8 {offsets = [0, 0, 0, 0], sizes = [2, 12, 8, 32], strides = [1, 1, 1, 1]} : vector<2x12x16x32xf32> to vector<2x12x8x32xf32>
    %11 = vector.extract_strided_slice %10 {offsets = [0, 0, 0, 0], sizes = [2, 8, 8, 32], strides = [1, 1, 1, 1]} : vector<2x12x8x32xf32> to vector<2x8x8x32xf32>
    %12 = vector.shape_cast %11 : vector<2x8x8x32xf32> to vector<128x32xf32>
    %c0_7 = arith.constant 0 : index
    %c0_8 = arith.constant 0 : index
    %c0_9 = arith.constant 0 : index
    %13 = vector.load %arg3[%c0_7, %c0_8, %c0_9] : memref<25x32x64xf32, #tpu.memory_space<vmem>>, vector<1x32x64xf32>
    %14 = vector.shape_cast %13 : vector<1x32x64xf32> to vector<32x64xf32>
    %cst_10 = arith.constant dense<0.000000e+00> : vector<128x64xf32>
    %15 = tpu.matmul %12, %14, %cst_10 {dimension_numbers = #tpu.dot_dimension_numbers<[1], [0], [0], [1], [0, 0, 1, 1], [], []>} : vector<128x32xf32>, vector<32x64xf32>, vector<128x64xf32> -> vector<128x64xf32>
    %16 = arith.addf %9, %15 : vector<128x64xf32>
    %17 = vector.extract_strided_slice %10 {offsets = [0, 1, 0, 0], sizes = [2, 8, 8, 32], strides = [1, 1, 1, 1]} : vector<2x12x8x32xf32> to vector<2x8x8x32xf32>
    %18 = vector.shape_cast %17 : vector<2x8x8x32xf32> to vector<128x32xf32>
    %c5 = arith.constant 5 : index
    %c0_11 = arith.constant 0 : index
    %c0_12 = arith.constant 0 : index
    %19 = vector.load %arg3[%c5, %c0_11, %c0_12] : memref<25x32x64xf32, #tpu.memory_space<vmem>>, vector<1x32x64xf32>
    %20 = vector.shape_cast %19 : vector<1x32x64xf32> to vector<32x64xf32>
    %cst_13 = arith.constant dense<0.000000e+00> : vector<128x64xf32>
    %21 = tpu.matmul %18, %20, %cst_13 {dimension_numbers = #tpu.dot_dimension_numbers<[1], [0], [0], [1], [0, 0, 1, 1], [], []>} : vector<128x32xf32>, vector<32x64xf32>, vector<128x64xf32> -> vector<128x64xf32>
    %22 = arith.addf %16, %21 : vector<128x64xf32>
    %23 = vector.extract_strided_slice %10 {offsets = [0, 2, 0, 0], sizes = [2, 8, 8, 32], strides = [1, 1, 1, 1]} : vector<2x12x8x32xf32> to vector<2x8x8x32xf32>
    %24 = vector.shape_cast %23 : vector<2x8x8x32xf32> to vector<128x32xf32>
    %c10 = arith.constant 10 : index
    %c0_14 = arith.constant 0 : index
    %c0_15 = arith.constant 0 : index
    %25 = vector.load %arg3[%c10, %c0_14, %c0_15] : memref<25x32x64xf32, #tpu.memory_space<vmem>>, vector<1x32x64xf32>
    %26 = vector.shape_cast %25 : vector<1x32x64xf32> to vector<32x64xf32>
    %cst_16 = arith.constant dense<0.000000e+00> : vector<128x64xf32>
    %27 = tpu.matmul %24, %26, %cst_16 {dimension_numbers = #tpu.dot_dimension_numbers<[1], [0], [0], [1], [0, 0, 1, 1], [], []>} : vector<128x32xf32>, vector<32x64xf32>, vector<128x64xf32> -> vector<128x64xf32>
    %28 = arith.addf %22, %27 : vector<128x64xf32>
    %29 = vector.extract_strided_slice %10 {offsets = [0, 3, 0, 0], sizes = [2, 8, 8, 32], strides = [1, 1, 1, 1]} : vector<2x12x8x32xf32> to vector<2x8x8x32xf32>
    %30 = vector.shape_cast %29 : vector<2x8x8x32xf32> to vector<128x32xf32>
    %c15 = arith.constant 15 : index
    %c0_17 = arith.constant 0 : index
    %c0_18 = arith.constant 0 : index
    %31 = vector.load %arg3[%c15, %c0_17, %c0_18] : memref<25x32x64xf32, #tpu.memory_space<vmem>>, vector<1x32x64xf32>
    %32 = vector.shape_cast %31 : vector<1x32x64xf32> to vector<32x64xf32>
    %cst_19 = arith.constant dense<0.000000e+00> : vector<128x64xf32>
    %33 = tpu.matmul %30, %32, %cst_19 {dimension_numbers = #tpu.dot_dimension_numbers<[1], [0], [0], [1], [0, 0, 1, 1], [], []>} : vector<128x32xf32>, vector<32x64xf32>, vector<128x64xf32> -> vector<128x64xf32>
    %34 = arith.addf %28, %33 : vector<128x64xf32>
    %35 = vector.extract_strided_slice %10 {offsets = [0, 4, 0, 0], sizes = [2, 8, 8, 32], strides = [1, 1, 1, 1]} : vector<2x12x8x32xf32> to vector<2x8x8x32xf32>
    %36 = vector.shape_cast %35 : vector<2x8x8x32xf32> to vector<128x32xf32>
    %c20 = arith.constant 20 : index
    %c0_20 = arith.constant 0 : index
    %c0_21 = arith.constant 0 : index
    %37 = vector.load %arg3[%c20, %c0_20, %c0_21] : memref<25x32x64xf32, #tpu.memory_space<vmem>>, vector<1x32x64xf32>
    %38 = vector.shape_cast %37 : vector<1x32x64xf32> to vector<32x64xf32>
    %cst_22 = arith.constant dense<0.000000e+00> : vector<128x64xf32>
    %39 = tpu.matmul %36, %38, %cst_22 {dimension_numbers = #tpu.dot_dimension_numbers<[1], [0], [0], [1], [0, 0, 1, 1], [], []>} : vector<128x32xf32>, vector<32x64xf32>, vector<128x64xf32> -> vector<128x64xf32>
    %40 = arith.addf %34, %39 : vector<128x64xf32>
    %41 = vector.extract_strided_slice %8 {offsets = [0, 0, 1, 0], sizes = [2, 12, 8, 32], strides = [1, 1, 1, 1]} : vector<2x12x16x32xf32> to vector<2x12x8x32xf32>
    %42 = vector.extract_strided_slice %41 {offsets = [0, 0, 0, 0], sizes = [2, 8, 8, 32], strides = [1, 1, 1, 1]} : vector<2x12x8x32xf32> to vector<2x8x8x32xf32>
    %43 = vector.shape_cast %42 : vector<2x8x8x32xf32> to vector<128x32xf32>
    %c1 = arith.constant 1 : index
    %c0_23 = arith.constant 0 : index
    %c0_24 = arith.constant 0 : index
    %44 = vector.load %arg3[%c1, %c0_23, %c0_24] : memref<25x32x64xf32, #tpu.memory_space<vmem>>, vector<1x32x64xf32>
    %45 = vector.shape_cast %44 : vector<1x32x64xf32> to vector<32x64xf32>
    %cst_25 = arith.constant dense<0.000000e+00> : vector<128x64xf32>
    %46 = tpu.matmul %43, %45, %cst_25 {dimension_numbers = #tpu.dot_dimension_numbers<[1], [0], [0], [1], [0, 0, 1, 1], [], []>} : vector<128x32xf32>, vector<32x64xf32>, vector<128x64xf32> -> vector<128x64xf32>
    %47 = arith.addf %40, %46 : vector<128x64xf32>
    %48 = vector.extract_strided_slice %41 {offsets = [0, 1, 0, 0], sizes = [2, 8, 8, 32], strides = [1, 1, 1, 1]} : vector<2x12x8x32xf32> to vector<2x8x8x32xf32>
    %49 = vector.shape_cast %48 : vector<2x8x8x32xf32> to vector<128x32xf32>
    %c6 = arith.constant 6 : index
    %c0_26 = arith.constant 0 : index
    %c0_27 = arith.constant 0 : index
    %50 = vector.load %arg3[%c6, %c0_26, %c0_27] : memref<25x32x64xf32, #tpu.memory_space<vmem>>, vector<1x32x64xf32>
    %51 = vector.shape_cast %50 : vector<1x32x64xf32> to vector<32x64xf32>
    %cst_28 = arith.constant dense<0.000000e+00> : vector<128x64xf32>
    %52 = tpu.matmul %49, %51, %cst_28 {dimension_numbers = #tpu.dot_dimension_numbers<[1], [0], [0], [1], [0, 0, 1, 1], [], []>} : vector<128x32xf32>, vector<32x64xf32>, vector<128x64xf32> -> vector<128x64xf32>
    %53 = arith.addf %47, %52 : vector<128x64xf32>
    %54 = vector.extract_strided_slice %41 {offsets = [0, 2, 0, 0], sizes = [2, 8, 8, 32], strides = [1, 1, 1, 1]} : vector<2x12x8x32xf32> to vector<2x8x8x32xf32>
    %55 = vector.shape_cast %54 : vector<2x8x8x32xf32> to vector<128x32xf32>
    %c11 = arith.constant 11 : index
    %c0_29 = arith.constant 0 : index
    %c0_30 = arith.constant 0 : index
    %56 = vector.load %arg3[%c11, %c0_29, %c0_30] : memref<25x32x64xf32, #tpu.memory_space<vmem>>, vector<1x32x64xf32>
    %57 = vector.shape_cast %56 : vector<1x32x64xf32> to vector<32x64xf32>
    %cst_31 = arith.constant dense<0.000000e+00> : vector<128x64xf32>
    %58 = tpu.matmul %55, %57, %cst_31 {dimension_numbers = #tpu.dot_dimension_numbers<[1], [0], [0], [1], [0, 0, 1, 1], [], []>} : vector<128x32xf32>, vector<32x64xf32>, vector<128x64xf32> -> vector<128x64xf32>
    %59 = arith.addf %53, %58 : vector<128x64xf32>
    %60 = vector.extract_strided_slice %41 {offsets = [0, 3, 0, 0], sizes = [2, 8, 8, 32], strides = [1, 1, 1, 1]} : vector<2x12x8x32xf32> to vector<2x8x8x32xf32>
    %61 = vector.shape_cast %60 : vector<2x8x8x32xf32> to vector<128x32xf32>
    %c16 = arith.constant 16 : index
    %c0_32 = arith.constant 0 : index
    %c0_33 = arith.constant 0 : index
    %62 = vector.load %arg3[%c16, %c0_32, %c0_33] : memref<25x32x64xf32, #tpu.memory_space<vmem>>, vector<1x32x64xf32>
    %63 = vector.shape_cast %62 : vector<1x32x64xf32> to vector<32x64xf32>
    %cst_34 = arith.constant dense<0.000000e+00> : vector<128x64xf32>
    %64 = tpu.matmul %61, %63, %cst_34 {dimension_numbers = #tpu.dot_dimension_numbers<[1], [0], [0], [1], [0, 0, 1, 1], [], []>} : vector<128x32xf32>, vector<32x64xf32>, vector<128x64xf32> -> vector<128x64xf32>
    %65 = arith.addf %59, %64 : vector<128x64xf32>
    %66 = vector.extract_strided_slice %41 {offsets = [0, 4, 0, 0], sizes = [2, 8, 8, 32], strides = [1, 1, 1, 1]} : vector<2x12x8x32xf32> to vector<2x8x8x32xf32>
    %67 = vector.shape_cast %66 : vector<2x8x8x32xf32> to vector<128x32xf32>
    %c21 = arith.constant 21 : index
    %c0_35 = arith.constant 0 : index
    %c0_36 = arith.constant 0 : index
    %68 = vector.load %arg3[%c21, %c0_35, %c0_36] : memref<25x32x64xf32, #tpu.memory_space<vmem>>, vector<1x32x64xf32>
    %69 = vector.shape_cast %68 : vector<1x32x64xf32> to vector<32x64xf32>
    %cst_37 = arith.constant dense<0.000000e+00> : vector<128x64xf32>
    %70 = tpu.matmul %67, %69, %cst_37 {dimension_numbers = #tpu.dot_dimension_numbers<[1], [0], [0], [1], [0, 0, 1, 1], [], []>} : vector<128x32xf32>, vector<32x64xf32>, vector<128x64xf32> -> vector<128x64xf32>
    %71 = arith.addf %65, %70 : vector<128x64xf32>
    %72 = vector.extract_strided_slice %8 {offsets = [0, 0, 2, 0], sizes = [2, 12, 8, 32], strides = [1, 1, 1, 1]} : vector<2x12x16x32xf32> to vector<2x12x8x32xf32>
    %73 = vector.extract_strided_slice %72 {offsets = [0, 0, 0, 0], sizes = [2, 8, 8, 32], strides = [1, 1, 1, 1]} : vector<2x12x8x32xf32> to vector<2x8x8x32xf32>
    %74 = vector.shape_cast %73 : vector<2x8x8x32xf32> to vector<128x32xf32>
    %c2 = arith.constant 2 : index
    %c0_38 = arith.constant 0 : index
    %c0_39 = arith.constant 0 : index
    %75 = vector.load %arg3[%c2, %c0_38, %c0_39] : memref<25x32x64xf32, #tpu.memory_space<vmem>>, vector<1x32x64xf32>
    %76 = vector.shape_cast %75 : vector<1x32x64xf32> to vector<32x64xf32>
    %cst_40 = arith.constant dense<0.000000e+00> : vector<128x64xf32>
    %77 = tpu.matmul %74, %76, %cst_40 {dimension_numbers = #tpu.dot_dimension_numbers<[1], [0], [0], [1], [0, 0, 1, 1], [], []>} : vector<128x32xf32>, vector<32x64xf32>, vector<128x64xf32> -> vector<128x64xf32>
    %78 = arith.addf %71, %77 : vector<128x64xf32>
    %79 = vector.extract_strided_slice %72 {offsets = [0, 1, 0, 0], sizes = [2, 8, 8, 32], strides = [1, 1, 1, 1]} : vector<2x12x8x32xf32> to vector<2x8x8x32xf32>
    %80 = vector.shape_cast %79 : vector<2x8x8x32xf32> to vector<128x32xf32>
    %c7 = arith.constant 7 : index
    %c0_41 = arith.constant 0 : index
    %c0_42 = arith.constant 0 : index
    %81 = vector.load %arg3[%c7, %c0_41, %c0_42] : memref<25x32x64xf32, #tpu.memory_space<vmem>>, vector<1x32x64xf32>
    %82 = vector.shape_cast %81 : vector<1x32x64xf32> to vector<32x64xf32>
    %cst_43 = arith.constant dense<0.000000e+00> : vector<128x64xf32>
    %83 = tpu.matmul %80, %82, %cst_43 {dimension_numbers = #tpu.dot_dimension_numbers<[1], [0], [0], [1], [0, 0, 1, 1], [], []>} : vector<128x32xf32>, vector<32x64xf32>, vector<128x64xf32> -> vector<128x64xf32>
    %84 = arith.addf %78, %83 : vector<128x64xf32>
    %85 = vector.extract_strided_slice %72 {offsets = [0, 2, 0, 0], sizes = [2, 8, 8, 32], strides = [1, 1, 1, 1]} : vector<2x12x8x32xf32> to vector<2x8x8x32xf32>
    %86 = vector.shape_cast %85 : vector<2x8x8x32xf32> to vector<128x32xf32>
    %c12 = arith.constant 12 : index
    %c0_44 = arith.constant 0 : index
    %c0_45 = arith.constant 0 : index
    %87 = vector.load %arg3[%c12, %c0_44, %c0_45] : memref<25x32x64xf32, #tpu.memory_space<vmem>>, vector<1x32x64xf32>
    %88 = vector.shape_cast %87 : vector<1x32x64xf32> to vector<32x64xf32>
    %cst_46 = arith.constant dense<0.000000e+00> : vector<128x64xf32>
    %89 = tpu.matmul %86, %88, %cst_46 {dimension_numbers = #tpu.dot_dimension_numbers<[1], [0], [0], [1], [0, 0, 1, 1], [], []>} : vector<128x32xf32>, vector<32x64xf32>, vector<128x64xf32> -> vector<128x64xf32>
    %90 = arith.addf %84, %89 : vector<128x64xf32>
    %91 = vector.extract_strided_slice %72 {offsets = [0, 3, 0, 0], sizes = [2, 8, 8, 32], strides = [1, 1, 1, 1]} : vector<2x12x8x32xf32> to vector<2x8x8x32xf32>
    %92 = vector.shape_cast %91 : vector<2x8x8x32xf32> to vector<128x32xf32>
    %c17 = arith.constant 17 : index
    %c0_47 = arith.constant 0 : index
    %c0_48 = arith.constant 0 : index
    %93 = vector.load %arg3[%c17, %c0_47, %c0_48] : memref<25x32x64xf32, #tpu.memory_space<vmem>>, vector<1x32x64xf32>
    %94 = vector.shape_cast %93 : vector<1x32x64xf32> to vector<32x64xf32>
    %cst_49 = arith.constant dense<0.000000e+00> : vector<128x64xf32>
    %95 = tpu.matmul %92, %94, %cst_49 {dimension_numbers = #tpu.dot_dimension_numbers<[1], [0], [0], [1], [0, 0, 1, 1], [], []>} : vector<128x32xf32>, vector<32x64xf32>, vector<128x64xf32> -> vector<128x64xf32>
    %96 = arith.addf %90, %95 : vector<128x64xf32>
    %97 = vector.extract_strided_slice %72 {offsets = [0, 4, 0, 0], sizes = [2, 8, 8, 32], strides = [1, 1, 1, 1]} : vector<2x12x8x32xf32> to vector<2x8x8x32xf32>
    %98 = vector.shape_cast %97 : vector<2x8x8x32xf32> to vector<128x32xf32>
    %c22 = arith.constant 22 : index
    %c0_50 = arith.constant 0 : index
    %c0_51 = arith.constant 0 : index
    %99 = vector.load %arg3[%c22, %c0_50, %c0_51] : memref<25x32x64xf32, #tpu.memory_space<vmem>>, vector<1x32x64xf32>
    %100 = vector.shape_cast %99 : vector<1x32x64xf32> to vector<32x64xf32>
    %cst_52 = arith.constant dense<0.000000e+00> : vector<128x64xf32>
    %101 = tpu.matmul %98, %100, %cst_52 {dimension_numbers = #tpu.dot_dimension_numbers<[1], [0], [0], [1], [0, 0, 1, 1], [], []>} : vector<128x32xf32>, vector<32x64xf32>, vector<128x64xf32> -> vector<128x64xf32>
    %102 = arith.addf %96, %101 : vector<128x64xf32>
    %103 = vector.extract_strided_slice %8 {offsets = [0, 0, 3, 0], sizes = [2, 12, 8, 32], strides = [1, 1, 1, 1]} : vector<2x12x16x32xf32> to vector<2x12x8x32xf32>
    %104 = vector.extract_strided_slice %103 {offsets = [0, 0, 0, 0], sizes = [2, 8, 8, 32], strides = [1, 1, 1, 1]} : vector<2x12x8x32xf32> to vector<2x8x8x32xf32>
    %105 = vector.shape_cast %104 : vector<2x8x8x32xf32> to vector<128x32xf32>
    %c3 = arith.constant 3 : index
    %c0_53 = arith.constant 0 : index
    %c0_54 = arith.constant 0 : index
    %106 = vector.load %arg3[%c3, %c0_53, %c0_54] : memref<25x32x64xf32, #tpu.memory_space<vmem>>, vector<1x32x64xf32>
    %107 = vector.shape_cast %106 : vector<1x32x64xf32> to vector<32x64xf32>
    %cst_55 = arith.constant dense<0.000000e+00> : vector<128x64xf32>
    %108 = tpu.matmul %105, %107, %cst_55 {dimension_numbers = #tpu.dot_dimension_numbers<[1], [0], [0], [1], [0, 0, 1, 1], [], []>} : vector<128x32xf32>, vector<32x64xf32>, vector<128x64xf32> -> vector<128x64xf32>
    %109 = arith.addf %102, %108 : vector<128x64xf32>
    %110 = vector.extract_strided_slice %103 {offsets = [0, 1, 0, 0], sizes = [2, 8, 8, 32], strides = [1, 1, 1, 1]} : vector<2x12x8x32xf32> to vector<2x8x8x32xf32>
    %111 = vector.shape_cast %110 : vector<2x8x8x32xf32> to vector<128x32xf32>
    %c8 = arith.constant 8 : index
    %c0_56 = arith.constant 0 : index
    %c0_57 = arith.constant 0 : index
    %112 = vector.load %arg3[%c8, %c0_56, %c0_57] : memref<25x32x64xf32, #tpu.memory_space<vmem>>, vector<1x32x64xf32>
    %113 = vector.shape_cast %112 : vector<1x32x64xf32> to vector<32x64xf32>
    %cst_58 = arith.constant dense<0.000000e+00> : vector<128x64xf32>
    %114 = tpu.matmul %111, %113, %cst_58 {dimension_numbers = #tpu.dot_dimension_numbers<[1], [0], [0], [1], [0, 0, 1, 1], [], []>} : vector<128x32xf32>, vector<32x64xf32>, vector<128x64xf32> -> vector<128x64xf32>
    %115 = arith.addf %109, %114 : vector<128x64xf32>
    %116 = vector.extract_strided_slice %103 {offsets = [0, 2, 0, 0], sizes = [2, 8, 8, 32], strides = [1, 1, 1, 1]} : vector<2x12x8x32xf32> to vector<2x8x8x32xf32>
    %117 = vector.shape_cast %116 : vector<2x8x8x32xf32> to vector<128x32xf32>
    %c13 = arith.constant 13 : index
    %c0_59 = arith.constant 0 : index
    %c0_60 = arith.constant 0 : index
    %118 = vector.load %arg3[%c13, %c0_59, %c0_60] : memref<25x32x64xf32, #tpu.memory_space<vmem>>, vector<1x32x64xf32>
    %119 = vector.shape_cast %118 : vector<1x32x64xf32> to vector<32x64xf32>
    %cst_61 = arith.constant dense<0.000000e+00> : vector<128x64xf32>
    %120 = tpu.matmul %117, %119, %cst_61 {dimension_numbers = #tpu.dot_dimension_numbers<[1], [0], [0], [1], [0, 0, 1, 1], [], []>} : vector<128x32xf32>, vector<32x64xf32>, vector<128x64xf32> -> vector<128x64xf32>
    %121 = arith.addf %115, %120 : vector<128x64xf32>
    %122 = vector.extract_strided_slice %103 {offsets = [0, 3, 0, 0], sizes = [2, 8, 8, 32], strides = [1, 1, 1, 1]} : vector<2x12x8x32xf32> to vector<2x8x8x32xf32>
    %123 = vector.shape_cast %122 : vector<2x8x8x32xf32> to vector<128x32xf32>
    %c18 = arith.constant 18 : index
    %c0_62 = arith.constant 0 : index
    %c0_63 = arith.constant 0 : index
    %124 = vector.load %arg3[%c18, %c0_62, %c0_63] : memref<25x32x64xf32, #tpu.memory_space<vmem>>, vector<1x32x64xf32>
    %125 = vector.shape_cast %124 : vector<1x32x64xf32> to vector<32x64xf32>
    %cst_64 = arith.constant dense<0.000000e+00> : vector<128x64xf32>
    %126 = tpu.matmul %123, %125, %cst_64 {dimension_numbers = #tpu.dot_dimension_numbers<[1], [0], [0], [1], [0, 0, 1, 1], [], []>} : vector<128x32xf32>, vector<32x64xf32>, vector<128x64xf32> -> vector<128x64xf32>
    %127 = arith.addf %121, %126 : vector<128x64xf32>
    %128 = vector.extract_strided_slice %103 {offsets = [0, 4, 0, 0], sizes = [2, 8, 8, 32], strides = [1, 1, 1, 1]} : vector<2x12x8x32xf32> to vector<2x8x8x32xf32>
    %129 = vector.shape_cast %128 : vector<2x8x8x32xf32> to vector<128x32xf32>
    %c23 = arith.constant 23 : index
    %c0_65 = arith.constant 0 : index
    %c0_66 = arith.constant 0 : index
    %130 = vector.load %arg3[%c23, %c0_65, %c0_66] : memref<25x32x64xf32, #tpu.memory_space<vmem>>, vector<1x32x64xf32>
    %131 = vector.shape_cast %130 : vector<1x32x64xf32> to vector<32x64xf32>
    %cst_67 = arith.constant dense<0.000000e+00> : vector<128x64xf32>
    %132 = tpu.matmul %129, %131, %cst_67 {dimension_numbers = #tpu.dot_dimension_numbers<[1], [0], [0], [1], [0, 0, 1, 1], [], []>} : vector<128x32xf32>, vector<32x64xf32>, vector<128x64xf32> -> vector<128x64xf32>
    %133 = arith.addf %127, %132 : vector<128x64xf32>
    %134 = vector.extract_strided_slice %8 {offsets = [0, 0, 4, 0], sizes = [2, 12, 8, 32], strides = [1, 1, 1, 1]} : vector<2x12x16x32xf32> to vector<2x12x8x32xf32>
    %135 = vector.extract_strided_slice %134 {offsets = [0, 0, 0, 0], sizes = [2, 8, 8, 32], strides = [1, 1, 1, 1]} : vector<2x12x8x32xf32> to vector<2x8x8x32xf32>
    %136 = vector.shape_cast %135 : vector<2x8x8x32xf32> to vector<128x32xf32>
    %c4 = arith.constant 4 : index
    %c0_68 = arith.constant 0 : index
    %c0_69 = arith.constant 0 : index
    %137 = vector.load %arg3[%c4, %c0_68, %c0_69] : memref<25x32x64xf32, #tpu.memory_space<vmem>>, vector<1x32x64xf32>
    %138 = vector.shape_cast %137 : vector<1x32x64xf32> to vector<32x64xf32>
    %cst_70 = arith.constant dense<0.000000e+00> : vector<128x64xf32>
    %139 = tpu.matmul %136, %138, %cst_70 {dimension_numbers = #tpu.dot_dimension_numbers<[1], [0], [0], [1], [0, 0, 1, 1], [], []>} : vector<128x32xf32>, vector<32x64xf32>, vector<128x64xf32> -> vector<128x64xf32>
    %140 = arith.addf %133, %139 : vector<128x64xf32>
    %141 = vector.extract_strided_slice %134 {offsets = [0, 1, 0, 0], sizes = [2, 8, 8, 32], strides = [1, 1, 1, 1]} : vector<2x12x8x32xf32> to vector<2x8x8x32xf32>
    %142 = vector.shape_cast %141 : vector<2x8x8x32xf32> to vector<128x32xf32>
    %c9 = arith.constant 9 : index
    %c0_71 = arith.constant 0 : index
    %c0_72 = arith.constant 0 : index
    %143 = vector.load %arg3[%c9, %c0_71, %c0_72] : memref<25x32x64xf32, #tpu.memory_space<vmem>>, vector<1x32x64xf32>
    %144 = vector.shape_cast %143 : vector<1x32x64xf32> to vector<32x64xf32>
    %cst_73 = arith.constant dense<0.000000e+00> : vector<128x64xf32>
    %145 = tpu.matmul %142, %144, %cst_73 {dimension_numbers = #tpu.dot_dimension_numbers<[1], [0], [0], [1], [0, 0, 1, 1], [], []>} : vector<128x32xf32>, vector<32x64xf32>, vector<128x64xf32> -> vector<128x64xf32>
    %146 = arith.addf %140, %145 : vector<128x64xf32>
    %147 = vector.extract_strided_slice %134 {offsets = [0, 2, 0, 0], sizes = [2, 8, 8, 32], strides = [1, 1, 1, 1]} : vector<2x12x8x32xf32> to vector<2x8x8x32xf32>
    %148 = vector.shape_cast %147 : vector<2x8x8x32xf32> to vector<128x32xf32>
    %c14 = arith.constant 14 : index
    %c0_74 = arith.constant 0 : index
    %c0_75 = arith.constant 0 : index
    %149 = vector.load %arg3[%c14, %c0_74, %c0_75] : memref<25x32x64xf32, #tpu.memory_space<vmem>>, vector<1x32x64xf32>
    %150 = vector.shape_cast %149 : vector<1x32x64xf32> to vector<32x64xf32>
    %cst_76 = arith.constant dense<0.000000e+00> : vector<128x64xf32>
    %151 = tpu.matmul %148, %150, %cst_76 {dimension_numbers = #tpu.dot_dimension_numbers<[1], [0], [0], [1], [0, 0, 1, 1], [], []>} : vector<128x32xf32>, vector<32x64xf32>, vector<128x64xf32> -> vector<128x64xf32>
    %152 = arith.addf %146, %151 : vector<128x64xf32>
    %153 = vector.extract_strided_slice %134 {offsets = [0, 3, 0, 0], sizes = [2, 8, 8, 32], strides = [1, 1, 1, 1]} : vector<2x12x8x32xf32> to vector<2x8x8x32xf32>
    %154 = vector.shape_cast %153 : vector<2x8x8x32xf32> to vector<128x32xf32>
    %c19 = arith.constant 19 : index
    %c0_77 = arith.constant 0 : index
    %c0_78 = arith.constant 0 : index
    %155 = vector.load %arg3[%c19, %c0_77, %c0_78] : memref<25x32x64xf32, #tpu.memory_space<vmem>>, vector<1x32x64xf32>
    %156 = vector.shape_cast %155 : vector<1x32x64xf32> to vector<32x64xf32>
    %cst_79 = arith.constant dense<0.000000e+00> : vector<128x64xf32>
    %157 = tpu.matmul %154, %156, %cst_79 {dimension_numbers = #tpu.dot_dimension_numbers<[1], [0], [0], [1], [0, 0, 1, 1], [], []>} : vector<128x32xf32>, vector<32x64xf32>, vector<128x64xf32> -> vector<128x64xf32>
    %158 = arith.addf %152, %157 : vector<128x64xf32>
    %159 = vector.extract_strided_slice %134 {offsets = [0, 4, 0, 0], sizes = [2, 8, 8, 32], strides = [1, 1, 1, 1]} : vector<2x12x8x32xf32> to vector<2x8x8x32xf32>
    %160 = vector.shape_cast %159 : vector<2x8x8x32xf32> to vector<128x32xf32>
    %c24 = arith.constant 24 : index
    %c0_80 = arith.constant 0 : index
    %c0_81 = arith.constant 0 : index
    %161 = vector.load %arg3[%c24, %c0_80, %c0_81] : memref<25x32x64xf32, #tpu.memory_space<vmem>>, vector<1x32x64xf32>
    %162 = vector.shape_cast %161 : vector<1x32x64xf32> to vector<32x64xf32>
    %cst_82 = arith.constant dense<0.000000e+00> : vector<128x64xf32>
    %163 = tpu.matmul %160, %162, %cst_82 {dimension_numbers = #tpu.dot_dimension_numbers<[1], [0], [0], [1], [0, 0, 1, 1], [], []>} : vector<128x32xf32>, vector<32x64xf32>, vector<128x64xf32> -> vector<128x64xf32>
    %164 = arith.addf %158, %163 : vector<128x64xf32>
    %c0_83 = arith.constant 0 : index
    %c0_84 = arith.constant 0 : index
    %165 = vector.load %arg4[%c0_83, %c0_84] : memref<1x64xf32, #tpu.memory_space<vmem>>, vector<1x64xf32>
    %166 = vector.broadcast %165 : vector<1x64xf32> to vector<128x64xf32>
    %167 = arith.addf %164, %166 : vector<128x64xf32>
    %168 = vector.shape_cast %167 : vector<128x64xf32> to vector<2x8x8x64xf32>
    %169 = vector.extract_strided_slice %168 {offsets = [0, 0, 0, 0], sizes = [2, 1, 8, 64], strides = [1, 1, 1, 1]} : vector<2x8x8x64xf32> to vector<2x1x8x64xf32>
    %170 = vector.shape_cast %169 : vector<2x1x8x64xf32> to vector<2x8x64xf32>
    %171 = vector.extract_strided_slice %168 {offsets = [0, 1, 0, 0], sizes = [2, 1, 8, 64], strides = [1, 1, 1, 1]} : vector<2x8x8x64xf32> to vector<2x1x8x64xf32>
    %172 = vector.shape_cast %171 : vector<2x1x8x64xf32> to vector<2x8x64xf32>
    %173 = arith.maximumf %170, %172 : vector<2x8x64xf32>
    %174 = vector.extract_strided_slice %168 {offsets = [0, 2, 0, 0], sizes = [2, 1, 8, 64], strides = [1, 1, 1, 1]} : vector<2x8x8x64xf32> to vector<2x1x8x64xf32>
    %175 = vector.shape_cast %174 : vector<2x1x8x64xf32> to vector<2x8x64xf32>
    %176 = vector.extract_strided_slice %168 {offsets = [0, 3, 0, 0], sizes = [2, 1, 8, 64], strides = [1, 1, 1, 1]} : vector<2x8x8x64xf32> to vector<2x1x8x64xf32>
    %177 = vector.shape_cast %176 : vector<2x1x8x64xf32> to vector<2x8x64xf32>
    %178 = arith.maximumf %175, %177 : vector<2x8x64xf32>
    %179 = arith.maximumf %173, %178 : vector<2x8x64xf32>
    %180 = vector.extract_strided_slice %168 {offsets = [0, 4, 0, 0], sizes = [2, 1, 8, 64], strides = [1, 1, 1, 1]} : vector<2x8x8x64xf32> to vector<2x1x8x64xf32>
    %181 = vector.shape_cast %180 : vector<2x1x8x64xf32> to vector<2x8x64xf32>
    %182 = vector.extract_strided_slice %168 {offsets = [0, 5, 0, 0], sizes = [2, 1, 8, 64], strides = [1, 1, 1, 1]} : vector<2x8x8x64xf32> to vector<2x1x8x64xf32>
    %183 = vector.shape_cast %182 : vector<2x1x8x64xf32> to vector<2x8x64xf32>
    %184 = arith.maximumf %181, %183 : vector<2x8x64xf32>
    %185 = vector.extract_strided_slice %168 {offsets = [0, 6, 0, 0], sizes = [2, 1, 8, 64], strides = [1, 1, 1, 1]} : vector<2x8x8x64xf32> to vector<2x1x8x64xf32>
    %186 = vector.shape_cast %185 : vector<2x1x8x64xf32> to vector<2x8x64xf32>
    %187 = vector.extract_strided_slice %168 {offsets = [0, 7, 0, 0], sizes = [2, 1, 8, 64], strides = [1, 1, 1, 1]} : vector<2x8x8x64xf32> to vector<2x1x8x64xf32>
    %188 = vector.shape_cast %187 : vector<2x1x8x64xf32> to vector<2x8x64xf32>
    %189 = arith.maximumf %186, %188 : vector<2x8x64xf32>
    %190 = arith.maximumf %184, %189 : vector<2x8x64xf32>
    %191 = vector.extract_strided_slice %179 {offsets = [0, 0, 0], sizes = [2, 4, 64], strides = [1, 1, 1]} : vector<2x8x64xf32> to vector<2x4x64xf32>
    %cst_85 = arith.constant dense<0xFF800000> : vector<2x64xf32>
    %192 = vector.multi_reduction <maximumf>, %191, %cst_85 [1] : vector<2x4x64xf32> to vector<2x64xf32>
    %cst_86 = arith.constant 0.000000e+00 : f32
    %193 = vector.broadcast %cst_86 : f32 to vector<2x64xf32>
    %194 = arith.maximumf %192, %193 : vector<2x64xf32>
    %195 = vector.extract_strided_slice %179 {offsets = [0, 4, 0], sizes = [2, 4, 64], strides = [1, 1, 1]} : vector<2x8x64xf32> to vector<2x4x64xf32>
    %cst_87 = arith.constant dense<0xFF800000> : vector<2x64xf32>
    %196 = vector.multi_reduction <maximumf>, %195, %cst_87 [1] : vector<2x4x64xf32> to vector<2x64xf32>
    %cst_88 = arith.constant 0.000000e+00 : f32
    %197 = vector.broadcast %cst_88 : f32 to vector<2x64xf32>
    %198 = arith.maximumf %196, %197 : vector<2x64xf32>
    %199 = vector.extract_strided_slice %190 {offsets = [0, 0, 0], sizes = [2, 4, 64], strides = [1, 1, 1]} : vector<2x8x64xf32> to vector<2x4x64xf32>
    %cst_89 = arith.constant dense<0xFF800000> : vector<2x64xf32>
    %200 = vector.multi_reduction <maximumf>, %199, %cst_89 [1] : vector<2x4x64xf32> to vector<2x64xf32>
    %cst_90 = arith.constant 0.000000e+00 : f32
    %201 = vector.broadcast %cst_90 : f32 to vector<2x64xf32>
    %202 = arith.maximumf %200, %201 : vector<2x64xf32>
    %203 = vector.extract_strided_slice %190 {offsets = [0, 4, 0], sizes = [2, 4, 64], strides = [1, 1, 1]} : vector<2x8x64xf32> to vector<2x4x64xf32>
    %cst_91 = arith.constant dense<0xFF800000> : vector<2x64xf32>
    %204 = vector.multi_reduction <maximumf>, %203, %cst_91 [1] : vector<2x4x64xf32> to vector<2x64xf32>
    %cst_92 = arith.constant 0.000000e+00 : f32
    %205 = vector.broadcast %cst_92 : f32 to vector<2x64xf32>
    %206 = arith.maximumf %204, %205 : vector<2x64xf32>
    %c0_93 = arith.constant 0 : index
    %c0_94 = arith.constant 0 : index
    %c0_95 = arith.constant 0 : index
    %207 = vector.load %arg5[%c0_93, %c0_94, %c0_95] : memref<4x64x200xf32, #tpu.memory_space<vmem>>, vector<1x64x200xf32>
    %208 = vector.shape_cast %207 : vector<1x64x200xf32> to vector<64x200xf32>
    %cst_96 = arith.constant dense<0.000000e+00> : vector<2x200xf32>
    %209 = tpu.matmul %194, %208, %cst_96 {dimension_numbers = #tpu.dot_dimension_numbers<[1], [0], [0], [1], [0, 0, 1, 1], [], []>} : vector<2x64xf32>, vector<64x200xf32>, vector<2x200xf32> -> vector<2x200xf32>
    %c1_97 = arith.constant 1 : index
    %c0_98 = arith.constant 0 : index
    %c0_99 = arith.constant 0 : index
    %210 = vector.load %arg5[%c1_97, %c0_98, %c0_99] : memref<4x64x200xf32, #tpu.memory_space<vmem>>, vector<1x64x200xf32>
    %211 = vector.shape_cast %210 : vector<1x64x200xf32> to vector<64x200xf32>
    %cst_100 = arith.constant dense<0.000000e+00> : vector<2x200xf32>
    %212 = tpu.matmul %198, %211, %cst_100 {dimension_numbers = #tpu.dot_dimension_numbers<[1], [0], [0], [1], [0, 0, 1, 1], [], []>} : vector<2x64xf32>, vector<64x200xf32>, vector<2x200xf32> -> vector<2x200xf32>
    %213 = arith.addf %209, %212 : vector<2x200xf32>
    %c2_101 = arith.constant 2 : index
    %c0_102 = arith.constant 0 : index
    %c0_103 = arith.constant 0 : index
    %214 = vector.load %arg5[%c2_101, %c0_102, %c0_103] : memref<4x64x200xf32, #tpu.memory_space<vmem>>, vector<1x64x200xf32>
    %215 = vector.shape_cast %214 : vector<1x64x200xf32> to vector<64x200xf32>
    %cst_104 = arith.constant dense<0.000000e+00> : vector<2x200xf32>
    %216 = tpu.matmul %202, %215, %cst_104 {dimension_numbers = #tpu.dot_dimension_numbers<[1], [0], [0], [1], [0, 0, 1, 1], [], []>} : vector<2x64xf32>, vector<64x200xf32>, vector<2x200xf32> -> vector<2x200xf32>
    %217 = arith.addf %213, %216 : vector<2x200xf32>
    %c3_105 = arith.constant 3 : index
    %c0_106 = arith.constant 0 : index
    %c0_107 = arith.constant 0 : index
    %218 = vector.load %arg5[%c3_105, %c0_106, %c0_107] : memref<4x64x200xf32, #tpu.memory_space<vmem>>, vector<1x64x200xf32>
    %219 = vector.shape_cast %218 : vector<1x64x200xf32> to vector<64x200xf32>
    %cst_108 = arith.constant dense<0.000000e+00> : vector<2x200xf32>
    %220 = tpu.matmul %206, %219, %cst_108 {dimension_numbers = #tpu.dot_dimension_numbers<[1], [0], [0], [1], [0, 0, 1, 1], [], []>} : vector<2x64xf32>, vector<64x200xf32>, vector<2x200xf32> -> vector<2x200xf32>
    %221 = arith.addf %217, %220 : vector<2x200xf32>
    %c0_109 = arith.constant 0 : index
    %c0_110 = arith.constant 0 : index
    %222 = vector.load %arg6[%c0_109, %c0_110] : memref<1x200xf32, #tpu.memory_space<vmem>>, vector<1x200xf32>
    %223 = vector.broadcast %222 : vector<1x200xf32> to vector<2x200xf32>
    %224 = arith.addf %221, %223 : vector<2x200xf32>
    %cst_111 = arith.constant 0.000000e+00 : f32
    %225 = vector.broadcast %cst_111 : f32 to vector<2x200xf32>
    %226 = arith.maximumf %224, %225 : vector<2x200xf32>
    %c0_112 = arith.constant 0 : index
    %c0_113 = arith.constant 0 : index
    %227 = vector.load %arg7[%c0_112, %c0_113] : memref<200x5xf32, #tpu.memory_space<vmem>>, vector<200x5xf32>
    %cst_114 = arith.constant dense<0.000000e+00> : vector<2x5xf32>
    %228 = tpu.matmul %226, %227, %cst_114 {dimension_numbers = #tpu.dot_dimension_numbers<[1], [0], [0], [1], [0, 0, 1, 1], [], []>} : vector<2x200xf32>, vector<200x5xf32>, vector<2x5xf32> -> vector<2x5xf32>
    %c0_115 = arith.constant 0 : index
    %c0_116 = arith.constant 0 : index
    %229 = vector.load %arg8[%c0_115, %c0_116] : memref<1x5xf32, #tpu.memory_space<vmem>>, vector<1x5xf32>
    %230 = vector.broadcast %229 : vector<1x5xf32> to vector<2x5xf32>
    %231 = arith.addf %228, %230 : vector<2x5xf32>
    %c0_117 = arith.constant 0 : index
    %c0_118 = arith.constant 0 : index
    %232 = vector.load %arg9[%c0_117, %c0_118] : memref<2x5xf32, #tpu.memory_space<vmem>>, vector<2x5xf32>
    tpu.vector_store %arg9[%c0_117, %c0_118], %231 {strides = array<i32>} : memref<2x5xf32, #tpu.memory_space<vmem>>, vector<2x5xf32>,
    return
  }
}

</mosaic_0001>

<bundles_post_ra>
// kernel: _lambda_.1
= control target key start
LH: loop header
LB: loop body
LE: loop exit
PB: predicated region body
PF: predicated region fallthrough
CT: control target
= control target key end

     0   :  { %vm235_vm0 = vcmask 1040384   ;;  %vm90_vm1 = vcmask 72704   ;;  %s11345_s0 = inlined_call_operand.vmem [shape: f32[384,9], index: 0, kind: input, shape index: {}]   ;;  %s11346_s1 = inlined_call_operand.vmem [shape: f32[9,32], index: 1, kind: input, shape index: {}]   ;;  %s11347_s2 = inlined_call_operand.vmem [shape: f32[1,32], index: 2, kind: input, shape index: {}]   ;;  %s11348_s3 = inlined_call_operand.vmem [shape: f32[25,32,64], index: 3, kind: input, shape index: {}]   ;;  %s11349_s4 = inlined_call_operand.vmem [shape: f32[1,64], index: 4, kind: input, shape index: {}]   ;;  %s11350_s5 = inlined_call_operand.vmem [shape: f32[4,64,200], index: 5, kind: input, shape index: {}]   ;;  %s11351_s6 = inlined_call_operand.vmem [shape: f32[1,200], index: 6, kind: input, shape index: {}]   ;;  %s11352_s7 = inlined_call_operand.vmem [shape: f32[200,5], index: 7, kind: input, shape index: {}]   ;;  %s11353_s8 = inlined_call_operand.vmem [shape: f32[1,5], index: 8, kind: input, shape index: {}]   ;;  %s11354_s9 = inlined_call_operand.hbm [shape: f32[2,5], index: 9, kind: output, shape index: {}]  }
   0x1   :  { %v82_v0 = vld [vmem:[%s11346_s1 + $0x8] sm:$0x1]  ;;  %v81_v1 = vld [vmem:[%s11346_s1] sm:$0xff]  ;;  %v35_v4 = vld [vmem:[%s11345_s0 + $0x10] sm:$0xff] }
   0x2   :  { %v33_v2 = vld [vmem:[%s11345_s0] sm:$0xff]  ;;  %7057 = vmatprep.subr.msk.mxu0 %vm235_vm0, %v82_v0  ;;  %v34_v3 = vld [vmem:[%s11345_s0 + $0x8] sm:$0xff]  ;;  %7933 = vmatprep.subr.msk.mxu1 %vm235_vm0, %v82_v0  ;;  %v36_v5 = vld [vmem:[%s11345_s0 + $0x18] sm:$0xff] }
   0x3   :  { %7061 = vmatprep.mubr.msk.f32.mxu0 %vm90_vm1, %v33_v2  ;;  %7058 = vmatpush3.msk.msra.mxu0 %vm235_vm0, %v82_v0  ;;  %v37_v6 = vld [vmem:[%s11345_s0 + $0x20] sm:$0xff]  ;;  %v38_v7 = vld [vmem:[%s11345_s0 + $0x28] sm:$0xff]  ;;  %v39_v8 = vld [vmem:[%s11345_s0 + $0x30] sm:$0xff] }
   0x4   :  { %7059 = vmatprep.subr.mxu0 %v81_v1  ;;  %7935 = vmatpush3.msk.msra.mxu1 %vm235_vm0, %v82_v0  ;;  %v69_v9 = vld [vmem:[%s11345_s0 + $0x120] sm:$0xff]  ;;  %v70_v10 = vld [vmem:[%s11345_s0 + $0x128] sm:$0xff]  ;;  %v71_v11 = vld [vmem:[%s11345_s0 + $0x130] sm:$0xff] }
   0x5   :  { %7060 = vmatpush3.msra.mxu0 %v81_v1  ;;  %7934 = vmatprep.subr.mxu1 %v81_v1  ;;  %v40_v12 = vld [vmem:[%s11345_s0 + $0x38] sm:$0xff]  ;;  %v41_v14 = vld [vmem:[%s11345_s0 + $0x40] sm:$0xff] }
   0x6   :  { %7062 = vmatmul.mubr.msk.f32.vlgmr.msra.gmra.mxu0 %vm90_vm1, %v34_v3  ;;  %7936 = vmatpush3.msra.mxu1 %v81_v1  ;;  %v72_v13 = vld [vmem:[%s11345_s0 + $0x138] sm:$0xff]  ;;  %v73_v15 = vld [vmem:[%s11345_s0 + $0x140] sm:$0xff] }
   0x7   :  { %7064 = vmatprep.mubr.msk.f32.mxu0 %vm90_vm1, %v35_v4  ;;  %7115 = vmatprep.mubr.msk.f32.mxu1 %vm90_vm1, %v69_v9 }
   0x8   :  { %7116 = vmatmul.mubr.msk.f32.vlgmr.msra.gmra.mxu1 %vm90_vm1, %v70_v10 }
   0x9   :  { %7118 = vmatprep.mubr.msk.f32.mxu1 %vm90_vm1, %v71_v11 }
   0xa   :  { %7065 = vmatmul.mubr.msk.f32.gmra.mxu0 %vm90_vm1, %v36_v5 }
   0xb   :  { %7067 = vmatprep.mubr.msk.f32.mxu0 %vm90_vm1, %v37_v6 }
   0xe   :  { %7068 = vmatmul.mubr.msk.f32.gmra.mxu0 %vm90_vm1, %v38_v7 }
   0xf   :  { %7070 = vmatprep.mubr.msk.f32.mxu0 %vm90_vm1, %v39_v8 }
  0x10   :  { %14 = vsyncpa [#allocation3], 0  ;;  %7119 = vmatmul.mubr.msk.f32.gmra.mxu1 %vm90_vm1, %v72_v13  ;;  %v42_v16 = vld [vmem:[%s11345_s0 + $0x48] sm:$0xff]  ;;  %v43_v18 = vld [vmem:[%s11345_s0 + $0x50] sm:$0xff]  ;;  %vm601_vm2 = vcmask 261120   ;;  %vm2437_vm3 = vcmask 1045504  }
  0x11   :  { %7121 = vmatprep.mubr.msk.f32.mxu1 %vm90_vm1, %v73_v15  ;;  %v74_v17 = vld [vmem:[%s11345_s0 + $0x148] sm:$0xff]  ;;  %v75_v19 = vld [vmem:[%s11345_s0 + $0x150] sm:$0xff]  ;;  %v44_v20 = vld [vmem:[%s11345_s0 + $0x58] sm:$0xff]  ;;  %vm3388_vm4 = vcmask 1044480   ;;  %vm1478_vm5 = vcmask 1046528   ;;  %vm4339_vm6 = vcmask 1043456  }
  0x12   :  { %7071 = vmatmul.mubr.msk.f32.gmra.mxu0 %vm90_vm1, %v40_v12  ;;  %v76_v21 = vld [vmem:[%s11345_s0 + $0x158] sm:$0xff]  ;;  %v45_v22 = vld [vmem:[%s11345_s0 + $0x60] sm:$0xff]  ;;  %v46_v24 = vld [vmem:[%s11345_s0 + $0x68] sm:$0xff]  ;;  %vm5325_vm7 = vcmask 519168   ;;  %vm5342_vm8 = vcmask 523268   ;;  %vm5426_vm9 = vcmask 1041409  }
  0x13   :  { %7073 = vmatprep.mubr.msk.f32.mxu0 %vm90_vm1, %v41_v14  ;;  %v77_v23 = vld [vmem:[%s11345_s0 + $0x160] sm:$0xff]  ;;  %v78_v25 = vld [vmem:[%s11345_s0 + $0x168] sm:$0xff]  ;;  %v47_v26 = vld [vmem:[%s11345_s0 + $0x70] sm:$0xff]  ;;  %vm5428_vm10 = vcmask 523264   ;;  %vm5816_vm11 = vcmask 588800   ;;  %vm5890_vm12 = vcmask 33792  }
  0x14   :  { %7122 = vmatmul.mubr.msk.f32.gmra.mxu1 %vm90_vm1, %v74_v17  ;;  %v79_v27 = vld [vmem:[%s11345_s0 + $0x170] sm:$0xff]  ;;  %v48_v28 = vld [vmem:[%s11345_s0 + $0x78] sm:$0xff]  ;;  %v49_v30 = vld [vmem:[%s11345_s0 + $0x80] sm:$0xff] }
  0x15   :  { %7124 = vmatprep.mubr.msk.f32.mxu1 %vm90_vm1, %v75_v19  ;;  %v80_v29 = vld [vmem:[%s11345_s0 + $0x178] sm:$0xff]  ;;  %v50_v31 = vld [vmem:[%s11345_s0 + $0x88] sm:$0xff]  ;;  %v51_v32 = vld [vmem:[%s11345_s0 + $0x90] sm:$0xff] }
  0x16   :  { %7074 = vmatmul.mubr.msk.f32.gmra.mxu0 %vm90_vm1, %v42_v16  ;;  %v52_v33 = vld [vmem:[%s11345_s0 + $0x98] sm:$0xff]  ;;  %v53_v34 = vld [vmem:[%s11345_s0 + $0xa0] sm:$0xff]  ;;  %v54_v35 = vld [vmem:[%s11345_s0 + $0xa8] sm:$0xff] }
  0x17   :  { %7076 = vmatprep.mubr.msk.f32.mxu0 %vm90_vm1, %v43_v18  ;;  %v55_v36 = vld [vmem:[%s11345_s0 + $0xb0] sm:$0xff]  ;;  %v56_v37 = vld [vmem:[%s11345_s0 + $0xb8] sm:$0xff]  ;;  %v57_v38 = vld [vmem:[%s11345_s0 + $0xc0] sm:$0xff] }
  0x18   :  { %7125 = vmatmul.mubr.msk.f32.gmra.mxu1 %vm90_vm1, %v76_v21  ;;  %v58_v39 = vld [vmem:[%s11345_s0 + $0xc8] sm:$0xff]  ;;  %v59_v40 = vld [vmem:[%s11345_s0 + $0xd0] sm:$0xff]  ;;  %v60_v41 = vld [vmem:[%s11345_s0 + $0xd8] sm:$0xff] }
  0x19   :  { %7127 = vmatprep.mubr.msk.f32.mxu1 %vm90_vm1, %v77_v23  ;;  %v61_v42 = vld [vmem:[%s11345_s0 + $0xe0] sm:$0xff]  ;;  %v62_v43 = vld [vmem:[%s11345_s0 + $0xe8] sm:$0xff]  ;;  %v63_v44 = vld [vmem:[%s11345_s0 + $0xf0] sm:$0xff] }
  0x1a   :  { %7077 = vmatmul.mubr.msk.f32.gmra.mxu0 %vm90_vm1, %v44_v20  ;;  %v64_v45 = vld [vmem:[%s11345_s0 + $0xf8] sm:$0xff]  ;;  %v65_v46 = vld [vmem:[%s11345_s0 + $0x100] sm:$0xff]  ;;  %v66_v47 = vld [vmem:[%s11345_s0 + $0x108] sm:$0xff] }
  0x1b   :  { %7079 = vmatprep.mubr.msk.f32.mxu0 %vm90_vm1, %v45_v22  ;;  %v67_v48 = vld [vmem:[%s11345_s0 + $0x110] sm:$0xff]  ;;  %v68_v49 = vld [vmem:[%s11345_s0 + $0x118] sm:$0xff]  ;;  %v5957_v52 = vld [vmem:[%s11348_s3 + $0xa8] sm:$0xff] }
  0x1c   :  { %7128 = vmatmul.mubr.msk.f32.gmra.mxu1 %vm90_vm1, %v78_v25  ;;  %v5959_v50 = vld [vmem:[%s11348_s3 + $0xb8] sm:$0xff]  ;;  %v5958_v51 = vld [vmem:[%s11348_s3 + $0xb0] sm:$0xff]  ;;  %v5956_v53 = vld [vmem:[%s11348_s3 + $0xa0] sm:$0xff] }
  0x1d   :  { %7130 = vmatprep.mubr.msk.f32.mxu1 %vm90_vm1, %v79_v27  ;;  %7133 = vmatprep.subr.mxu1 %v5959_v50  ;;  %v6015_v54 = vld [vmem:[%s11348_s3 + $0x1f8] sm:$0xff]  ;;  %v6014_v55 = vld [vmem:[%s11348_s3 + $0x1f0] sm:$0xff]  ;;  %v6013_v56 = vld [vmem:[%s11348_s3 + $0x1e8] sm:$0xff] }
  0x1e   :  { %7080 = vmatmul.mubr.msk.f32.gmra.mxu0 %vm90_vm1, %v46_v24  ;;  %7134 = vmatpush3.msra.mxu1 %v5959_v50  ;;  %v6012_v57 = vld [vmem:[%s11348_s3 + $0x1e0] sm:$0xff]  ;;  %v595_v58 = vld [vmem:[%s11348_s3 + $0x18] sm:$0xff]  ;;  %v594_v9 = vld [vmem:[%s11348_s3 + $0x10] sm:$0xff] }
  0x1f   :  { %7082 = vmatprep.mubr.msk.f32.mxu0 %vm90_vm1, %v47_v26  ;;  %7135 = vmatprep.subr.mxu1 %v5958_v51  ;;  %v6055_v59 = vld [vmem:[%s11348_s3 + $0x38] sm:$0xff]  ;;  %v8250_v63 = vld [vmem:[%s11347_s2] ss:$0 sm:$0xff]  ;;  %v593_v13 = vld [vmem:[%s11348_s3 + $0x8] sm:$0xff] }
  0x20   :  { %7131 = vmatmul.mubr.msk.f32.gmra.mxu1 %vm90_vm1, %v80_v29  ;;  %7229 = vmatprep.subr.mxu0 %v6015_v54  ;;  %v592_v16 = vld [vmem:[%s11348_s3] sm:$0xff]  ;;  %v8292_v20 = vld [vmem:[%s11348_s3 + $0x158] sm:$0xff]  ;;  %v6054_v22 = vld [vmem:[%s11348_s3 + $0x30] sm:$0xff] }
  0x21   :  { %7136 = vmatpush3.msra.mxu1 %v5958_v51  ;;  %7230 = vmatpush3.msra.mxu0 %v6015_v54  ;;  %v6053_v26 = vld [vmem:[%s11348_s3 + $0x28] sm:$0xff]  ;;  %v6052_v29 = vld [vmem:[%s11348_s3 + $0x20] sm:$0xff] }
  0x22   :  { %7083 = vmatmul.mubr.msk.f32.gmra.mxu0 %vm90_vm1, %v48_v28  ;;  %7137 = vmatprep.subr.mxu1 %v5957_v52 }
  0x23   :  { %7085 = vmatprep.mubr.msk.f32.mxu0 %vm90_vm1, %v49_v30  ;;  %7138 = vmatpush3.msra.mxu1 %v5957_v52 }
  0x24   :  { %7139 = vmatprep.subr.mxu1 %v5956_v53  ;;  %7231 = vmatprep.subr.mxu0 %v6014_v55 }
  0x25   :  { %7140 = vmatpush3.msra.mxu1 %v5956_v53  ;;  %7232 = vmatpush3.msra.mxu0 %v6014_v55 }
  0x26   :  { %7086 = vmatmul.mubr.msk.f32.gmra.mxu0 %vm90_vm1, %v50_v31  ;;  %7233 = vmatprep.subr.mxu0 %v6013_v56 }
  0x27   :  { %7088 = vmatprep.mubr.msk.f32.mxu0 %vm90_vm1, %v51_v32  ;;  %7234 = vmatpush3.msra.mxu0 %v6013_v56 }
  0x28   :  { %7235 = vmatprep.subr.mxu0 %v6012_v57  ;;  %7165 = vmatprep.subr.mxu1 %v595_v58 }
  0x29   :  { %7236 = vmatpush3.msra.mxu0 %v6012_v57 }
  0x2a   :  { %7089 = vmatmul.mubr.msk.f32.gmra.mxu0 %vm90_vm1, %v52_v33  ;;  %7293 = vmatprep.subr.mxu0 %v6055_v59  ;;  %v8326_v33 = vld [vmem:[%s11348_s3 + $0x178] sm:$0xff] }
  0x2b   :  { %7091 = vmatprep.mubr.msk.f32.mxu0 %vm90_vm1, %v53_v34 }
  0x2e   :  { %7092 = vmatmul.mubr.msk.f32.gmra.mxu0 %vm90_vm1, %v54_v35 }
  0x2f   :  { %7094 = vmatprep.mubr.msk.f32.mxu0 %vm90_vm1, %v55_v36 }
  0x32   :  { %7095 = vmatmul.mubr.msk.f32.gmra.mxu0 %vm90_vm1, %v56_v37 }
  0x33   :  { %7097 = vmatprep.mubr.msk.f32.mxu0 %vm90_vm1, %v57_v38 }
  0x36   :  { %7098 = vmatmul.mubr.msk.f32.gmra.mxu0 %vm90_vm1, %v58_v39 }
  0x37   :  { %7100 = vmatprep.mubr.msk.f32.mxu0 %vm90_vm1, %v59_v40 }
  0x3a   :  { %7101 = vmatmul.mubr.msk.f32.gmra.mxu0 %vm90_vm1, %v60_v41 }
  0x3b   :  { %7103 = vmatprep.mubr.msk.f32.mxu0 %vm90_vm1, %v61_v42 }
  0x3e   :  { %7104 = vmatmul.mubr.msk.f32.gmra.mxu0 %vm90_vm1, %v62_v43 }
  0x3f   :  { %7106 = vmatprep.mubr.msk.f32.mxu0 %vm90_vm1, %v63_v44 }
  0x42   :  { %7107 = vmatmul.mubr.msk.f32.gmra.mxu0 %vm90_vm1, %v64_v45 }
  0x43   :  { %7109 = vmatprep.mubr.msk.f32.mxu0 %vm90_vm1, %v65_v46 }
  0x46   :  { %7110 = vmatmul.mubr.msk.f32.gmra.mxu0 %vm90_vm1, %v66_v47 }
  0x47   :  { %7112 = vmatprep.mubr.msk.f32.mxu0 %vm90_vm1, %v67_v48 }
  0x4a   :  { %7113 = vmatmul.mubr.msk.f32.gmra.mxu0 %vm90_vm1, %v68_v49 }
  0xc6   :  { %v8241_v60 = vpop.f32.mrf.mxu0 }
  0xc8   :  { %v8243_v61 = vpop.f32.mrf.mxu0  ;;  %v8346_v40 = vpop.f32.mrf.mxu1 }
  0xca   :  { %v8245_v62 = vpop.f32.mrf.mxu0  ;;  %v485_v45 = vpop.f32.mrf.mxu1 }
  0xcc   :  { %v315_v0 = vpop.f32.mrf.mxu0 }
  0xcd   :  { %v316_v1 = vadd.f32 %v8250_v63, %v315_v0 }
  0xce   :  { %v8253_v2 = vpop.f32.mrf.mxu0 }
  0xcf   :  { %v8255_v3 = vmax.f32 %v316_v1, 0.0 }
  0xd0   :  { %v325_v4 = vpop.f32.mrf.mxu0  ;;  %v8364_v50 = vpop.f32.mrf.mxu1 }
  0xd1   :  { %11446 = vst [vmem:[#allocation5_spill] sm:$0xff] %v8255_v3  ;;  %v326_v5 = vadd.f32 %v8250_v63, %v325_v4  ;;  %7141 = vmatprep.mubr.msk.f32.mxu1 %vm601_vm2, %v8255_v3 }
  0xd2   :  { %v8260_v6 = vpop.f32.mrf.mxu0  ;;  %v495_v53 = vpop.f32.mrf.mxu1 }
  0xd3   :  { %v8262_v7 = vmax.f32 %v326_v5, 0.0 }
  0xd4   :  { %v335_v8 = vpop.f32.mrf.mxu0  ;;  %v8371_v57 = vpop.f32.mrf.mxu1 }
  0xd5   :  { %11447 = vst [vmem:[#allocation6_spill] sm:$0xff] %v8262_v7  ;;  %v336_v10 = vadd.f32 %v8250_v63, %v335_v8  ;;  %7142 = vmatmul.mubr.msk.f32.vlgmr.msra.gmra.mxu1 %vm601_vm2, %v8262_v7 }
  0xd6   :  { %v8270_v11 = vpop.f32.mrf.mxu0  ;;  %7166 = vmatpush3.msra.mxu1 %v595_v58  ;;  %v505_v5 = vpop.f32.mrf.mxu1 }
  0xd7   :  { %v8272_v12 = vmax.f32 %v336_v10, 0.0  ;;  %7167 = vmatprep.subr.mxu1 %v594_v9 }
  0xd8   :  { %v345_v14 = vpop.f32.mrf.mxu0  ;;  %7168 = vmatpush3.msra.mxu1 %v594_v9 }
  0xd9   :  { %11448 = vst [vmem:[#allocation7_spill] sm:$0xff] %v8272_v12  ;;  %v346_v15 = vadd.f32 %v8250_v63, %v345_v14  ;;  %7144 = vmatprep.mubr.msk.f32.mxu1 %vm601_vm2, %v8272_v12  ;;  %7237 = vmatprep.mubr.msk.f32.mxu0 %vm601_vm2, %v8272_v12 }
  0xda   :  { %v8285_v17 = vpop.f32.mrf.mxu0  ;;  %7169 = vmatprep.subr.mxu1 %v593_v13 }
  0xdb   :  { %7170 = vmatpush3.msra.mxu1 %v593_v13  ;;  %v8287_v18 = vmax.f32 %v346_v15, 0.0 }
  0xdc   :  { %v355_v19 = vpop.f32.mrf.mxu0  ;;  %7171 = vmatprep.subr.mxu1 %v592_v16 }
  0xdd   :  { %11449 = vst [vmem:[#allocation8_spill] sm:$0xff] %v8287_v18  ;;  %v356_v21 = vadd.f32 %v8250_v63, %v355_v19  ;;  %7172 = vmatpush3.msra.mxu1 %v592_v16  ;;  %7238 = vmatmul.mubr.msk.f32.vlgmr.msra.gmra.mxu0 %vm601_vm2, %v8287_v18  ;;  %v8389_v16 = vpop.f32.mrf.mxu1 }
  0xde   :  { %7145 = vmatmul.mubr.msk.f32.gmra.mxu1 %vm601_vm2, %v8287_v18  ;;  %v8302_v23 = vpop.f32.mrf.mxu0  ;;  %7294 = vmatpush3.msra.mxu0 %v6055_v59 }
  0xdf   :  { %v8304_v24 = vmax.f32 %v356_v21, 0.0  ;;  %7197 = vmatprep.subr.mxu1 %v8292_v20  ;;  %7295 = vmatprep.subr.mxu0 %v6054_v22 }
  0xe0   :  { %v365_v25 = vpop.f32.mrf.mxu0  ;;  %7296 = vmatpush3.msra.mxu0 %v6054_v22 }
  0xe1   :  { %11450 = vst [vmem:[#allocation9_spill] sm:$0xff] %v8304_v24  ;;  %v366_v27 = vadd.f32 %v8250_v63, %v365_v25  ;;  %7147 = vmatprep.mubr.msk.f32.mxu1 %vm601_vm2, %v8304_v24  ;;  %7240 = vmatprep.mubr.msk.f32.mxu0 %vm601_vm2, %v8304_v24 }
  0xe2   :  { %v8315_v28 = vpop.f32.mrf.mxu0  ;;  %7297 = vmatprep.subr.mxu0 %v6053_v26 }
  0xe3   :  { %v8320_v30 = vmax.f32 %v366_v27, 0.0  ;;  %7298 = vmatpush3.msra.mxu0 %v6053_v26 }
  0xe4   :  { %v375_v31 = vpop.f32.mrf.mxu0  ;;  %7299 = vmatprep.subr.mxu0 %v6052_v29 }
  0xe5   :  { %11451 = vst [vmem:[#allocation10_spill] sm:$0xff] %v8320_v30  ;;  %v376_v32 = vadd.f32 %v8250_v63, %v375_v31  ;;  %7148 = vmatmul.mubr.msk.f32.gmra.mxu1 %vm601_vm2, %v8320_v30  ;;  %7241 = vmatmul.mubr.msk.f32.gmra.mxu0 %vm601_vm2, %v8320_v30 }
  0xe6   :  { %v8332_v34 = vpop.f32.mrf.mxu0  ;;  %7300 = vmatpush3.msra.mxu0 %v6052_v29  ;;  %v515_v29 = vpop.f32.mrf.mxu1 }
  0xe7   :  { %v8334_v35 = vmax.f32 %v376_v32, 0.0  ;;  %7357 = vmatprep.subr.mxu0 %v8326_v33 }
  0xe8   :  { %v385_v36 = vpop.f32.mrf.mxu0 }
  0xe9   :  { %11452 = vst [vmem:[#allocation11_spill] sm:$0xff] %v8334_v35  ;;  %v386_v37 = vadd.f32 %v8250_v63, %v385_v36  ;;  %7150 = vmatprep.mubr.msk.f32.mxu1 %vm601_vm2, %v8334_v35  ;;  %7243 = vmatprep.mubr.msk.f32.mxu0 %vm601_vm2, %v8334_v35 }
  0xea   :  { %v8342_v38 = vpop.f32.mrf.mxu0 }
  0xeb   :  { %v8344_v39 = vmax.f32 %v386_v37, 0.0 }
  0xec   :  { %v395_v41 = vpop.f32.mrf.mxu0 }
  0xed   :  { %11453 = vst [vmem:[#allocation12_spill] sm:$0xff] %v8344_v39  ;;  %v396_v42 = vadd.f32 %v8250_v63, %v395_v41  ;;  %7151 = vmatmul.mubr.msk.f32.gmra.mxu1 %vm601_vm2, %v8344_v39  ;;  %7244 = vmatmul.mubr.msk.f32.gmra.mxu0 %vm601_vm2, %v8344_v39 }
  0xee   :  { %v8353_v43 = vpop.f32.mrf.mxu0 }
  0xef   :  { %v8355_v44 = vmax.f32 %v396_v42, 0.0  ;;  %v8412_v42 = vpop.f32.mrf.mxu1 }
  0xf0   :  { %v405_v46 = vpop.f32.mrf.mxu0 }
  0xf1   :  { %11454 = vst [vmem:[#allocation13_spill] sm:$0xff] %v8355_v44  ;;  %v406_v47 = vadd.f32 %v8250_v63, %v405_v46  ;;  %7246 = vmatprep.mubr.msk.f32.mxu0 %vm601_vm2, %v8355_v44 }
  0xf2   :  { %v8360_v48 = vpop.f32.mrf.mxu0 }
  0xf3   :  { %v8362_v49 = vmax.f32 %v406_v47, 0.0  ;;  %v486_v47 = vadd.f32 %v8250_v63, %v485_v45  ;;  %v516_v45 = vadd.f32 %v8250_v63, %v515_v29 }
  0xf4   :  { %v8366_v51 = vpop.f32.mrf.mxu0 }
  0xf5   :  { %11455 = vst [vmem:[#allocation14_spill] sm:$0xff] %v8362_v49  ;;  %7247 = vmatmul.mubr.msk.f32.gmra.mxu0 %vm601_vm2, %v8362_v49 }
  0xf6   :  { %v7099_v52 = vpop.f32.mrf.mxu0 }
  0xf7   :  { %v431_v31 = vadd.f32 %v7099_v52, %v8250_v63 }
  0xf8   :  { %v425_v54 = vpop.f32.mrf.mxu0 }
  0xf9   :  { %v426_v25 = vadd.f32 %v8250_v63, %v425_v54  ;;  %v8414_v46 = vmax.f32 %v431_v31, 0.0 }
  0xfa   :  { %v7102_v55 = vpop.f32.mrf.mxu0 }
  0xfb   :  { %v441_v56 = vadd.f32 %v7102_v55, %v8250_v63  ;;  %v8408_v37 = vmax.f32 %v426_v25, 0.0  ;;  %v306_v55 = vadd.f32 %v8250_v63, %v8243_v61  ;;  %v506_v61 = vadd.f32 %v8250_v63, %v505_v5 }
  0xfc   :  { %v435_v58 = vpop.f32.mrf.mxu0  ;;  %v321_v25 = vadd.f32 %v8245_v62, %v8250_v63  ;;  %v3414_v62 = vrot.slane %v8414_v46, 3 }
  0xfd   :  { %v436_v59 = vadd.f32 %v8250_v63, %v435_v58  ;;  %v8374_v0 = vmax.f32 %v441_v56, 0.0  ;;  %v496_v56 = vadd.f32 %v8250_v63, %v495_v53  ;;  %v2463_v53 = vrot.slane %v8414_v46, 2 }
  0xfe   :  { %v8376_v1 = vpop.f32.mrf.mxu0  ;;  %v3413_v29 = vrot.slane %v8408_v37, 3 }
  0xff   :  { %v8378_v4 = vmax.f32 %v436_v59, 0.0  ;;  %v2466_v14 = vrot.slane %v8374_v0, 2  ;;  %v2462_v59 = vrot.slane %v8408_v37, 2  ;;  %v3417_v31 = vrot.slane %v8374_v0, 3 }
 0x100   :  { %v445_v8 = vpop.f32.mrf.mxu0 }
 0x101   :  { %v446_v9 = vadd.f32 %v8250_v63, %v445_v8  ;;  %7153 = vmatprep.mubr.msk.f32.mxu1 %vm601_vm2, %v8378_v4  ;;  %v2465_v10 = vrot.slane %v8378_v4, 2  ;;  %v8453_v5 = vsel %vm2437_vm3, %v2462_v59, %v2463_v53  ;;  %v341_v59 = vadd.f32 %v8260_v6, %v8250_v63 }
 0x102   :  { %v8384_v13 = vpop.f32.mrf.mxu0  ;;  %11464 = vst [vmem:[#allocation23_spill] sm:$0xff] %v8453_v5  ;;  %v351_v6 = vadd.f32 %v8270_v11, %v8250_v63  ;;  %v5992_v5 = vld [vmem:[%s11348_s3 + $0x140] sm:$0xff] }
 0x103   :  { %v8387_v15 = vmax.f32 %v446_v9, 0.0  ;;  %v8392_v21 = vsel %vm2437_vm3, %v2465_v10, %v2466_v14  ;;  %v525_v9 = vpop.f32.mrf.mxu1  ;;  %v8431_v10 = vmax.f32 %v486_v47, 0.0  ;;  %v311_v14 = vadd.f32 %v8241_v60, %v8250_v63 }
 0x104   :  { %v455_v19 = vpop.f32.mrf.mxu0  ;;  %11457 = vst [vmem:[#allocation16_spill] sm:$0xff] %v8392_v21  ;;  %v526_v60 = vadd.f32 %v8250_v63, %v525_v9  ;;  %v331_v47 = vadd.f32 %v8253_v2, %v8250_v63  ;;  %v8485_v2 = vmax.f32 %v321_v25, 0.0  ;;  %v5994_v25 = vld [vmem:[%s11348_s3 + $0x150] sm:$0xff]  ;;  %v1504_v21 = vrot.slane %v8414_v46, 1 }
 0x105   :  { %11456 = vst [vmem:[#allocation15_spill] sm:$0xff] %v8387_v15  ;;  %v456_v22 = vadd.f32 %v8250_v63, %v455_v19  ;;  %7154 = vmatmul.mubr.msk.f32.gmra.mxu1 %vm601_vm2, %v8387_v15  ;;  %11461 = vst [vmem:[#allocation20_spill] sm:$0xff] %v8431_v10  ;;  %v8437_v19 = vmax.f32 %v306_v55, 0.0  ;;  %v8469_v55 = vmax.f32 %v311_v14, 0.0  ;;  %v1482_v14 = vrot.slane %v8255_v3, 1 }
 0x106   :  { %v8398_v26 = vpop.f32.mrf.mxu0  ;;  %11471 = vst [vmem:[#allocation30_spill] sm:$0xff] %v8485_v2  ;;  %v1483_v11 = vrot.slane %v8485_v2, 1 }
 0x107   :  { %v8400_v27 = vmax.f32 %v456_v22, 0.0  ;;  %11462 = vst [vmem:[#allocation21_spill] sm:$0xff] %v8437_v19  ;;  %v8439_v22 = vmax.f32 %v496_v56, 0.0  ;;  %11467 = vst [vmem:[#allocation26_spill] sm:$0xff] %v8469_v55  ;;  %v8472_v56 = vsel %vm3388_vm4, %v3413_v29, %v3414_v62  ;;  %v1479_v9 = vrot.slane %v8437_v19, 1 }
 0x108   :  { %v465_v32 = vpop.f32.mrf.mxu0  ;;  %11468 = vst [vmem:[#allocation27_spill] sm:$0xff] %v8472_v56  ;;  %v1480_v53 = vrot.slane %v8469_v55, 1  ;;  %v1485_v29 = vrot.slane %v8262_v7, 1  ;;  %v1494_v56 = vrot.slane %v8304_v24, 1 }
 0x109   :  { %11458 = vst [vmem:[#allocation17_spill] sm:$0xff] %v8400_v27  ;;  %v466_v36 = vadd.f32 %v8250_v63, %v465_v32  ;;  %7156 = vmatprep.mubr.msk.f32.mxu1 %vm601_vm2, %v8400_v27  ;;  %7249 = vmatprep.mubr.msk.f32.mxu0 %vm601_vm2, %v8400_v27  ;;  %11463 = vst [vmem:[#allocation22_spill] sm:$0xff] %v8439_v22  ;;  %v8457_v32 = vmax.f32 %v516_v45, 0.0  ;;  %v8479_v45 = vmax.f32 %v526_v60, 0.0  ;;  %v8501_v60 = vmax.f32 %v341_v59, 0.0 }
 0x10a   :  { %v8410_v41 = vpop.f32.mrf.mxu0  ;;  %v1481_v62 = vsel %vm1478_vm5, %v1479_v9, %v1480_v53  ;;  %v6094_v53 = vld [vmem:[%s11348_s3 + $0x170] sm:$0xff] }
 0x10b   :  { %v8417_v52 = vmax.f32 %v466_v36, 0.0  ;;  %11465 = vst [vmem:[#allocation24_spill] sm:$0xff] %v8457_v32  ;;  %v3416_v36 = vrot.slane %v8378_v4, 3  ;;  %11470 = vst [vmem:[#allocation29_spill] sm:$0xff] %v8479_v45  ;;  %v1489_v9 = vrot.slane %v8501_v60, 1 }
 0x10c   :  { %v475_v54 = vpop.f32.mrf.mxu0  ;;  %11473 = vst [vmem:[#allocation32_spill] sm:$0xff] %v8501_v60 }
 0x10d   :  { %11459 = vst [vmem:[#allocation18_spill] sm:$0xff] %v8417_v52  ;;  %v476_v58 = vadd.f32 %v8250_v63, %v475_v54  ;;  %7157 = vmatmul.mubr.msk.f32.gmra.mxu1 %vm601_vm2, %v8417_v52  ;;  %7250 = vmatmul.mubr.msk.f32.gmra.mxu0 %vm601_vm2, %v8417_v52  ;;  %v8467_v54 = vmax.f32 %v506_v61, 0.0  ;;  %v8492_v61 = vmax.f32 %v331_v47, 0.0  ;;  %v371_v47 = vadd.f32 %v8302_v23, %v8250_v63 }
 0x10f   :  { %v8428_v8 = vmax.f32 %v476_v58, 0.0  ;;  %11466 = vst [vmem:[#allocation25_spill] sm:$0xff] %v8467_v54  ;;  %v8475_v58 = vsel %vm3388_vm4, %v3416_v36, %v3417_v31  ;;  %11472 = vst [vmem:[#allocation31_spill] sm:$0xff] %v8492_v61  ;;  %v361_v31 = vadd.f32 %v8285_v17, %v8250_v63  ;;  %v8515_v36 = vmax.f32 %v351_v6, 0.0 }
 0x110   :  { %11469 = vst [vmem:[#allocation28_spill] sm:$0xff] %v8475_v58  ;;  %v1486_v59 = vrot.slane %v8492_v61, 1  ;;  %v8522_v58 = vsel %vm1478_vm5, %v1482_v14, %v1483_v11  ;;  %v1488_v17 = vrot.slane %v8272_v12, 1  ;;  %v1491_v6 = vrot.slane %v8287_v18, 1 }
 0x111   :  { %11460 = vst [vmem:[#allocation19_spill] sm:$0xff] %v8428_v8  ;;  %7159 = vmatprep.mubr.msk.f32.mxu1 %vm601_vm2, %v8428_v8  ;;  %7252 = vmatprep.mubr.msk.f32.mxu0 %vm601_vm2, %v8428_v8  ;;  %11474 = vst [vmem:[#allocation33_spill] sm:$0xff] %v8515_v36  ;;  %v8540_v14 = vmax.f32 %v361_v31, 0.0  ;;  %v421_v11 = vadd.f32 %v8360_v48, %v8250_v63  ;;  %v416_v31 = vadd.f32 %v8250_v63, %v8366_v51 }
 0x112   :  { %7160 = vmatmul.mubr.msk.f32.gmra.mxu1 %vm601_vm2, %v8431_v10  ;;  %7253 = vmatmul.mubr.msk.f32.gmra.mxu0 %vm601_vm2, %v8431_v10  ;;  %v8533_v23 = vsel %vm1478_vm5, %v1485_v29, %v1486_v59  ;;  %v4367_v29 = vrot.slane %v8378_v4, 4  ;;  %v8552_v59 = vmax.f32 %v371_v47, 0.0  ;;  %v8559_v48 = vsel %vm1478_vm5, %v1488_v17, %v1489_v9  ;;  %v6093_v47 = vld [vmem:[%s11348_s3 + $0x168] sm:$0xff] }
 0x113   :  { %7162 = vmatprep.mubr.msk.f32.mxu1 %vm601_vm2, %v8439_v22  ;;  %7255 = vmatprep.mubr.msk.f32.mxu0 %vm601_vm2, %v8439_v22  ;;  %11475 = vst [vmem:[#allocation34_spill] sm:$0xff] %v8540_v14  ;;  %v1497_v51 = vrot.slane %v8320_v30, 1  ;;  %v8582_v55 = vmax.f32 %v421_v11, 0.0  ;;  %v1500_v11 = vrot.slane %v8334_v35, 1 }
 0x114   :  { %11476 = vst [vmem:[#allocation35_spill] sm:$0xff] %v8552_v59 }
 0x115   :  { %11479 = vst [vmem:[#allocation38_spill] sm:$0xff] %v8582_v55 }
 0x116   :  { %7163 = vmatmul.mubr.msk.f32.gmra.mxu1 %vm601_vm2, %v8467_v54  ;;  %7256 = vmatmul.mubr.msk.f32.gmra.mxu0 %vm601_vm2, %v8467_v54 }
 0x117   :  { %7173 = vmatprep.mubr.msk.f32.mxu1 %vm601_vm2, %v8437_v19  ;;  %7258 = vmatprep.mubr.msk.f32.mxu0 %vm601_vm2, %v8457_v32  ;;  %v471_v19 = vadd.f32 %v8398_v26, %v8250_v63 }
 0x11a   :  { %7174 = vmatmul.mubr.msk.f32.vlgmr.msra.gmra.mxu1 %vm601_vm2, %v8255_v3  ;;  %7259 = vmatmul.mubr.msk.f32.gmra.mxu0 %vm601_vm2, %v8479_v45 }
 0x11b   :  { %7198 = vmatpush3.msra.mxu1 %v8292_v20  ;;  %7176 = vmatprep.mubr.msk.f32.mxu1 %vm601_vm2, %v8262_v7  ;;  %v5993_v20 = vld [vmem:[%s11348_s3 + $0x148] sm:$0xff] }
 0x11c   :  { %7301 = vmatprep.mubr.msk.f32.mxu0 %vm601_vm2, %v1481_v62  ;;  %7199 = vmatprep.subr.mxu1 %v5994_v25  ;;  %v1492_v62 = vrot.slane %v8515_v36, 1 }
 0x11d   :  { %7200 = vmatpush3.msra.mxu1 %v5994_v25  ;;  %v381_v25 = vadd.f32 %v8315_v28, %v8250_v63  ;;  %v4368_v28 = vrot.slane %v8374_v0, 4 }
 0x11e   :  { %7177 = vmatmul.mubr.msk.f32.gmra.mxu1 %vm601_vm2, %v8272_v12  ;;  %7302 = vmatmul.mubr.msk.f32.vlgmr.msra.gmra.mxu0 %vm601_vm2, %v8522_v58 }
 0x11f   :  { %7179 = vmatprep.mubr.msk.f32.mxu1 %vm601_vm2, %v8287_v18  ;;  %7304 = vmatprep.mubr.msk.f32.mxu0 %vm601_vm2, %v8533_v23  ;;  %v8577_v17 = vsel %vm4339_vm6, %v4367_v29, %v4368_v28  ;;  %v8580_v9 = vmax.f32 %v381_v25, 0.0  ;;  %v451_v29 = vadd.f32 %v8376_v1, %v8250_v63  ;;  %v8600_v28 = vld [vmem:[%s11348_s3 + $0x298] sm:$0xff] }
 0x120   :  { %7201 = vmatprep.subr.mxu1 %v5993_v20  ;;  %7358 = vmatpush3.msra.mxu0 %v8326_v33  ;;  %v8570_v33 = vsel %vm1478_vm5, %v1491_v6, %v1492_v62  ;;  %11477 = vst [vmem:[#allocation36_spill] sm:$0xff] %v8577_v17  ;;  %v1498_v6 = vrot.slane %v8552_v59, 1  ;;  %v8589_v62 = vmax.f32 %v416_v31, 0.0  ;;  %v461_v17 = vadd.f32 %v8384_v13, %v8250_v63 }
 0x121   :  { %7202 = vmatpush3.msra.mxu1 %v5993_v20  ;;  %7359 = vmatprep.subr.mxu0 %v6094_v53  ;;  %v1495_v20 = vrot.slane %v8540_v14, 1  ;;  %11478 = vst [vmem:[#allocation37_spill] sm:$0xff] %v8580_v9  ;;  %v1501_v31 = vrot.slane %v8580_v9, 1 }
 0x122   :  { %7180 = vmatmul.mubr.msk.f32.gmra.mxu1 %vm601_vm2, %v8304_v24  ;;  %7305 = vmatmul.mubr.msk.f32.gmra.mxu0 %vm601_vm2, %v8559_v48  ;;  %11480 = vst [vmem:[#allocation39_spill] sm:$0xff] %v8589_v62  ;;  %v8607_v1 = vsel %vm1478_vm5, %v1497_v51, %v1498_v6  ;;  %v4365_v51 = vrot.slane %v8414_v46, 4  ;;  %v8623_v6 = vmax.f32 %v451_v29, 0.0  ;;  %v5114_v13 = vrot.slane %v8589_v62, 4 }
 0x123   :  { %7182 = vmatprep.mubr.msk.f32.mxu1 %vm601_vm2, %v8320_v30  ;;  %7307 = vmatprep.mubr.msk.f32.mxu0 %vm601_vm2, %v8570_v33  ;;  %v8594_v25 = vsel %vm1478_vm5, %v1494_v56, %v1495_v20  ;;  %v1503_v56 = vrot.slane %v8408_v37, 1  ;;  %v5115_v20 = vrot.slane %v8582_v55, 4  ;;  %v8631_v9 = vsel %vm1478_vm5, %v1500_v11, %v1501_v31 }
 0x124   :  { %7203 = vmatprep.subr.mxu1 %v5992_v5  ;;  %7360 = vmatpush3.msra.mxu0 %v6094_v53  ;;  %v4364_v53 = vrot.slane %v8408_v37, 4  ;;  %11481 = vst [vmem:[#allocation40_spill] sm:$0xff] %v8623_v6  ;;  %v491_v29 = vadd.f32 %v8346_v40, %v8250_v63  ;;  %v1509_v46 = vrot.slane %v8387_v15, 1  ;;  %v481_v40 = vadd.f32 %v8410_v41, %v8250_v63 }
 0x125   :  { %7204 = vmatpush3.msra.mxu1 %v5992_v5  ;;  %7361 = vmatprep.subr.mxu0 %v6093_v47  ;;  %v6092_v5 = vld [vmem:[%s11348_s3 + $0x160] sm:$0xff]  ;;  %v1505_v26 = vsel %vm1478_vm5, %v1503_v56, %v1504_v21  ;;  %v8649_v11 = vsel %vm4339_vm6, %v5114_v13, %v5115_v20  ;;  %v8659_v21 = vmax.f32 %v471_v19, 0.0  ;;  %v1510_v56 = vrot.slane %v8623_v6, 1 }
 0x126   :  { %7183 = vmatmul.mubr.msk.f32.gmra.mxu1 %vm601_vm2, %v8334_v35  ;;  %7308 = vmatmul.mubr.msk.f32.gmra.mxu0 %vm601_vm2, %v8594_v25  ;;  %v8635_v59 = vsel %vm4339_vm6, %v4364_v53, %v4365_v51  ;;  %11483 = vst [vmem:[#allocation42_spill] sm:$0xff] %v8649_v11  ;;  %v8651_v53 = vmax.f32 %v461_v17, 0.0  ;;  %v501_v31 = vadd.f32 %v8364_v50, %v8250_v63  ;;  %v1512_v41 = vrot.slane %v8400_v27, 1 }
 0x127   :  { %7185 = vmatprep.mubr.msk.f32.mxu1 %vm601_vm2, %v8408_v37  ;;  %7310 = vmatprep.mubr.msk.f32.mxu0 %vm601_vm2, %v8607_v1  ;;  %v1506_v37 = vrot.slane %v8378_v4, 1  ;;  %11482 = vst [vmem:[#allocation41_spill] sm:$0xff] %v8635_v59  ;;  %11485 = vst [vmem:[#allocation44_spill] sm:$0xff] %v8659_v21  ;;  %v8668_v20 = vmax.f32 %v491_v29, 0.0  ;;  %v1515_v19 = vrot.slane %v8417_v52, 1  ;;  %v8678_v50 = vmax.f32 %v481_v40, 0.0 }
 0x128   :  { %7261 = vmatprep.subr.mxu1 %v8600_v28  ;;  %7362 = vmatpush3.msra.mxu0 %v6093_v47  ;;  %v6135_v47 = vld [vmem:[%s11348_s3 + $0x2b8] sm:$0xff]  ;;  %11484 = vst [vmem:[#allocation43_spill] sm:$0xff] %v8651_v53  ;;  %v1516_v51 = vrot.slane %v8659_v21, 1  ;;  %v8686_v13 = vmax.f32 %v501_v31, 0.0  ;;  %v1518_v29 = vrot.slane %v8428_v8, 1  ;;  %v1521_v40 = vrot.slane %v8431_v10, 1 }
 0x129   :  { %7363 = vmatprep.subr.mxu0 %v6092_v5  ;;  %11486 = vst [vmem:[#allocation45_spill] sm:$0xff] %v8668_v20  ;;  %11487 = vst [vmem:[#allocation46_spill] sm:$0xff] %v8678_v50  ;;  %v1905_v11 = vrot.slane %v8355_v44, 1 }
 0x12a   :  { %7186 = vmatmul.mubr.msk.f32.gmra.mxu1 %vm601_vm2, %v8378_v4  ;;  %7311 = vmatmul.mubr.msk.f32.gmra.mxu0 %vm601_vm2, %v8631_v9  ;;  %v1507_v4 = vrot.slane %v8374_v0, 1  ;;  %v8675_v0 = vsel %vm1478_vm5, %v1509_v46, %v1510_v56  ;;  %11488 = vst [vmem:[#allocation47_spill] sm:$0xff] %v8686_v13  ;;  %v8698_v46 = vsel %vm1478_vm5, %v1515_v19, %v1516_v51  ;;  %v1525_v56 = vrot.slane %v8686_v13, 1  ;;  %v6034_v51 = vld [vmem:[%s11348_s3 + $0x290] sm:$0xff] }
 0x12b   :  { %7188 = vmatprep.mubr.msk.f32.mxu1 %vm601_vm2, %v8387_v15  ;;  %7313 = vmatprep.mubr.msk.f32.mxu0 %vm601_vm2, %v1505_v26  ;;  %v1522_v26 = vrot.slane %v8668_v20, 1 }
 0x12c   :  { %7364 = vmatpush3.msra.mxu0 %v6092_v5  ;;  %v8665_v17 = vsel %vm1478_vm5, %v1506_v37, %v1507_v4  ;;  %v1513_v5 = vrot.slane %v8651_v53, 1  ;;  %v1519_v4 = vrot.slane %v8678_v50, 1 }
 0x12d   :  { %7421 = vmatprep.subr.mxu0 %v6135_v47  ;;  %v8716_v19 = vsel %vm1478_vm5, %v1521_v40, %v1522_v26  ;;  %v7132_v26 = vpop.f32.mrf.mxu1  ;;  %v6033_v40 = vld [vmem:[%s11348_s3 + $0x288] sm:$0xff] }
 0x12e   :  { %7189 = vmatmul.mubr.msk.f32.gmra.mxu1 %vm601_vm2, %v8400_v27  ;;  %7314 = vmatmul.mubr.msk.f32.gmra.mxu0 %vm601_vm2, %v8665_v17  ;;  %v8689_v37 = vsel %vm1478_vm5, %v1512_v41, %v1513_v5  ;;  %v8708_v31 = vsel %vm1478_vm5, %v1518_v29, %v1519_v4  ;;  %v1524_v41 = vrot.slane %v8439_v22, 1  ;;  %v391_v29 = vadd.f32 %v8332_v34, %v8250_v63  ;;  %v6134_v34 = vld [vmem:[%s11348_s3 + $0x2b0] sm:$0xff] }
 0x12f   :  { %7191 = vmatprep.mubr.msk.f32.mxu1 %vm601_vm2, %v8417_v52  ;;  %7316 = vmatprep.mubr.msk.f32.mxu0 %vm601_vm2, %v8675_v0 }
 0x130   :  { %v8723_v5 = vsel %vm1478_vm5, %v1524_v41, %v1525_v56  ;;  %v8755_v4 = vmax.f32 %v391_v29, 0.0  ;;  %v535_v56 = vpop.f32.mrf.mxu1  ;;  %v6032_v41 = vld [vmem:[%s11348_s3 + $0x280] sm:$0xff] }
 0x132   :  { %7192 = vmatmul.mubr.msk.f32.gmra.mxu1 %vm601_vm2, %v8428_v8  ;;  %7317 = vmatmul.mubr.msk.f32.gmra.mxu0 %vm601_vm2, %v8689_v37  ;;  %11489 = vst [vmem:[#allocation48_spill] sm:$0xff] %v8755_v4 }
 0x133   :  { %7194 = vmatprep.mubr.msk.f32.mxu1 %vm601_vm2, %v8431_v10  ;;  %7319 = vmatprep.mubr.msk.f32.mxu0 %vm601_vm2, %v8698_v46 }
 0x136   :  { %7195 = vmatmul.mubr.msk.f32.gmra.mxu1 %vm601_vm2, %v8439_v22  ;;  %7320 = vmatmul.mubr.msk.f32.gmra.mxu0 %vm601_vm2, %v8708_v31 }
 0x137   :  { %7205 = vmatprep.mubr.msk.f32.mxu1 %vm601_vm2, %v8262_v7  ;;  %7322 = vmatprep.mubr.msk.f32.mxu0 %vm601_vm2, %v8716_v19 }
 0x13a   :  { %7206 = vmatmul.mubr.msk.f32.vlgmr.msra.gmra.mxu1 %vm601_vm2, %v8272_v12  ;;  %7323 = vmatmul.mubr.msk.f32.gmra.mxu0 %vm601_vm2, %v8723_v5 }
 0x13b   :  { %7262 = vmatpush3.msra.mxu1 %v8600_v28  ;;  %7208 = vmatprep.mubr.msk.f32.mxu1 %vm601_vm2, %v8287_v18  ;;  %v401_v28 = vadd.f32 %v8342_v38, %v8250_v63  ;;  %v1727_v38 = vrot.slane %v8344_v39, 1 }
 0x13c   :  { %7365 = vmatprep.mubr.msk.f32.mxu0 %vm601_vm2, %v8533_v23  ;;  %7263 = vmatprep.subr.mxu1 %v6034_v51 }
 0x13d   :  { %7264 = vmatpush3.msra.mxu1 %v6034_v51  ;;  %v541_v51 = vadd.f32 %v7132_v26, %v8250_v63  ;;  %v8769_v29 = vmax.f32 %v401_v28, 0.0  ;;  %v536_v26 = vadd.f32 %v8250_v63, %v535_v56  ;;  %v6075_v28 = vld [vmem:[%s11348_s3 + $0xd8] sm:$0xff] }
 0x13e   :  { %7209 = vmatmul.mubr.msk.f32.gmra.mxu1 %vm601_vm2, %v8304_v24  ;;  %7366 = vmatmul.mubr.msk.f32.vlgmr.msra.gmra.mxu0 %vm601_vm2, %v8559_v48 }
 0x13f   :  { %7211 = vmatprep.mubr.msk.f32.mxu1 %vm601_vm2, %v8320_v30  ;;  %7368 = vmatprep.mubr.msk.f32.mxu0 %vm601_vm2, %v8570_v33  ;;  %11490 = vst [vmem:[#allocation49_spill] sm:$0xff] %v8769_v29  ;;  %v8781_v59 = vmax.f32 %v541_v51, 0.0  ;;  %v8798_v51 = vmax.f32 %v536_v26, 0.0  ;;  %v6175_v26 = vld [vmem:[%s11348_s3 + $0xf8] sm:$0xff] }
 0x140   :  { %7265 = vmatprep.subr.mxu1 %v6033_v40  ;;  %7422 = vmatpush3.msra.mxu0 %v6135_v47  ;;  %v6133_v47 = vld [vmem:[%s11348_s3 + $0x2a8] sm:$0xff] }
 0x141   :  { %7266 = vmatpush3.msra.mxu1 %v6033_v40  ;;  %7423 = vmatprep.subr.mxu0 %v6134_v34  ;;  %v1728_v40 = vrot.slane %v8755_v4, 1  ;;  %11491 = vst [vmem:[#allocation50_spill] sm:$0xff] %v8781_v59  ;;  %11492 = vst [vmem:[#allocation51_spill] sm:$0xff] %v8798_v51 }
 0x142   :  { %7212 = vmatmul.mubr.msk.f32.gmra.mxu1 %vm601_vm2, %v8334_v35  ;;  %7369 = vmatmul.mubr.msk.f32.gmra.mxu0 %vm601_vm2, %v8594_v25 }
 0x143   :  { %7214 = vmatprep.mubr.msk.f32.mxu1 %vm601_vm2, %v8344_v39  ;;  %7371 = vmatprep.mubr.msk.f32.mxu0 %vm601_vm2, %v8607_v1  ;;  %v8788_v56 = vsel %vm1478_vm5, %v1727_v38, %v1728_v40  ;;  %v5118_v38 = vrot.slane %v8781_v59, 4  ;;  %v511_v40 = vadd.f32 %v8371_v57, %v8250_v63  ;;  %v521_v57 = vadd.f32 %v8389_v16, %v8250_v63 }
 0x144   :  { %7267 = vmatprep.subr.mxu1 %v6032_v41  ;;  %7424 = vmatpush3.msra.mxu0 %v6134_v34  ;;  %v6132_v34 = vld [vmem:[%s11348_s3 + $0x2a0] sm:$0xff]  ;;  %v1730_v16 = vrot.slane %v8467_v54, 1 }
 0x145   :  { %7268 = vmatpush3.msra.mxu1 %v6032_v41  ;;  %7425 = vmatprep.subr.mxu0 %v6133_v47  ;;  %v1906_v41 = vrot.slane %v8769_v29, 1 }
 0x146   :  { %7215 = vmatmul.mubr.msk.f32.gmra.mxu1 %vm601_vm2, %v8355_v44  ;;  %7372 = vmatmul.mubr.msk.f32.gmra.mxu0 %vm601_vm2, %v8631_v9 }
 0x147   :  { %7217 = vmatprep.mubr.msk.f32.mxu1 %vm601_vm2, %v8387_v15  ;;  %7374 = vmatprep.mubr.msk.f32.mxu0 %vm601_vm2, %v8788_v56  ;;  %v8801_v13 = vsel %vm1478_vm5, %v1905_v11, %v1906_v41  ;;  %v5117_v11 = vrot.slane %v8798_v51, 4  ;;  %v8823_v41 = vmax.f32 %v511_v40, 0.0  ;;  %v1908_v40 = vrot.slane %v8457_v32, 1 }
 0x148   :  { %7325 = vmatprep.subr.mxu1 %v6075_v28  ;;  %7426 = vmatpush3.msra.mxu0 %v6133_v47 }
 0x149   :  { %7427 = vmatprep.subr.mxu0 %v6132_v34  ;;  %v8821_v47 = vsel %vm4339_vm6, %v5117_v11, %v5118_v38  ;;  %11494 = vst [vmem:[#allocation53_spill] sm:$0xff] %v8823_v41  ;;  %v1731_v38 = vrot.slane %v8823_v41, 1 }
 0x14a   :  { %7218 = vmatmul.mubr.msk.f32.gmra.mxu1 %vm601_vm2, %v8400_v27  ;;  %7375 = vmatmul.mubr.msk.f32.gmra.mxu0 %vm601_vm2, %v8801_v13  ;;  %11493 = vst [vmem:[#allocation52_spill] sm:$0xff] %v8821_v47 }
 0x14b   :  { %7220 = vmatprep.mubr.msk.f32.mxu1 %vm601_vm2, %v8417_v52  ;;  %7377 = vmatprep.mubr.msk.f32.mxu0 %vm601_vm2, %v8675_v0 }
 0x14c   :  { %7428 = vmatpush3.msra.mxu0 %v6132_v34  ;;  %v8833_v34 = vmax.f32 %v521_v57, 0.0  ;;  %v8852_v57 = vsel %vm1478_vm5, %v1730_v16, %v1731_v38  ;;  %v411_v16 = vadd.f32 %v8353_v43, %v8250_v63  ;;  %v6073_v38 = vld [vmem:[%s11348_s3 + $0xc8] sm:$0xff] }
 0x14d   :  { %7485 = vmatprep.subr.mxu0 %v6175_v26 }
 0x14e   :  { %7221 = vmatmul.mubr.msk.f32.gmra.mxu1 %vm601_vm2, %v8428_v8  ;;  %7378 = vmatmul.mubr.msk.f32.gmra.mxu0 %vm601_vm2, %v8689_v37  ;;  %11495 = vst [vmem:[#allocation54_spill] sm:$0xff] %v8833_v34  ;;  %v1909_v11 = vrot.slane %v8833_v34, 1  ;;  %v6074_v34 = vld [vmem:[%s11348_s3 + $0xd0] sm:$0xff]  ;;  %v8888_v43 = vmax.f32 %v411_v16, 0.0  ;;  %v2261_v16 = vrot.slane %v8589_v62, 1 }
 0x14f   :  { %7223 = vmatprep.mubr.msk.f32.mxu1 %vm601_vm2, %v8431_v10  ;;  %7380 = vmatprep.mubr.msk.f32.mxu0 %vm601_vm2, %v8698_v46 }
 0x150   :  { %v8859_v47 = vsel %vm1478_vm5, %v1908_v40, %v1909_v11  ;;  %11496 = vst [vmem:[#allocation55_spill] sm:$0xff] %v8888_v43  ;;  %v2083_v40 = vrot.slane %v8362_v49, 1  ;;  %v6173_v11 = vld [vmem:[%s11348_s3 + $0xe8] sm:$0xff] }
 0x152   :  { %7224 = vmatmul.mubr.msk.f32.gmra.mxu1 %vm601_vm2, %v8439_v22  ;;  %7381 = vmatmul.mubr.msk.f32.gmra.mxu0 %vm601_vm2, %v8708_v31 }
 0x153   :  { %7226 = vmatprep.mubr.msk.f32.mxu1 %vm601_vm2, %v8467_v54  ;;  %7383 = vmatprep.mubr.msk.f32.mxu0 %vm601_vm2, %v8716_v19 }
 0x156   :  { %7227 = vmatmul.mubr.msk.f32.gmra.mxu1 %vm601_vm2, %v8457_v32  ;;  %7384 = vmatmul.mubr.msk.f32.gmra.mxu0 %vm601_vm2, %v8723_v5 }
 0x157   :  { %7269 = vmatprep.mubr.msk.f32.mxu1 %vm601_vm2, %v8287_v18  ;;  %7386 = vmatprep.mubr.msk.f32.mxu0 %vm601_vm2, %v8852_v57 }
 0x15a   :  { %7270 = vmatmul.mubr.msk.f32.vlgmr.msra.gmra.mxu1 %vm601_vm2, %v8304_v24  ;;  %7387 = vmatmul.mubr.msk.f32.gmra.mxu0 %vm601_vm2, %v8859_v47 }
 0x15b   :  { %7326 = vmatpush3.msra.mxu1 %v6075_v28  ;;  %7272 = vmatprep.mubr.msk.f32.mxu1 %vm601_vm2, %v8320_v30  ;;  %v6174_v28 = vld [vmem:[%s11348_s3 + $0xf0] sm:$0xff] }
 0x15c   :  { %7429 = vmatprep.mubr.msk.f32.mxu0 %vm601_vm2, %v8570_v33  ;;  %7327 = vmatprep.subr.mxu1 %v6074_v34 }
 0x15d   :  { %7328 = vmatpush3.msra.mxu1 %v6074_v34  ;;  %v6072_v34 = vld [vmem:[%s11348_s3 + $0xc0] sm:$0xff] }
 0x15e   :  { %7273 = vmatmul.mubr.msk.f32.gmra.mxu1 %vm601_vm2, %v8334_v35  ;;  %7430 = vmatmul.mubr.msk.f32.vlgmr.msra.gmra.mxu0 %vm601_vm2, %v8594_v25 }
 0x15f   :  { %7275 = vmatprep.mubr.msk.f32.mxu1 %vm601_vm2, %v8344_v39  ;;  %7432 = vmatprep.mubr.msk.f32.mxu0 %vm601_vm2, %v8607_v1 }
 0x160   :  { %7329 = vmatprep.subr.mxu1 %v6073_v38  ;;  %7486 = vmatpush3.msra.mxu0 %v6175_v26  ;;  %v2084_v26 = vrot.slane %v8888_v43, 1 }
 0x161   :  { %7330 = vmatpush3.msra.mxu1 %v6073_v38  ;;  %7487 = vmatprep.subr.mxu0 %v6174_v28  ;;  %v6115_v38 = vld [vmem:[%s11348_s3 + $0x218] sm:$0xff] }
 0x162   :  { %7276 = vmatmul.mubr.msk.f32.gmra.mxu1 %vm601_vm2, %v8355_v44  ;;  %7433 = vmatmul.mubr.msk.f32.gmra.mxu0 %vm601_vm2, %v8631_v9 }
 0x163   :  { %7278 = vmatprep.mubr.msk.f32.mxu1 %vm601_vm2, %v8362_v49  ;;  %7435 = vmatprep.mubr.msk.f32.mxu0 %vm601_vm2, %v8788_v56  ;;  %v8915_v49 = vsel %vm1478_vm5, %v2083_v40, %v2084_v26  ;;  %v531_v40 = vadd.f32 %v8412_v42, %v8250_v63  ;;  %v6215_v26 = vld [vmem:[%s11348_s3 + $0x238] sm:$0xff]  ;;  %v2086_v63 = vrot.slane %v8479_v45, 1 }
 0x164   :  { %7331 = vmatprep.subr.mxu1 %v6072_v34  ;;  %7488 = vmatpush3.msra.mxu0 %v6174_v28  ;;  %v6172_v28 = vld [vmem:[%s11348_s3 + $0xe0] sm:$0xff] }
 0x165   :  { %7332 = vmatpush3.msra.mxu1 %v6072_v34  ;;  %7489 = vmatprep.subr.mxu0 %v6173_v11  ;;  %v2262_v34 = vrot.slane %v8582_v55, 1  ;;  %v6114_v55 = vld [vmem:[%s11348_s3 + $0x210] sm:$0xff] }
 0x166   :  { %7279 = vmatmul.mubr.msk.f32.gmra.mxu1 %vm601_vm2, %v8589_v62  ;;  %7436 = vmatmul.mubr.msk.f32.gmra.mxu0 %vm601_vm2, %v8801_v13 }
 0x167   :  { %7281 = vmatprep.mubr.msk.f32.mxu1 %vm601_vm2, %v8417_v52  ;;  %7438 = vmatprep.mubr.msk.f32.mxu0 %vm601_vm2, %v8915_v49  ;;  %v2263_v62 = vsel %vm1478_vm5, %v2261_v16, %v2262_v34  ;;  %v2265_v16 = vrot.slane %v8781_v59, 1  ;;  %v2441_v34 = vrot.slane %v8255_v3, 2  ;;  %v2442_v59 = vrot.slane %v8485_v2, 2 }
 0x168   :  { %7389 = vmatprep.subr.mxu1 %v6115_v38  ;;  %7490 = vmatpush3.msra.mxu0 %v6173_v11  ;;  %v8938_v11 = vmax.f32 %v531_v40, 0.0 }
 0x169   :  { %7491 = vmatprep.subr.mxu0 %v6172_v28 }
 0x16a   :  { %7282 = vmatmul.mubr.msk.f32.gmra.mxu1 %vm601_vm2, %v8428_v8  ;;  %7439 = vmatmul.mubr.msk.f32.gmra.mxu0 %vm601_vm2, %v2263_v62  ;;  %11497 = vst [vmem:[#allocation56_spill] sm:$0xff] %v8938_v11  ;;  %v2087_v42 = vrot.slane %v8938_v11, 1  ;;  %v2264_v62 = vrot.slane %v8798_v51, 1 }
 0x16b   :  { %7284 = vmatprep.mubr.msk.f32.mxu1 %vm601_vm2, %v8431_v10  ;;  %7441 = vmatprep.mubr.msk.f32.mxu0 %vm601_vm2, %v8698_v46 }
 0x16c   :  { %7492 = vmatpush3.msra.mxu0 %v6172_v28  ;;  %v8965_v28 = vsel %vm1478_vm5, %v2086_v63, %v2087_v42  ;;  %v2266_v40 = vsel %vm1478_vm5, %v2264_v62, %v2265_v16  ;;  %v2445_v63 = vrot.slane %v8492_v61, 2  ;;  %v8986_v42 = vsel %vm2437_vm3, %v2441_v34, %v2442_v59 }
 0x16d   :  { %7549 = vmatprep.subr.mxu0 %v6215_v26  ;;  %v2448_v62 = vrot.slane %v8501_v60, 2  ;;  %v2450_v16 = vrot.slane %v8287_v18, 2  ;;  %v2453_v34 = vrot.slane %v8304_v24, 2 }
 0x16e   :  { %7285 = vmatmul.mubr.msk.f32.gmra.mxu1 %vm601_vm2, %v8439_v22  ;;  %7442 = vmatmul.mubr.msk.f32.gmra.mxu0 %vm601_vm2, %v8708_v31 }
 0x16f   :  { %7287 = vmatprep.mubr.msk.f32.mxu1 %vm601_vm2, %v8467_v54  ;;  %7444 = vmatprep.mubr.msk.f32.mxu0 %vm601_vm2, %v8716_v19 }
 0x172   :  { %7288 = vmatmul.mubr.msk.f32.gmra.mxu1 %vm601_vm2, %v8457_v32  ;;  %7445 = vmatmul.mubr.msk.f32.gmra.mxu0 %vm601_vm2, %v8723_v5 }
 0x173   :  { %7290 = vmatprep.mubr.msk.f32.mxu1 %vm601_vm2, %v8479_v45  ;;  %7447 = vmatprep.mubr.msk.f32.mxu0 %vm601_vm2, %v8852_v57 }
 0x176   :  { %7291 = vmatmul.mubr.msk.f32.gmra.mxu1 %vm601_vm2, %v8798_v51  ;;  %7448 = vmatmul.mubr.msk.f32.gmra.mxu0 %vm601_vm2, %v8859_v47  ;;  %v2444_v51 = vrot.slane %v8262_v7, 2 }
 0x177   :  { %7333 = vmatprep.mubr.msk.f32.mxu1 %vm601_vm2, %v8522_v58  ;;  %7450 = vmatprep.mubr.msk.f32.mxu0 %vm601_vm2, %v8965_v28  ;;  %v2447_v58 = vrot.slane %v8272_v12, 2 }
 0x179   :  { %v9003_v59 = vsel %vm2437_vm3, %v2447_v58, %v2448_v62  ;;  %v6112_v62 = vld [vmem:[%s11348_s3 + $0x200] sm:$0xff] }
 0x17a   :  { %7334 = vmatmul.mubr.msk.f32.vlgmr.msra.gmra.mxu1 %vm601_vm2, %v8533_v23  ;;  %7451 = vmatmul.mubr.msk.f32.gmra.mxu0 %vm601_vm2, %v2266_v40  ;;  %v8992_v23 = vsel %vm2437_vm3, %v2444_v51, %v2445_v63  ;;  %v2451_v51 = vrot.slane %v8515_v36, 2  ;;  %v2454_v40 = vrot.slane %v8540_v14, 2  ;;  %v2456_v63 = vrot.slane %v8320_v30, 2  ;;  %v11499_v30 = vld [vmem:[#allocation37_spill] sm:$0xff] }
 0x17b   :  { %7390 = vmatpush3.msra.mxu1 %v6115_v38  ;;  %7336 = vmatprep.mubr.msk.f32.mxu1 %vm601_vm2, %v8559_v48  ;;  %v6113_v38 = vld [vmem:[%s11348_s3 + $0x208] sm:$0xff]  ;;  %v2460_v24 = vrot.slane %v11499_v30, 2 }
 0x17c   :  { %7493 = vmatprep.mubr.msk.f32.mxu0 %vm601_vm2, %v8986_v42  ;;  %7391 = vmatprep.subr.mxu1 %v6114_v55  ;;  %v9016_v58 = vsel %vm2437_vm3, %v2450_v16, %v2451_v51  ;;  %v9027_v14 = vsel %vm2437_vm3, %v2453_v34, %v2454_v40  ;;  %v6213_v16 = vld [vmem:[%s11348_s3 + $0x228] sm:$0xff]  ;;  %v2684_v40 = vrot.slane %v8344_v39, 2  ;;  %v2477_v39 = vrot.slane %v8428_v8, 2 }
 0x17d   :  { %7392 = vmatpush3.msra.mxu1 %v6114_v55  ;;  %v6214_v55 = vld [vmem:[%s11348_s3 + $0x230] sm:$0xff] }
 0x17e   :  { %7337 = vmatmul.mubr.msk.f32.gmra.mxu1 %vm601_vm2, %v8570_v33  ;;  %7494 = vmatmul.mubr.msk.f32.vlgmr.msra.gmra.mxu0 %vm601_vm2, %v8992_v23 }
 0x17f   :  { %7339 = vmatprep.mubr.msk.f32.mxu1 %vm601_vm2, %v8594_v25  ;;  %7496 = vmatprep.mubr.msk.f32.mxu0 %vm601_vm2, %v9003_v59 }
 0x180   :  { %7393 = vmatprep.subr.mxu1 %v6113_v38  ;;  %7550 = vmatpush3.msra.mxu0 %v6215_v26  ;;  %v2459_v26 = vrot.slane %v8334_v35, 2  ;;  %v6155_v35 = vld [vmem:[%s11348_s3 + $0x58] sm:$0xff] }
 0x181   :  { %7394 = vmatpush3.msra.mxu1 %v6113_v38  ;;  %7551 = vmatprep.subr.mxu0 %v6214_v55  ;;  %v11498_v38 = vld [vmem:[#allocation35_spill] sm:$0xff] }
 0x182   :  { %7340 = vmatmul.mubr.msk.f32.gmra.mxu1 %vm601_vm2, %v8607_v1  ;;  %7497 = vmatmul.mubr.msk.f32.gmra.mxu0 %vm601_vm2, %v9016_v58  ;;  %v2457_v51 = vrot.slane %v11498_v38, 2  ;;  %v9051_v30 = vsel %vm2437_vm3, %v2459_v26, %v2460_v24  ;;  %v2468_v24 = vrot.slane %v8387_v15, 2  ;;  %v6255_v26 = vld [vmem:[%s11348_s3 + $0x78] sm:$0xff] }
 0x183   :  { %7342 = vmatprep.mubr.msk.f32.mxu1 %vm601_vm2, %v8631_v9  ;;  %7499 = vmatprep.mubr.msk.f32.mxu0 %vm601_vm2, %v9027_v14 }
 0x184   :  { %7395 = vmatprep.subr.mxu1 %v6112_v62  ;;  %7552 = vmatpush3.msra.mxu0 %v6214_v55  ;;  %v9040_v34 = vsel %vm2437_vm3, %v2456_v63, %v2457_v51  ;;  %v6212_v55 = vld [vmem:[%s11348_s3 + $0x220] sm:$0xff]  ;;  %v2685_v63 = vrot.slane %v8755_v4, 2  ;;  %v2469_v51 = vrot.slane %v8623_v6, 2 }
 0x185   :  { %7396 = vmatpush3.msra.mxu1 %v6112_v62  ;;  %7553 = vmatprep.subr.mxu0 %v6213_v16 }
 0x186   :  { %7343 = vmatmul.mubr.msk.f32.gmra.mxu1 %vm601_vm2, %v8788_v56  ;;  %7500 = vmatmul.mubr.msk.f32.gmra.mxu0 %vm601_vm2, %v9040_v34  ;;  %v9062_v62 = vsel %vm2437_vm3, %v2684_v40, %v2685_v63  ;;  %v2472_v40 = vrot.slane %v8651_v53, 2  ;;  %v2474_v63 = vrot.slane %v8417_v52, 2  ;;  %v2475_v53 = vrot.slane %v8659_v21, 2 }
 0x187   :  { %7345 = vmatprep.mubr.msk.f32.mxu1 %vm601_vm2, %v8665_v17  ;;  %7502 = vmatprep.mubr.msk.f32.mxu0 %vm601_vm2, %v9051_v30  ;;  %v2471_v17 = vrot.slane %v8400_v27, 2 }
 0x188   :  { %7453 = vmatprep.subr.mxu1 %v6155_v35  ;;  %7554 = vmatpush3.msra.mxu0 %v6213_v16  ;;  %v11500_v16 = vld [vmem:[#allocation16_spill] sm:$0xff] }
 0x189   :  { %7555 = vmatprep.subr.mxu0 %v6212_v55  ;;  %v9088_v4 = vsel %vm2437_vm3, %v2471_v17, %v2472_v40  ;;  %v2480_v17 = vrot.slane %v8431_v10, 2  ;;  %v11501_v40 = vld [vmem:[#allocation47_spill] sm:$0xff] }
 0x18a   :  { %7346 = vmatmul.mubr.msk.f32.gmra.mxu1 %vm601_vm2, %v8675_v0  ;;  %7503 = vmatmul.mubr.msk.f32.gmra.mxu0 %vm601_vm2, %v9062_v62  ;;  %v9080_v0 = vsel %vm2437_vm3, %v2468_v24, %v2469_v51  ;;  %v2481_v24 = vrot.slane %v8668_v20, 2  ;;  %v9099_v51 = vsel %vm2437_vm3, %v2474_v63, %v2475_v53  ;;  %v2484_v52 = vrot.slane %v11501_v40, 2 }
 0x18b   :  { %7348 = vmatprep.mubr.msk.f32.mxu1 %vm601_vm2, %v8689_v37  ;;  %7505 = vmatprep.mubr.msk.f32.mxu0 %vm601_vm2, %v11500_v16  ;;  %v2688_v53 = vrot.slane %v8823_v41, 2  ;;  %v2687_v40 = vrot.slane %v8467_v54, 2 }
 0x18c   :  { %7556 = vmatpush3.msra.mxu0 %v6212_v55  ;;  %v2478_v55 = vrot.slane %v8678_v50, 2  ;;  %v2483_v50 = vrot.slane %v8439_v22, 2  ;;  %v9117_v63 = vsel %vm2437_vm3, %v2480_v17, %v2481_v24  ;;  %v6154_v24 = vld [vmem:[%s11348_s3 + $0x50] sm:$0xff]  ;;  %v3037_v17 = vrot.slane %v8888_v43, 2 }
 0x18d   :  { %7613 = vmatprep.subr.mxu0 %v6255_v26 }
 0x18e   :  { %7349 = vmatmul.mubr.msk.f32.gmra.mxu1 %vm601_vm2, %v8698_v46  ;;  %7506 = vmatmul.mubr.msk.f32.gmra.mxu0 %vm601_vm2, %v9080_v0  ;;  %v9108_v8 = vsel %vm2437_vm3, %v2477_v39, %v2478_v55  ;;  %v9125_v39 = vsel %vm2437_vm3, %v2483_v50, %v2484_v52  ;;  %v9132_v55 = vsel %vm2437_vm3, %v2687_v40, %v2688_v53  ;;  %v6153_v52 = vld [vmem:[%s11348_s3 + $0x48] sm:$0xff]  ;;  %v9204_v40 = vld [vmem:[%s11348_s3 + $0x1b8] sm:$0xff] }
 0x18f   :  { %7351 = vmatprep.mubr.msk.f32.mxu1 %vm601_vm2, %v8708_v31  ;;  %7508 = vmatprep.mubr.msk.f32.mxu0 %vm601_vm2, %v9088_v4  ;;  %v11504_v53 = vld [vmem:[#allocation54_spill] sm:$0xff] }
 0x192   :  { %7352 = vmatmul.mubr.msk.f32.gmra.mxu1 %vm601_vm2, %v8716_v19  ;;  %7509 = vmatmul.mubr.msk.f32.gmra.mxu0 %vm601_vm2, %v9099_v51 }
 0x193   :  { %7354 = vmatprep.mubr.msk.f32.mxu1 %vm601_vm2, %v8723_v5  ;;  %7511 = vmatprep.mubr.msk.f32.mxu0 %vm601_vm2, %v9108_v8 }
 0x196   :  { %7355 = vmatmul.mubr.msk.f32.gmra.mxu1 %vm601_vm2, %v8852_v57  ;;  %7512 = vmatmul.mubr.msk.f32.gmra.mxu0 %vm601_vm2, %v9117_v63 }
 0x197   :  { %7397 = vmatprep.mubr.msk.f32.mxu1 %vm601_vm2, %v8559_v48  ;;  %7514 = vmatprep.mubr.msk.f32.mxu0 %vm601_vm2, %v9125_v39  ;;  %v6152_v48 = vld [vmem:[%s11348_s3 + $0x40] sm:$0xff] }
 0x19a   :  { %7398 = vmatmul.mubr.msk.f32.vlgmr.msra.gmra.mxu1 %vm601_vm2, %v8570_v33  ;;  %7515 = vmatmul.mubr.msk.f32.gmra.mxu0 %vm601_vm2, %v9132_v55  ;;  %v2860_v33 = vrot.slane %v8355_v44, 2 }
 0x19b   :  { %7454 = vmatpush3.msra.mxu1 %v6155_v35  ;;  %7400 = vmatprep.mubr.msk.f32.mxu1 %vm601_vm2, %v8594_v25  ;;  %v6254_v35 = vld [vmem:[%s11348_s3 + $0x70] sm:$0xff]  ;;  %v2861_v25 = vrot.slane %v8769_v29, 2 }
 0x19c   :  { %7557 = vmatprep.mubr.msk.f32.mxu0 %vm601_vm2, %v9003_v59  ;;  %7455 = vmatprep.subr.mxu1 %v6154_v24 }
 0x19d   :  { %7456 = vmatpush3.msra.mxu1 %v6154_v24  ;;  %v2864_v24 = vrot.slane %v11504_v53, 2 }
 0x19e   :  { %7401 = vmatmul.mubr.msk.f32.gmra.mxu1 %vm601_vm2, %v8607_v1  ;;  %7558 = vmatmul.mubr.msk.f32.vlgmr.msra.gmra.mxu0 %vm601_vm2, %v9016_v58  ;;  %v11502_v1 = vld [vmem:[#allocation14_spill] sm:$0xff] }
 0x19f   :  { %7403 = vmatprep.mubr.msk.f32.mxu1 %vm601_vm2, %v8631_v9  ;;  %7560 = vmatprep.mubr.msk.f32.mxu0 %vm601_vm2, %v9027_v14  ;;  %v6253_v9 = vld [vmem:[%s11348_s3 + $0x68] sm:$0xff]  ;;  %v3036_v50 = vrot.slane %v11502_v1, 2 }
 0x1a0   :  { %7457 = vmatprep.subr.mxu1 %v6153_v52  ;;  %7614 = vmatpush3.msra.mxu0 %v6255_v26  ;;  %v6252_v26 = vld [vmem:[%s11348_s3 + $0x60] sm:$0xff] }
 0x1a1   :  { %7458 = vmatpush3.msra.mxu1 %v6153_v52  ;;  %7615 = vmatprep.subr.mxu0 %v6254_v35  ;;  %v11505_v52 = vld [vmem:[#allocation26_spill] sm:$0xff] }
 0x1a2   :  { %7404 = vmatmul.mubr.msk.f32.gmra.mxu1 %vm601_vm2, %v8788_v56  ;;  %7561 = vmatmul.mubr.msk.f32.gmra.mxu0 %vm601_vm2, %v9040_v34  ;;  %v6195_v56 = vld [vmem:[%s11348_s3 + $0x198] sm:$0xff] }
 0x1a3   :  { %7406 = vmatprep.mubr.msk.f32.mxu1 %vm601_vm2, %v8801_v13  ;;  %7563 = vmatprep.mubr.msk.f32.mxu0 %vm601_vm2, %v9051_v30  ;;  %v9184_v13 = vsel %vm2437_vm3, %v2860_v33, %v2861_v25 }
 0x1a4   :  { %7459 = vmatprep.subr.mxu1 %v6152_v48  ;;  %7616 = vmatpush3.msra.mxu0 %v6254_v35  ;;  %v2439_v35 = vrot.slane %v11505_v52, 2 }
 0x1a5   :  { %7460 = vmatpush3.msra.mxu1 %v6152_v48  ;;  %7617 = vmatprep.subr.mxu0 %v6253_v9  ;;  %v3039_v48 = vrot.slane %v8479_v45, 2 }
 0x1a6   :  { %7407 = vmatmul.mubr.msk.f32.gmra.mxu1 %vm601_vm2, %v8915_v49  ;;  %7564 = vmatmul.mubr.msk.f32.gmra.mxu0 %vm601_vm2, %v9062_v62  ;;  %v9195_v49 = vsel %vm2437_vm3, %v3036_v50, %v3037_v17  ;;  %v3392_v17 = vrot.slane %v8255_v3, 3 }
 0x1a7   :  { %7409 = vmatprep.mubr.msk.f32.mxu1 %vm601_vm2, %v8689_v37  ;;  %7566 = vmatprep.mubr.msk.f32.mxu0 %vm601_vm2, %v9184_v13  ;;  %v9219_v37 = vpop.f32.mrf.mxu1 }
 0x1a8   :  { %7517 = vmatprep.subr.mxu1 %v6195_v56  ;;  %7618 = vmatpush3.msra.mxu0 %v6253_v9  ;;  %v9239_v9 = vpop.f32.mrf.mxu0 }
 0x1a9   :  { %7619 = vmatprep.subr.mxu0 %v6252_v26  ;;  %11506 = vst [vmem:[#allocation16_spill] sm:$0xff] %v9239_v9 }
 0x1aa   :  { %7410 = vmatmul.mubr.msk.f32.gmra.mxu1 %vm601_vm2, %v8698_v46  ;;  %7567 = vmatmul.mubr.msk.f32.gmra.mxu0 %vm601_vm2, %v9195_v49  ;;  %v11503_v46 = vld [vmem:[#allocation21_spill] sm:$0xff] }
 0x1ab   :  { %7412 = vmatprep.mubr.msk.f32.mxu1 %vm601_vm2, %v8708_v31  ;;  %7569 = vmatprep.mubr.msk.f32.mxu0 %vm601_vm2, %v9088_v4  ;;  %v2438_v31 = vrot.slane %v11503_v46, 2  ;;  %v3389_v50 = vrot.slane %v11503_v46, 3 }
 0x1ac   :  { %7620 = vmatpush3.msra.mxu0 %v6252_v26 }
 0x1ad   :  { %7677 = vmatprep.subr.mxu0 %v9204_v40 }
 0x1ae   :  { %7413 = vmatmul.mubr.msk.f32.gmra.mxu1 %vm601_vm2, %v8716_v19  ;;  %7570 = vmatmul.mubr.msk.f32.gmra.mxu0 %vm601_vm2, %v9099_v51  ;;  %v2863_v19 = vrot.slane %v8457_v32, 2 }
 0x1af   :  { %7415 = vmatprep.mubr.msk.f32.mxu1 %vm601_vm2, %v8723_v5  ;;  %7572 = vmatprep.mubr.msk.f32.mxu0 %vm601_vm2, %v9108_v8  ;;  %v9232_v5 = vpop.f32.mrf.mxu1 }
 0x1b0   :  { %v9247_v25 = vsel %vm2437_vm3, %v2863_v19, %v2864_v24  ;;  %v9263_v24 = vpop.f32.mrf.mxu0 }
 0x1b1   :  { %v9237_v33 = vpop.f32.mrf.mxu1  ;;  %11508 = vst [vmem:[#allocation58_spill] sm:$0xff] %v9263_v24  ;;  %v6193_v24 = vld [vmem:[%s11348_s3 + $0x188] sm:$0xff] }
 0x1b2   :  { %7416 = vmatmul.mubr.msk.f32.gmra.mxu1 %vm601_vm2, %v8852_v57  ;;  %7573 = vmatmul.mubr.msk.f32.gmra.mxu0 %vm601_vm2, %v9117_v63  ;;  %v3040_v57 = vrot.slane %v8938_v11, 2 }
 0x1b3   :  { %7418 = vmatprep.mubr.msk.f32.mxu1 %vm601_vm2, %v8859_v47  ;;  %7575 = vmatprep.mubr.msk.f32.mxu0 %vm601_vm2, %v9125_v39  ;;  %v2440_v47 = vsel %vm2437_vm3, %v2438_v31, %v2439_v35  ;;  %v6194_v31 = vld [vmem:[%s11348_s3 + $0x190] sm:$0xff]  ;;  %v9261_v19 = vpop.f32.mrf.mxu1  ;;  %v3395_v35 = vrot.slane %v8262_v7, 3  ;;  %v11525_v7 = vld [vmem:[#allocation28_spill] sm:$0xff] }
 0x1b4   :  { %v9254_v26 = vsel %vm2437_vm3, %v3039_v48, %v3040_v57  ;;  %v3393_v57 = vrot.slane %v8485_v2, 3  ;;  %v11526_v2 = vld [vmem:[#allocation18_spill] sm:$0xff] }
 0x1b5   :  { %11507 = vst [vmem:[#allocation57_spill] sm:$0xff] %v9254_v26 }
 0x1b6   :  { %7419 = vmatmul.mubr.msk.f32.gmra.mxu1 %vm601_vm2, %v8965_v28  ;;  %7576 = vmatmul.mubr.msk.f32.gmra.mxu0 %vm601_vm2, %v9132_v55  ;;  %v3390_v28 = vrot.slane %v11505_v52, 3  ;;  %v9276_v52 = vpop.f32.mrf.mxu0  ;;  %v9281_v46 = vsel %vm3388_vm4, %v3392_v17, %v3393_v57  ;;  %v6294_v17 = vld [vmem:[%s11348_s3 + $0x1b0] sm:$0xff]  ;;  %v3402_v57 = vrot.slane %v8515_v36, 3 }
 0x1b7   :  { %7461 = vmatprep.mubr.msk.f32.mxu1 %vm601_vm2, %v2440_v47  ;;  %7578 = vmatprep.mubr.msk.f32.mxu0 %vm601_vm2, %v9247_v25  ;;  %v9274_v47 = vpop.f32.mrf.mxu1  ;;  %11509 = vst [vmem:[#allocation59_spill] sm:$0xff] %v9276_v52  ;;  %11510 = vst [vmem:[#allocation60_spill] sm:$0xff] %v9281_v46  ;;  %v11514_v52 = vld [vmem:[#allocation9_spill] sm:$0xff] }
 0x1b8   :  { %v3391_v48 = vsel %vm3388_vm4, %v3389_v50, %v3390_v28  ;;  %v3401_v28 = vrot.slane %v8287_v18, 3  ;;  %v3404_v18 = vrot.slane %v11514_v52, 3 }
 0x1ba   :  { %7462 = vmatmul.mubr.msk.f32.vlgmr.msra.gmra.mxu1 %vm601_vm2, %v8986_v42  ;;  %7579 = vmatmul.mubr.msk.f32.gmra.mxu0 %vm601_vm2, %v9254_v26  ;;  %v3396_v42 = vrot.slane %v8492_v61, 3 }
 0x1bb   :  { %7518 = vmatpush3.msra.mxu1 %v6195_v56  ;;  %7464 = vmatprep.mubr.msk.f32.mxu1 %vm601_vm2, %v8992_v23  ;;  %v3398_v56 = vrot.slane %v8272_v12, 3 }
 0x1bc   :  { %7621 = vmatprep.mubr.msk.f32.mxu0 %vm601_vm2, %v3391_v48  ;;  %7519 = vmatprep.subr.mxu1 %v6194_v31  ;;  %v9292_v50 = vsel %vm3388_vm4, %v3395_v35, %v3396_v42  ;;  %v9304_v48 = vpop.f32.mrf.mxu1  ;;  %v9306_v35 = vpop.f32.mrf.mxu0 }
 0x1bd   :  { %7520 = vmatpush3.msra.mxu1 %v6194_v31  ;;  %11511 = vst [vmem:[#allocation61_spill] sm:$0xff] %v9292_v50  ;;  %v3399_v31 = vrot.slane %v8501_v60, 3  ;;  %11512 = vst [vmem:[#allocation62_spill] sm:$0xff] %v9306_v35  ;;  %v6192_v60 = vld [vmem:[%s11348_s3 + $0x180] sm:$0xff]  ;;  %v11517_v35 = vld [vmem:[#allocation34_spill] sm:$0xff] }
 0x1be   :  { %7465 = vmatmul.mubr.msk.f32.gmra.mxu1 %vm601_vm2, %v9003_v59  ;;  %7622 = vmatmul.mubr.msk.f32.vlgmr.msra.gmra.mxu0 %vm601_vm2, %v9281_v46  ;;  %v9316_v61 = vpop.f32.mrf.mxu1  ;;  %v9318_v36 = vpop.f32.mrf.mxu0  ;;  %v3405_v52 = vrot.slane %v11517_v35, 3  ;;  %v9344_v35 = vld [vmem:[%s11348_s3 + $0x2d8] sm:$0xff] }
 0x1bf   :  { %7467 = vmatprep.mubr.msk.f32.mxu1 %vm601_vm2, %v9016_v58  ;;  %7624 = vmatprep.mubr.msk.f32.mxu0 %vm601_vm2, %v9292_v50  ;;  %v9310_v42 = vsel %vm3388_vm4, %v3398_v56, %v3399_v31  ;;  %11515 = vst [vmem:[#allocation64_spill] sm:$0xff] %v9318_v36  ;;  %v11516_v56 = vld [vmem:[#allocation10_spill] sm:$0xff]  ;;  %v3408_v36 = vrot.slane %v11498_v38, 3 }
 0x1c0   :  { %7521 = vmatprep.subr.mxu1 %v6193_v24  ;;  %7678 = vmatpush3.msra.mxu0 %v9204_v40  ;;  %11513 = vst [vmem:[#allocation63_spill] sm:$0xff] %v9310_v42  ;;  %v9325_v40 = vsel %vm3388_vm4, %v3401_v28, %v3402_v57  ;;  %v6293_v31 = vld [vmem:[%s11348_s3 + $0x1a8] sm:$0xff]  ;;  %v9338_v28 = vsel %vm3388_vm4, %v3404_v18, %v3405_v52  ;;  %v11518_v57 = vld [vmem:[#allocation11_spill] sm:$0xff]  ;;  %v9346_v12 = vpop.f32.mrf.mxu1  ;;  %v9348_v9 = vpop.f32.mrf.mxu0 }
 0x1c1   :  { %7522 = vmatpush3.msra.mxu1 %v6193_v24  ;;  %7679 = vmatprep.subr.mxu0 %v6294_v17  ;;  %v3407_v24 = vrot.slane %v11516_v56, 3  ;;  %v3410_v56 = vrot.slane %v11518_v57, 3  ;;  %11519 = vst [vmem:[#allocation65_spill] sm:$0xff] %v9348_v9  ;;  %v11520_v52 = vld [vmem:[#allocation37_spill] sm:$0xff]  ;;  %v11521_v57 = vld [vmem:[#allocation23_spill] sm:$0xff] }
 0x1c2   :  { %7468 = vmatmul.mubr.msk.f32.gmra.mxu1 %vm601_vm2, %v9027_v14  ;;  %7625 = vmatmul.mubr.msk.f32.gmra.mxu0 %vm601_vm2, %v9310_v42  ;;  %v9365_v9 = vpop.f32.mrf.mxu0 }
 0x1c3   :  { %7470 = vmatprep.mubr.msk.f32.mxu1 %vm601_vm2, %v9040_v34  ;;  %7627 = vmatprep.mubr.msk.f32.mxu0 %vm601_vm2, %v9325_v40  ;;  %v9355_v18 = vsel %vm3388_vm4, %v3407_v24, %v3408_v36  ;;  %11522 = vst [vmem:[#allocation23_spill] sm:$0xff] %v9365_v9  ;;  %v3419_v24 = vrot.slane %v8387_v15, 3  ;;  %v3422_v15 = vrot.slane %v8400_v27, 3  ;;  %v3426_v27 = vrot.slane %v8659_v21, 3 }
 0x1c4   :  { %7523 = vmatprep.subr.mxu1 %v6192_v60  ;;  %7680 = vmatpush3.msra.mxu0 %v6294_v17  ;;  %v3411_v17 = vrot.slane %v11520_v52, 3 }
 0x1c5   :  { %7524 = vmatpush3.msra.mxu1 %v6192_v60  ;;  %7681 = vmatprep.subr.mxu0 %v6293_v31  ;;  %v6292_v60 = vld [vmem:[%s11348_s3 + $0x1a0] sm:$0xff]  ;;  %v9367_v38 = vpop.f32.mrf.mxu1 }
 0x1c6   :  { %7471 = vmatmul.mubr.msk.f32.gmra.mxu1 %vm601_vm2, %v9051_v30  ;;  %7628 = vmatmul.mubr.msk.f32.gmra.mxu0 %vm601_vm2, %v9338_v28  ;;  %v9371_v36 = vsel %vm3388_vm4, %v3410_v56, %v3411_v17  ;;  %v9387_v56 = vpop.f32.mrf.mxu0 }
 0x1c7   :  { %7473 = vmatprep.mubr.msk.f32.mxu1 %vm601_vm2, %v11521_v57  ;;  %7630 = vmatprep.mubr.msk.f32.mxu0 %vm601_vm2, %v9355_v18  ;;  %v9381_v57 = vld [vmem:[%s11348_s3 + $0x2f8] sm:$0xff]  ;;  %v9389_v17 = vpop.f32.mrf.mxu1 }
 0x1c8   :  { %7581 = vmatprep.subr.mxu1 %v9344_v35  ;;  %7682 = vmatpush3.msra.mxu0 %v6293_v31  ;;  %v11523_v31 = vld [vmem:[#allocation27_spill] sm:$0xff] }
 0x1c9   :  { %7683 = vmatprep.subr.mxu0 %v6292_v60 }
 0x1ca   :  { %7474 = vmatmul.mubr.msk.f32.gmra.mxu1 %vm601_vm2, %v11500_v16  ;;  %7631 = vmatmul.mubr.msk.f32.gmra.mxu0 %vm601_vm2, %v9371_v36  ;;  %v3420_v16 = vrot.slane %v8623_v6, 3  ;;  %v3425_v6 = vrot.slane %v11526_v2, 3  ;;  %v3432_v2 = vrot.slane %v8668_v20, 3 }
 0x1cb   :  { %7476 = vmatprep.mubr.msk.f32.mxu1 %vm601_vm2, %v9080_v0  ;;  %7633 = vmatprep.mubr.msk.f32.mxu0 %vm601_vm2, %v11523_v31 }
 0x1cc   :  { %7684 = vmatpush3.msra.mxu0 %v6292_v60  ;;  %v9403_v31 = vsel %vm3388_vm4, %v3419_v24, %v3420_v16  ;;  %v11527_v60 = vld [vmem:[#allocation43_spill] sm:$0xff]  ;;  %v9430_v21 = vsel %vm3388_vm4, %v3425_v6, %v3426_v27  ;;  %v3434_v27 = vrot.slane %v8439_v22, 3 }
 0x1cd   :  { %7741 = vmatprep.subr.mxu0 %v9381_v57  ;;  %v9394_v9 = vpop.f32.mrf.mxu1  ;;  %v9396_v52 = vpop.f32.mrf.mxu0  ;;  %v3423_v46 = vrot.slane %v11527_v60, 3  ;;  %v11529_v24 = vld [vmem:[#allocation19_spill] sm:$0xff] }
 0x1ce   :  { %11524 = vst [vmem:[#allocation27_spill] sm:$0xff] %v9396_v52  ;;  %7477 = vmatmul.mubr.msk.f32.gmra.mxu1 %vm601_vm2, %v9088_v4  ;;  %7634 = vmatmul.mubr.msk.f32.gmra.mxu0 %vm601_vm2, %v11525_v7  ;;  %v3428_v16 = vrot.slane %v11529_v24, 3 }
 0x1cf   :  { %7479 = vmatprep.mubr.msk.f32.mxu1 %vm601_vm2, %v9099_v51  ;;  %7636 = vmatprep.mubr.msk.f32.mxu0 %vm601_vm2, %v9403_v31  ;;  %v9412_v3 = vpop.f32.mrf.mxu1  ;;  %v9414_v26 = vpop.f32.mrf.mxu0  ;;  %v9417_v7 = vsel %vm3388_vm4, %v3422_v15, %v3423_v46  ;;  %v3431_v15 = vrot.slane %v8431_v10, 3  ;;  %v11531_v46 = vld [vmem:[#allocation46_spill] sm:$0xff] }
 0x1d0   :  { %11528 = vst [vmem:[#allocation66_spill] sm:$0xff] %v9414_v26  ;;  %v3429_v45 = vrot.slane %v11531_v46, 3 }
 0x1d1   :  { %v9456_v46 = vsel %vm3388_vm4, %v3431_v15, %v3432_v2 }
 0x1d2   :  { %v9421_v60 = vpop.f32.mrf.mxu1  ;;  %v9423_v11 = vpop.f32.mrf.mxu0  ;;  %7480 = vmatmul.mubr.msk.f32.gmra.mxu1 %vm601_vm2, %v9108_v8  ;;  %7637 = vmatmul.mubr.msk.f32.gmra.mxu0 %vm601_vm2, %v9417_v7  ;;  %v9444_v52 = vsel %vm3388_vm4, %v3428_v16, %v3429_v45 }
 0x1d3   :  { %11530 = vst [vmem:[#allocation67_spill] sm:$0xff] %v9423_v11  ;;  %7482 = vmatprep.mubr.msk.f32.mxu1 %vm601_vm2, %v9117_v63  ;;  %7639 = vmatprep.mubr.msk.f32.mxu0 %vm601_vm2, %v9430_v21  ;;  %v11533_v11 = vld [vmem:[#allocation47_spill] sm:$0xff] }
 0x1d4   :  { %v9438_v20 = vpop.f32.mrf.mxu1  ;;  %v9440_v24 = vpop.f32.mrf.mxu0  ;;  %v3435_v26 = vrot.slane %v11533_v11, 3  ;;  %v6234_v11 = vld [vmem:[%s11348_s3 + $0x2d0] sm:$0xff] }
 0x1d5   :  { %11532 = vst [vmem:[#allocation68_spill] sm:$0xff] %v9440_v24 }
 0x1d6   :  { %v9447_v6 = vpop.f32.mrf.mxu1  ;;  %v9449_v10 = vpop.f32.mrf.mxu0  ;;  %7483 = vmatmul.mubr.msk.f32.gmra.mxu1 %vm601_vm2, %v9125_v39  ;;  %7640 = vmatmul.mubr.msk.f32.gmra.mxu0 %vm601_vm2, %v9444_v52  ;;  %v9467_v22 = vsel %vm3388_vm4, %v3434_v27, %v3435_v26 }
 0x1d7   :  { %11534 = vst [vmem:[#allocation69_spill] sm:$0xff] %v9449_v10  ;;  %7525 = vmatprep.mubr.msk.f32.mxu1 %vm601_vm2, %v8992_v23  ;;  %7642 = vmatprep.mubr.msk.f32.mxu0 %vm601_vm2, %v9456_v46 }
 0x1d8   :  { %v9462_v45 = vpop.f32.mrf.mxu1  ;;  %v9464_v16 = vpop.f32.mrf.mxu0 }
 0x1d9   :  { %11535 = vst [vmem:[#allocation70_spill] sm:$0xff] %v9464_v16  ;;  %v3811_v16 = vrot.slane %v8355_v44, 3 }
 0x1da   :  { %v9472_v10 = vpop.f32.mrf.mxu1  ;;  %v9474_v2 = vpop.f32.mrf.mxu0  ;;  %7526 = vmatmul.mubr.msk.f32.vlgmr.msra.gmra.mxu1 %vm601_vm2, %v9003_v59  ;;  %7643 = vmatmul.mubr.msk.f32.gmra.mxu0 %vm601_vm2, %v9467_v22  ;;  %v6233_v59 = vld [vmem:[%s11348_s3 + $0x2c8] sm:$0xff] }
 0x1db   :  { %11536 = vst [vmem:[#allocation71_spill] sm:$0xff] %v9474_v2  ;;  %7582 = vmatpush3.msra.mxu1 %v9344_v35  ;;  %7528 = vmatprep.mubr.msk.f32.mxu1 %vm601_vm2, %v9016_v58 }
 0x1dc   :  { %7685 = vmatprep.mubr.msk.f32.mxu0 %vm601_vm2, %v9292_v50  ;;  %v867_v23 = vpop.f32.mrf.mxu1  ;;  %v9485_v26 = vpop.f32.mrf.mxu0  ;;  %7583 = vmatprep.subr.mxu1 %v6234_v11  ;;  %v11542_v50 = vld [vmem:[#allocation48_spill] sm:$0xff] }
 0x1dd   :  { %11537 = vst [vmem:[#allocation72_spill] sm:$0xff] %v9485_v26  ;;  %v9488_v15 = vadd.f32 %v867_v23, %v9232_v5  ;;  %7584 = vmatpush3.msra.mxu1 %v6234_v11  ;;  %v6334_v26 = vld [vmem:[%s11348_s3 + $0x2f0] sm:$0xff]  ;;  %v3636_v2 = vrot.slane %v11542_v50, 3 }
 0x1de   :  { %v7178_v27 = vpop.f32.mrf.mxu1  ;;  %v9493_v35 = vpop.f32.mrf.mxu0  ;;  %7529 = vmatmul.mubr.msk.f32.gmra.mxu1 %vm601_vm2, %v9027_v14  ;;  %7686 = vmatmul.mubr.msk.f32.vlgmr.msra.gmra.mxu0 %vm601_vm2, %v9310_v42 }
 0x1df   :  { %11538 = vst [vmem:[#allocation73_spill] sm:$0xff] %v9493_v35  ;;  %v9503_v5 = vadd.f32 %v7178_v27, %v9237_v33  ;;  %7531 = vmatprep.mubr.msk.f32.mxu1 %vm601_vm2, %v9040_v34  ;;  %7688 = vmatprep.mubr.msk.f32.mxu0 %vm601_vm2, %v9325_v40  ;;  %v6232_v33 = vld [vmem:[%s11348_s3 + $0x2c0] sm:$0xff] }
 0x1e0   :  { %v877_v11 = vpop.f32.mrf.mxu1  ;;  %v9509_v23 = vpop.f32.mrf.mxu0  ;;  %7585 = vmatprep.subr.mxu1 %v6233_v59  ;;  %7742 = vmatpush3.msra.mxu0 %v9381_v57 }
 0x1e1   :  { %11539 = vst [vmem:[#allocation74_spill] sm:$0xff] %v9509_v23  ;;  %v9513_v35 = vadd.f32 %v877_v11, %v9261_v19  ;;  %7586 = vmatpush3.msra.mxu1 %v6233_v59  ;;  %7743 = vmatprep.subr.mxu0 %v6334_v26  ;;  %v11541_v23 = vld [vmem:[#allocation12_spill] sm:$0xff]  ;;  %v6333_v19 = vld [vmem:[%s11348_s3 + $0x2e8] sm:$0xff] }
 0x1e2   :  { %v7181_v27 = vpop.f32.mrf.mxu1  ;;  %v9518_v42 = vpop.f32.mrf.mxu0  ;;  %7532 = vmatmul.mubr.msk.f32.gmra.mxu1 %vm601_vm2, %v9051_v30  ;;  %7689 = vmatmul.mubr.msk.f32.gmra.mxu0 %vm601_vm2, %v9338_v28  ;;  %v3635_v57 = vrot.slane %v11541_v23, 3 }
 0x1e3   :  { %11540 = vst [vmem:[#allocation75_spill] sm:$0xff] %v9518_v42  ;;  %v9529_v59 = vadd.f32 %v7181_v27, %v9274_v47  ;;  %7534 = vmatprep.mubr.msk.f32.mxu1 %vm601_vm2, %v9062_v62  ;;  %7691 = vmatprep.mubr.msk.f32.mxu0 %vm601_vm2, %v9355_v18  ;;  %v9545_v47 = vld [vmem:[%s11348_s3 + $0x118] sm:$0xff] }
 0x1e4   :  { %v887_v11 = vpop.f32.mrf.mxu1  ;;  %v9535_v42 = vpop.f32.mrf.mxu0  ;;  %7587 = vmatprep.subr.mxu1 %v6232_v33  ;;  %7744 = vmatpush3.msra.mxu0 %v6334_v26  ;;  %v6332_v26 = vld [vmem:[%s11348_s3 + $0x2e0] sm:$0xff] }
 0x1e5   :  { %v9539_v23 = vadd.f32 %v887_v11, %v9304_v48  ;;  %7588 = vmatpush3.msra.mxu1 %v6232_v33  ;;  %7745 = vmatprep.subr.mxu0 %v6333_v19  ;;  %v9554_v48 = vsel %vm3388_vm4, %v3635_v57, %v3636_v2  ;;  %v3812_v33 = vrot.slane %v8769_v29, 3 }
 0x1e6   :  { %v7184_v27 = vpop.f32.mrf.mxu1  ;;  %v9547_v24 = vpop.f32.mrf.mxu0  ;;  %7535 = vmatmul.mubr.msk.f32.gmra.mxu1 %vm601_vm2, %v9184_v13  ;;  %7692 = vmatmul.mubr.msk.f32.gmra.mxu0 %vm601_vm2, %v9371_v36 }
 0x1e7   :  { %v9561_v11 = vadd.f32 %v7184_v27, %v9316_v61  ;;  %7537 = vmatprep.mubr.msk.f32.mxu1 %vm601_vm2, %v9080_v0  ;;  %7694 = vmatprep.mubr.msk.f32.mxu0 %vm601_vm2, %v9554_v48  ;;  %v9574_v57 = vsel %vm3388_vm4, %v3811_v16, %v3812_v33  ;;  %v9585_v0 = vld [vmem:[%s11348_s3 + $0x138] sm:$0xff] }
 0x1e8   :  { %v897_v44 = vpop.f32.mrf.mxu1  ;;  %v9567_v50 = vpop.f32.mrf.mxu0  ;;  %7645 = vmatprep.subr.mxu1 %v9545_v47  ;;  %7746 = vmatpush3.msra.mxu0 %v6333_v19 }
 0x1e9   :  { %v9571_v2 = vadd.f32 %v897_v44, %v9346_v12  ;;  %7747 = vmatprep.subr.mxu0 %v6332_v26 }
 0x1ea   :  { %v7187_v61 = vpop.f32.mrf.mxu1  ;;  %v9576_v27 = vpop.f32.mrf.mxu0  ;;  %7538 = vmatmul.mubr.msk.f32.gmra.mxu1 %vm601_vm2, %v9088_v4  ;;  %7695 = vmatmul.mubr.msk.f32.gmra.mxu0 %vm601_vm2, %v9574_v57 }
 0x1eb   :  { %v9588_v12 = vadd.f32 %v7187_v61, %v9367_v38  ;;  %7540 = vmatprep.mubr.msk.f32.mxu1 %vm601_vm2, %v9099_v51  ;;  %7697 = vmatprep.mubr.msk.f32.mxu0 %vm601_vm2, %v9403_v31 }
 0x1ec   :  { %v907_v44 = vpop.f32.mrf.mxu1  ;;  %v9594_v16 = vpop.f32.mrf.mxu0  ;;  %7748 = vmatpush3.msra.mxu0 %v6332_v26 }
 0x1ed   :  { %11543 = vst [vmem:[#allocation76_spill] sm:$0xff] %v9594_v16  ;;  %v9597_v4 = vadd.f32 %v907_v44, %v9389_v17  ;;  %7805 = vmatprep.subr.mxu0 %v9585_v0 }
 0x1ee   :  { %v7190_v19 = vpop.f32.mrf.mxu1  ;;  %v9600_v33 = vpop.f32.mrf.mxu0  ;;  %7541 = vmatmul.mubr.msk.f32.gmra.mxu1 %vm601_vm2, %v9108_v8  ;;  %7698 = vmatmul.mubr.msk.f32.gmra.mxu0 %vm601_vm2, %v9417_v7 }
 0x1ef   :  { %11544 = vst [vmem:[#allocation77_spill] sm:$0xff] %v9600_v33  ;;  %v9607_v38 = vadd.f32 %v7190_v19, %v9394_v9  ;;  %7543 = vmatprep.mubr.msk.f32.mxu1 %vm601_vm2, %v9117_v63  ;;  %7700 = vmatprep.mubr.msk.f32.mxu0 %vm601_vm2, %v9430_v21  ;;  %v3638_v9 = vrot.slane %v8467_v54, 3  ;;  %v3639_v19 = vrot.slane %v8823_v41, 3  ;;  %v3814_v54 = vrot.slane %v8457_v32, 3 }
 0x1f0   :  { %v917_v17 = vpop.f32.mrf.mxu1  ;;  %v9613_v26 = vpop.f32.mrf.mxu0 }
 0x1f1   :  { %11545 = vst [vmem:[#allocation78_spill] sm:$0xff] %v9613_v26  ;;  %v9616_v61 = vadd.f32 %v917_v17, %v9412_v3 }
 0x1f2   :  { %v7193_v44 = vpop.f32.mrf.mxu1  ;;  %v9618_v29 = vpop.f32.mrf.mxu0  ;;  %7544 = vmatmul.mubr.msk.f32.gmra.mxu1 %vm601_vm2, %v9125_v39  ;;  %7701 = vmatmul.mubr.msk.f32.gmra.mxu0 %vm601_vm2, %v9444_v52 }
 0x1f3   :  { %11546 = vst [vmem:[#allocation79_spill] sm:$0xff] %v9618_v29  ;;  %v9627_v33 = vadd.f32 %v7193_v44, %v9421_v60  ;;  %7546 = vmatprep.mubr.msk.f32.mxu1 %vm601_vm2, %v9132_v55  ;;  %7703 = vmatprep.mubr.msk.f32.mxu0 %vm601_vm2, %v9456_v46  ;;  %v3815_v29 = vrot.slane %v11504_v53, 3  ;;  %v9647_v60 = vsel %vm3388_vm4, %v3638_v9, %v3639_v19 }
 0x1f4   :  { %v927_v3 = vpop.f32.mrf.mxu1  ;;  %v9633_v17 = vpop.f32.mrf.mxu0  ;;  %v873_v53 = vadd.f32 %v9472_v10, %v9219_v37 }
 0x1f5   :  { %v9637_v26 = vadd.f32 %v927_v3, %v9438_v20  ;;  %v9664_v9 = vsel %vm3388_vm4, %v3814_v54, %v3815_v29 }
 0x1f6   :  { %v7196_v41 = vpop.f32.mrf.mxu1  ;;  %v9640_v16 = vpop.f32.mrf.mxu0  ;;  %7547 = vmatmul.mubr.msk.f32.gmra.mxu1 %vm601_vm2, %v9247_v25  ;;  %7704 = vmatmul.mubr.msk.f32.gmra.mxu0 %vm601_vm2, %v9467_v22  ;;  %11547 = vst [vmem:[#allocation80_spill] sm:$0xff] %v9664_v9 }
 0x1f7   :  { %v9650_v44 = vadd.f32 %v7196_v41, %v9447_v6  ;;  %7589 = vmatprep.mubr.msk.f32.mxu1 %vm601_vm2, %v9016_v58  ;;  %7706 = vmatprep.mubr.msk.f32.mxu0 %vm601_vm2, %v9647_v60  ;;  %v6274_v41 = vld [vmem:[%s11348_s3 + $0x110] sm:$0xff] }
 0x1f8   :  { %v937_v20 = vpop.f32.mrf.mxu1  ;;  %v9656_v3 = vpop.f32.mrf.mxu0 }
 0x1f9   :  { %v9661_v32 = vadd.f32 %v937_v20, %v9462_v45  ;;  %v11549_v20 = vld [vmem:[#allocation39_spill] sm:$0xff] }
 0x1fa   :  { %v7207_v58 = vpop.f32.mrf.mxu1  ;;  %v9669_v6 = vpop.f32.mrf.mxu0  ;;  %7590 = vmatmul.mubr.msk.f32.vlgmr.msra.gmra.mxu1 %vm601_vm2, %v9027_v14  ;;  %7707 = vmatmul.mubr.msk.f32.gmra.mxu0 %vm601_vm2, %v9664_v9  ;;  %v6273_v14 = vld [vmem:[%s11348_s3 + $0x108] sm:$0xff] }
 0x1fb   :  { %v9675_v10 = vadd.f32 %v7207_v58, %v873_v53  ;;  %7646 = vmatpush3.msra.mxu1 %v9545_v47  ;;  %7592 = vmatprep.mubr.msk.f32.mxu1 %vm601_vm2, %v9040_v34  ;;  %v6374_v34 = vld [vmem:[%s11348_s3 + $0x130] sm:$0xff] }
 0x1fc   :  { %7749 = vmatprep.mubr.msk.f32.mxu0 %vm601_vm2, %v9325_v40  ;;  %v1023_v54 = vpop.f32.mrf.mxu1  ;;  %v9682_v29 = vpop.f32.mrf.mxu0  ;;  %7647 = vmatprep.subr.mxu1 %v6274_v41 }
 0x1fd   :  { %v9685_v37 = vadd.f32 %v1023_v54, %v9488_v15  ;;  %7648 = vmatpush3.msra.mxu1 %v6274_v41  ;;  %v3212_v41 = vrot.slane %v11549_v20, 2  ;;  %v11551_v54 = vld [vmem:[#allocation38_spill] sm:$0xff] }
 0x1fe   :  { %v7210_v53 = vpop.f32.mrf.mxu1  ;;  %v9690_v45 = vpop.f32.mrf.mxu0  ;;  %7593 = vmatmul.mubr.msk.f32.gmra.mxu1 %vm601_vm2, %v9051_v30  ;;  %7750 = vmatmul.mubr.msk.f32.vlgmr.msra.gmra.mxu0 %vm601_vm2, %v9338_v28 }
 0x1ff   :  { %v9700_v15 = vadd.f32 %v7210_v53, %v9503_v5  ;;  %7595 = vmatprep.mubr.msk.f32.mxu1 %vm601_vm2, %v9062_v62  ;;  %7752 = vmatprep.mubr.msk.f32.mxu0 %vm601_vm2, %v9355_v18  ;;  %v6272_v5 = vld [vmem:[%s11348_s3 + $0x100] sm:$0xff] }
 0x200   :  { %v1033_v47 = vpop.f32.mrf.mxu1  ;;  %v9706_v19 = vpop.f32.mrf.mxu0  ;;  %7649 = vmatprep.subr.mxu1 %v6273_v14  ;;  %7806 = vmatpush3.msra.mxu0 %v9585_v0  ;;  %v6373_v0 = vld [vmem:[%s11348_s3 + $0x128] sm:$0xff] }
 0x201   :  { %11548 = vst [vmem:[#allocation81_spill] sm:$0xff] %v9706_v19  ;;  %v9710_v30 = vadd.f32 %v1033_v47, %v9513_v35  ;;  %7650 = vmatpush3.msra.mxu1 %v6273_v14  ;;  %7807 = vmatprep.subr.mxu0 %v6374_v34  ;;  %v3987_v35 = vrot.slane %v11502_v1, 3  ;;  %v3213_v14 = vrot.slane %v11551_v54, 2  ;;  %v3988_v1 = vrot.slane %v8888_v43, 3 }
 0x202   :  { %v7213_v62 = vpop.f32.mrf.mxu1  ;;  %v9716_v58 = vpop.f32.mrf.mxu0  ;;  %7596 = vmatmul.mubr.msk.f32.gmra.mxu1 %vm601_vm2, %v9184_v13  ;;  %7753 = vmatmul.mubr.msk.f32.gmra.mxu0 %vm601_vm2, %v9371_v36 }
 0x203   :  { %11550 = vst [vmem:[#allocation39_spill] sm:$0xff] %v9716_v58  ;;  %v9728_v53 = vadd.f32 %v7213_v62, %v9529_v59  ;;  %7598 = vmatprep.mubr.msk.f32.mxu1 %vm601_vm2, %v9195_v49  ;;  %7755 = vmatprep.mubr.msk.f32.mxu0 %vm601_vm2, %v9554_v48  ;;  %v3214_v19 = vsel %vm2437_vm3, %v3212_v41, %v3213_v14  ;;  %v4163_v59 = vrot.slane %v11549_v20, 3  ;;  %v9745_v49 = vld [vmem:[%s11348_s3 + $0x258] sm:$0xff]  ;;  %v4164_v20 = vrot.slane %v11551_v54, 3 }
 0x204   :  { %v1043_v13 = vpop.f32.mrf.mxu1  ;;  %v9734_v47 = vpop.f32.mrf.mxu0  ;;  %7651 = vmatprep.subr.mxu1 %v6272_v5  ;;  %7808 = vmatpush3.msra.mxu0 %v6374_v34  ;;  %v6372_v34 = vld [vmem:[%s11348_s3 + $0x120] sm:$0xff] }
 0x205   :  { %11552 = vst [vmem:[#allocation38_spill] sm:$0xff] %v9734_v47  ;;  %v9738_v58 = vadd.f32 %v1043_v13, %v9539_v23  ;;  %7652 = vmatpush3.msra.mxu1 %v6272_v5  ;;  %7809 = vmatprep.subr.mxu0 %v6373_v0  ;;  %v9753_v23 = vsel %vm3388_vm4, %v3987_v35, %v3988_v1 }
 0x206   :  { %v7216_v62 = vpop.f32.mrf.mxu1  ;;  %v9747_v47 = vpop.f32.mrf.mxu0  ;;  %7599 = vmatmul.mubr.msk.f32.gmra.mxu1 %vm601_vm2, %v3214_v19  ;;  %7756 = vmatmul.mubr.msk.f32.gmra.mxu0 %vm601_vm2, %v9574_v57  ;;  %v4165_v35 = vsel %vm3388_vm4, %v4163_v59, %v4164_v20  ;;  %v11556_v59 = vld [vmem:[#allocation27_spill] sm:$0xff] }
 0x207   :  { %v9760_v41 = vadd.f32 %v7216_v62, %v9561_v11  ;;  %7601 = vmatprep.mubr.msk.f32.mxu1 %vm601_vm2, %v9099_v51  ;;  %7758 = vmatprep.mubr.msk.f32.mxu0 %vm601_vm2, %v9753_v23  ;;  %v9779_v51 = vld [vmem:[%s11348_s3 + $0x278] sm:$0xff] }
 0x208   :  { %v1053_v19 = vpop.f32.mrf.mxu1  ;;  %v9766_v5 = vpop.f32.mrf.mxu0  ;;  %7709 = vmatprep.subr.mxu1 %v9745_v49  ;;  %7810 = vmatpush3.msra.mxu0 %v6373_v0 }
 0x209   :  { %11553 = vst [vmem:[#allocation82_spill] sm:$0xff] %v9766_v5  ;;  %v1108_v1 = vadd.f32 %v1053_v19, %v9571_v2  ;;  %7811 = vmatprep.subr.mxu0 %v6372_v34  ;;  %v11611_v5 = vld [vmem:[#allocation12_spill] sm:$0xff] }
 0x20a   :  { %v7219_v54 = vpop.f32.mrf.mxu1  ;;  %v9771_v11 = vpop.f32.mrf.mxu0  ;;  %7602 = vmatmul.mubr.msk.f32.gmra.mxu1 %vm601_vm2, %v9108_v8  ;;  %7759 = vmatmul.mubr.msk.f32.gmra.mxu0 %vm601_vm2, %v4165_v35  ;;  %v4586_v43 = vrot.slane %v11611_v5, 4  ;;  %v6412_v5 = vld [vmem:[%s11348_s3 + $0x260] sm:$0xff] }
 0x20b   :  { %11554 = vst [vmem:[#allocation83_spill] sm:$0xff] %v9771_v11  ;;  %v1111_v0 = vadd.f32 %v7219_v54, %v9588_v12  ;;  %7604 = vmatprep.mubr.msk.f32.mxu1 %vm601_vm2, %v9117_v63  ;;  %7761 = vmatprep.mubr.msk.f32.mxu0 %vm601_vm2, %v9430_v21  ;;  %v9787_v2 = vadd.f32 %v9387_v56, %v1108_v1  ;;  %v11558_v56 = vld [vmem:[#allocation66_spill] sm:$0xff]  ;;  %v11561_v54 = vld [vmem:[#allocation51_spill] sm:$0xff] }
 0x20c   :  { %v1063_v14 = vpop.f32.mrf.mxu1  ;;  %v9789_v8 = vpop.f32.mrf.mxu0  ;;  %7812 = vmatpush3.msra.mxu0 %v6372_v34  ;;  %v11560_v1 = vld [vmem:[#allocation50_spill] sm:$0xff] }
 0x20d   :  { %11555 = vst [vmem:[#allocation84_spill] sm:$0xff] %v9789_v8  ;;  %v1110_v13 = vadd.f32 %v1063_v14, %v9597_v4  ;;  %v9793_v62 = vadd.f32 %v11556_v59, %v1111_v0  ;;  %7869 = vmatprep.subr.mxu0 %v9779_v51  ;;  %v3216_v35 = vrot.slane %v11560_v1, 2  ;;  %v3215_v0 = vrot.slane %v11561_v54, 2  ;;  %v11562_v14 = vld [vmem:[#allocation67_spill] sm:$0xff] }
 0x20e   :  { %v7222_v12 = vpop.f32.mrf.mxu1  ;;  %v9796_v20 = vpop.f32.mrf.mxu0  ;;  %7605 = vmatmul.mubr.msk.f32.gmra.mxu1 %vm601_vm2, %v9125_v39  ;;  %7762 = vmatmul.mubr.msk.f32.gmra.mxu0 %vm601_vm2, %v9444_v52 }
 0x20f   :  { %11557 = vst [vmem:[#allocation27_spill] sm:$0xff] %v9796_v20  ;;  %v1113_v63 = vadd.f32 %v7222_v12, %v9607_v38  ;;  %7607 = vmatprep.mubr.msk.f32.mxu1 %vm601_vm2, %v9132_v55  ;;  %7764 = vmatprep.mubr.msk.f32.mxu0 %vm601_vm2, %v9456_v46  ;;  %v9808_v4 = vadd.f32 %v11558_v56, %v1110_v13  ;;  %v11564_v13 = vld [vmem:[#allocation29_spill] sm:$0xff]  ;;  %v11565_v56 = vld [vmem:[#allocation56_spill] sm:$0xff] }
 0x210   :  { %v1073_v34 = vpop.f32.mrf.mxu1  ;;  %v9810_v19 = vpop.f32.mrf.mxu0  ;;  %v3990_v12 = vrot.slane %v11564_v13, 3 }
 0x211   :  { %11559 = vst [vmem:[#allocation66_spill] sm:$0xff] %v9810_v19  ;;  %v1112_v39 = vadd.f32 %v1073_v34, %v9616_v61  ;;  %v9816_v38 = vadd.f32 %v11562_v14, %v1113_v63  ;;  %v3991_v19 = vrot.slane %v11565_v56, 3  ;;  %v11566_v34 = vld [vmem:[#allocation57_spill] sm:$0xff]  ;;  %v11567_v63 = vld [vmem:[#allocation68_spill] sm:$0xff]  ;;  %v3217_v56 = vsel %vm2437_vm3, %v3215_v0, %v3216_v35 }
 0x212   :  { %v7225_v59 = vpop.f32.mrf.mxu1  ;;  %v9818_v55 = vpop.f32.mrf.mxu0  ;;  %7608 = vmatmul.mubr.msk.f32.gmra.mxu1 %vm601_vm2, %v9247_v25  ;;  %7765 = vmatmul.mubr.msk.f32.gmra.mxu0 %vm601_vm2, %v9467_v22  ;;  %v4167_v25 = vrot.slane %v11560_v1, 3  ;;  %v11573_v0 = vld [vmem:[#allocation60_spill] sm:$0xff] }
 0x213   :  { %11563 = vst [vmem:[#allocation50_spill] sm:$0xff] %v9818_v55  ;;  %v1115_v61 = vadd.f32 %v7225_v59, %v9627_v33  ;;  %7610 = vmatprep.mubr.msk.f32.mxu1 %vm601_vm2, %v11566_v34  ;;  %7767 = vmatprep.mubr.msk.f32.mxu0 %vm601_vm2, %v9647_v60  ;;  %v9832_v14 = vadd.f32 %v11567_v63, %v1112_v39  ;;  %v4166_v33 = vrot.slane %v11561_v54, 3  ;;  %v11569_v59 = vld [vmem:[#allocation69_spill] sm:$0xff]  ;;  %v11574_v54 = vld [vmem:[#allocation70_spill] sm:$0xff] }
 0x214   :  { %v1083_v55 = vpop.f32.mrf.mxu1  ;;  %v9835_v20 = vpop.f32.mrf.mxu0  ;;  %v9849_v1 = vsel %vm3388_vm4, %v3990_v12, %v3991_v19  ;;  %v11572_v39 = vld [vmem:[#allocation5_spill] sm:$0xff]  ;;  %v11576_v63 = vld [vmem:[#allocation30_spill] sm:$0xff] }
 0x215   :  { %11568 = vst [vmem:[#allocation51_spill] sm:$0xff] %v9835_v20  ;;  %v1114_v13 = vadd.f32 %v1083_v55, %v9637_v26  ;;  %v9841_v8 = vadd.f32 %v11569_v59, %v1115_v61  ;;  %11571 = vst [vmem:[#allocation57_spill] sm:$0xff] %v9849_v1  ;;  %v4343_v26 = vrot.slane %v11572_v39, 4  ;;  %v4344_v59 = vrot.slane %v11576_v63, 4  ;;  %v11577_v19 = vld [vmem:[#allocation6_spill] sm:$0xff]  ;;  %v11581_v63 = vld [vmem:[#allocation61_spill] sm:$0xff] }
 0x216   :  { %v7228_v34 = vpop.f32.mrf.mxu1  ;;  %v9843_v11 = vpop.f32.mrf.mxu0  ;;  %7611 = vmatmul.mubr.msk.f32.gmra.mxu1 %vm601_vm2, %v3217_v56  ;;  %7768 = vmatmul.mubr.msk.f32.gmra.mxu0 %vm601_vm2, %v9664_v9  ;;  %v4346_v12 = vrot.slane %v11577_v19, 4 }
 0x217   :  { %11570 = vst [vmem:[#allocation67_spill] sm:$0xff] %v9843_v11  ;;  %v1117_v35 = vadd.f32 %v7228_v34, %v9650_v44  ;;  %7653 = vmatprep.mubr.msk.f32.mxu1 %vm601_vm2, %v11573_v0  ;;  %7770 = vmatprep.mubr.msk.f32.mxu0 %vm601_vm2, %v9849_v1  ;;  %v9858_v55 = vadd.f32 %v11574_v54, %v1114_v13  ;;  %v11578_v44 = vld [vmem:[#allocation16_spill] sm:$0xff]  ;;  %v6314_v1 = vld [vmem:[%s11348_s3 + $0x250] sm:$0xff] }
 0x218   :  { %v1093_v56 = vpop.f32.mrf.mxu1  ;;  %v9860_v61 = vpop.f32.mrf.mxu0  ;;  %v1275_v34 = vadd.f32 %v11578_v44, %v9675_v10  ;;  %v4168_v0 = vsel %vm3388_vm4, %v4166_v33, %v4167_v25  ;;  %v11579_v13 = vld [vmem:[#allocation71_spill] sm:$0xff]  ;;  %v11586_v44 = vld [vmem:[#allocation58_spill] sm:$0xff] }
 0x219   :  { %11575 = vst [vmem:[#allocation68_spill] sm:$0xff] %v9860_v61  ;;  %v1116_v39 = vadd.f32 %v1093_v56, %v9661_v32  ;;  %v9872_v54 = vadd.f32 %v11579_v13, %v1117_v35  ;;  %v9880_v32 = vsel %vm4339_vm6, %v4343_v26, %v4344_v59  ;;  %v11583_v10 = vld [vmem:[#allocation7_spill] sm:$0xff]  ;;  %v1274_v13 = vadd.f32 %v11586_v44, %v9685_v37 }
 0x21a   :  { %v7271_v11 = vpop.f32.mrf.mxu1  ;;  %v9874_v61 = vpop.f32.mrf.mxu0  ;;  %7654 = vmatmul.mubr.msk.f32.vlgmr.msra.gmra.mxu1 %vm601_vm2, %v11581_v63  ;;  %7771 = vmatmul.mubr.msk.f32.gmra.mxu0 %vm601_vm2, %v4168_v0  ;;  %11582 = vst [vmem:[#allocation5_spill] sm:$0xff] %v9880_v32  ;;  %v4349_v25 = vrot.slane %v11583_v10, 4  ;;  %v11584_v33 = vld [vmem:[#allocation31_spill] sm:$0xff]  ;;  %v11589_v0 = vld [vmem:[#allocation32_spill] sm:$0xff] }
 0x21b   :  { %11580 = vst [vmem:[#allocation69_spill] sm:$0xff] %v9874_v61  ;;  %v4347_v56 = vrot.slane %v11584_v33, 4  ;;  %v1447_v19 = vadd.f32 %v7271_v11, %v1275_v34  ;;  %7710 = vmatpush3.msra.mxu1 %v9745_v49  ;;  %v11585_v35 = vld [vmem:[#allocation63_spill] sm:$0xff]  ;;  %v11587_v61 = vld [vmem:[#allocation72_spill] sm:$0xff]  ;;  %7813 = vmatprep.mubr.msk.f32.mxu0 %vm601_vm2, %v9880_v32  ;;  %v4350_v10 = vrot.slane %v11589_v0, 4 }
 0x21c   :  { %7656 = vmatprep.mubr.msk.f32.mxu1 %vm601_vm2, %v11585_v35  ;;  %v9890_v63 = vadd.f32 %v11587_v61, %v1116_v39  ;;  %v1367_v26 = vpop.f32.mrf.mxu1  ;;  %v9894_v59 = vpop.f32.mrf.mxu0  ;;  %7711 = vmatprep.subr.mxu1 %v6314_v1  ;;  %v11590_v11 = vld [vmem:[#allocation8_spill] sm:$0xff]  ;;  %v11591_v33 = vld [vmem:[#allocation59_spill] sm:$0xff]  ;;  %v6313_v61 = vld [vmem:[%s11348_s3 + $0x248] sm:$0xff] }
 0x21d   :  { %11588 = vst [vmem:[#allocation60_spill] sm:$0xff] %v9894_v59  ;;  %v4352_v49 = vrot.slane %v11590_v11, 4  ;;  %v1446_v34 = vadd.f32 %v1367_v26, %v1274_v13  ;;  %v1277_v20 = vadd.f32 %v11591_v33, %v9700_v15  ;;  %v9901_v37 = vsel %vm4339_vm6, %v4346_v12, %v4347_v56  ;;  %7712 = vmatpush3.msra.mxu1 %v6314_v1  ;;  %v11593_v39 = vld [vmem:[#allocation73_spill] sm:$0xff]  ;;  %v6414_v56 = vld [vmem:[%s11348_s3 + $0x270] sm:$0xff] }
 0x21e   :  { %11592 = vst [vmem:[#allocation70_spill] sm:$0xff] %v9901_v37  ;;  %v9907_v44 = vadd.f32 %v11593_v39, %v1447_v19  ;;  %v11594_v59 = vld [vmem:[#allocation33_spill] sm:$0xff]  ;;  %v7274_v32 = vpop.f32.mrf.mxu1  ;;  %v9910_v9 = vpop.f32.mrf.mxu0  ;;  %7657 = vmatmul.mubr.msk.f32.gmra.mxu1 %vm601_vm2, %v9325_v40  ;;  %7814 = vmatmul.mubr.msk.f32.vlgmr.msra.gmra.mxu0 %vm601_vm2, %v9901_v37  ;;  %v9917_v15 = vsel %vm4339_vm6, %v4349_v25, %v4350_v10  ;;  %v11597_v13 = vld [vmem:[#allocation62_spill] sm:$0xff]  ;;  %v11602_v37 = vld [vmem:[#allocation64_spill] sm:$0xff] }
 0x21f   :  { %v4353_v0 = vrot.slane %v11594_v59, 4  ;;  %11595 = vst [vmem:[#allocation30_spill] sm:$0xff] %v9910_v9  ;;  %v11596_v1 = vld [vmem:[#allocation9_spill] sm:$0xff]  ;;  %v1449_v19 = vadd.f32 %v7274_v32, %v1277_v20  ;;  %7659 = vmatprep.mubr.msk.f32.mxu1 %vm601_vm2, %v9338_v28  ;;  %7816 = vmatprep.mubr.msk.f32.mxu0 %vm601_vm2, %v9917_v15  ;;  %v1276_v26 = vadd.f32 %v11597_v13, %v9710_v30  ;;  %v11598_v59 = vld [vmem:[#allocation74_spill] sm:$0xff]  ;;  %v11603_v13 = vld [vmem:[#allocation75_spill] sm:$0xff] }
 0x220   :  { %v4355_v12 = vrot.slane %v11596_v1, 4  ;;  %v9930_v11 = vadd.f32 %v11598_v59, %v1446_v34  ;;  %v11599_v25 = vld [vmem:[#allocation34_spill] sm:$0xff]  ;;  %v1377_v33 = vpop.f32.mrf.mxu1  ;;  %v9933_v39 = vpop.f32.mrf.mxu0  ;;  %7713 = vmatprep.subr.mxu1 %v6313_v61  ;;  %7870 = vmatpush3.msra.mxu0 %v9779_v51  ;;  %v1279_v30 = vadd.f32 %v11602_v37, %v9728_v53  ;;  %v6312_v34 = vld [vmem:[%s11348_s3 + $0x240] sm:$0xff]  ;;  %v11606_v51 = vld [vmem:[#allocation11_spill] sm:$0xff] }
 0x221   :  { %v4356_v10 = vrot.slane %v11599_v25, 4  ;;  %11600 = vst [vmem:[#allocation6_spill] sm:$0xff] %v9933_v39  ;;  %v9936_v1 = vsel %vm4339_vm6, %v4352_v49, %v4353_v0  ;;  %v11601_v20 = vld [vmem:[#allocation10_spill] sm:$0xff]  ;;  %v1448_v9 = vadd.f32 %v1377_v33, %v1276_v26  ;;  %7714 = vmatpush3.msra.mxu1 %v6313_v61  ;;  %7871 = vmatprep.subr.mxu0 %v6414_v56  ;;  %v11604_v49 = vld [vmem:[#allocation35_spill] sm:$0xff]  ;;  %v4361_v37 = vrot.slane %v11606_v51, 4  ;;  %v11607_v26 = vld [vmem:[#allocation65_spill] sm:$0xff] }
 0x222   :  { %v4358_v32 = vrot.slane %v11601_v20, 4  ;;  %v9946_v59 = vadd.f32 %v11603_v13, %v1449_v19  ;;  %v4359_v0 = vrot.slane %v11604_v49, 4  ;;  %v7277_v25 = vpop.f32.mrf.mxu1  ;;  %v9949_v20 = vpop.f32.mrf.mxu0  ;;  %7660 = vmatmul.mubr.msk.f32.gmra.mxu1 %vm601_vm2, %v9355_v18  ;;  %7817 = vmatmul.mubr.msk.f32.gmra.mxu0 %vm601_vm2, %v9936_v1  ;;  %v6413_v61 = vld [vmem:[%s11348_s3 + $0x268] sm:$0xff]  ;;  %v1278_v33 = vadd.f32 %v11607_v26, %v9738_v58 }
 0x223   :  { %11605 = vst [vmem:[#allocation16_spill] sm:$0xff] %v9949_v20  ;;  %v9956_v53 = vsel %vm4339_vm6, %v4355_v12, %v4356_v10  ;;  %v1451_v19 = vadd.f32 %v7277_v25, %v1279_v30  ;;  %7662 = vmatprep.mubr.msk.f32.mxu1 %vm601_vm2, %v9371_v36  ;;  %v9969_v13 = vadd.f32 %v9535_v42, %v1448_v9  ;;  %v11608_v12 = vld [vmem:[#allocation37_spill] sm:$0xff]  ;;  %v11610_v25 = vld [vmem:[#allocation23_spill] sm:$0xff] }
 0x224   :  { %7819 = vmatprep.mubr.msk.f32.mxu0 %vm601_vm2, %v9956_v53  ;;  %v4362_v10 = vrot.slane %v11608_v12, 4  ;;  %v1387_v49 = vpop.f32.mrf.mxu1  ;;  %v9972_v51 = vpop.f32.mrf.mxu0  ;;  %v9975_v20 = vsel %vm4339_vm6, %v4358_v32, %v4359_v0  ;;  %7715 = vmatprep.subr.mxu1 %v6312_v34  ;;  %v1281_v39 = vadd.f32 %v11610_v25, %v9760_v41  ;;  %v9983_v42 = vld [vmem:[%s11348_s3 + $0x98] sm:$0xff] }
 0x225   :  { %11609 = vst [vmem:[#allocation71_spill] sm:$0xff] %v9972_v51  ;;  %7872 = vmatpush3.msra.mxu0 %v6414_v56  ;;  %v1450_v30 = vadd.f32 %v1387_v49, %v1278_v33  ;;  %7716 = vmatpush3.msra.mxu1 %v6312_v34  ;;  %v9986_v9 = vadd.f32 %v9547_v24, %v1451_v19  ;;  %v11613_v56 = vld [vmem:[#allocation48_spill] sm:$0xff] }
 0x226   :  { %7873 = vmatprep.subr.mxu0 %v6413_v61  ;;  %v7280_v58 = vpop.f32.mrf.mxu1  ;;  %v9988_v32 = vpop.f32.mrf.mxu0  ;;  %7663 = vmatmul.mubr.msk.f32.gmra.mxu1 %vm601_vm2, %v9554_v48  ;;  %v9995_v41 = vsel %vm4339_vm6, %v4361_v37, %v4362_v10  ;;  %v4587_v34 = vrot.slane %v11613_v56, 4  ;;  %v11614_v0 = vld [vmem:[#allocation28_spill] sm:$0xff] }
 0x227   :  { %11612 = vst [vmem:[#allocation61_spill] sm:$0xff] %v9988_v32  ;;  %7820 = vmatmul.mubr.msk.f32.gmra.mxu0 %vm601_vm2, %v9975_v20  ;;  %v1453_v24 = vadd.f32 %v7280_v58, %v1281_v39  ;;  %7665 = vmatprep.mubr.msk.f32.mxu1 %vm601_vm2, %v11614_v0  ;;  %v10006_v19 = vadd.f32 %v9567_v50, %v1450_v30  ;;  %v11616_v39 = vld [vmem:[#allocation15_spill] sm:$0xff]  ;;  %v11619_v30 = vld [vmem:[#allocation40_spill] sm:$0xff] }
 0x228   :  { %7822 = vmatprep.mubr.msk.f32.mxu0 %vm601_vm2, %v9995_v41  ;;  %v1397_v26 = vpop.f32.mrf.mxu1  ;;  %v10008_v33 = vpop.f32.mrf.mxu0  ;;  %7773 = vmatprep.subr.mxu1 %v9983_v42  ;;  %v10013_v12 = vsel %vm4339_vm6, %v4586_v43, %v4587_v34  ;;  %v4370_v10 = vrot.slane %v11616_v39, 4  ;;  %v4371_v43 = vrot.slane %v11619_v30, 4  ;;  %v11621_v56 = vld [vmem:[#allocation76_spill] sm:$0xff]  ;;  %v11623_v0 = vld [vmem:[#allocation43_spill] sm:$0xff]  ;;  %v11626_v30 = vld [vmem:[#allocation77_spill] sm:$0xff] }
 0x229   :  { %11615 = vst [vmem:[#allocation7_spill] sm:$0xff] %v10008_v33  ;;  %7874 = vmatpush3.msra.mxu0 %v6413_v61  ;;  %v1452_v37 = vadd.f32 %v1397_v26, %v9787_v2  ;;  %v10017_v49 = vadd.f32 %v9576_v27, %v1453_v24  ;;  %v11618_v61 = vld [vmem:[#allocation17_spill] sm:$0xff]  ;;  %v11620_v27 = vld [vmem:[#allocation36_spill] sm:$0xff]  ;;  %v4374_v26 = vrot.slane %v11623_v0, 4  ;;  %v11635_v32 = vld [vmem:[#allocation47_spill] sm:$0xff] }
 0x22a   :  { %7875 = vmatprep.subr.mxu0 %v6412_v5  ;;  %v7283_v25 = vpop.f32.mrf.mxu1  ;;  %v10019_v50 = vpop.f32.mrf.mxu0  ;;  %7666 = vmatmul.mubr.msk.f32.gmra.mxu1 %vm601_vm2, %v9403_v31  ;;  %v4373_v2 = vrot.slane %v11618_v61, 4  ;;  %v10040_v61 = vsel %vm4339_vm6, %v4370_v10, %v4371_v43  ;;  %v11629_v10 = vld [vmem:[#allocation44_spill] sm:$0xff]  ;;  %v11631_v0 = vld [vmem:[#allocation45_spill] sm:$0xff] }
 0x22b   :  { %11617 = vst [vmem:[#allocation31_spill] sm:$0xff] %v10019_v50  ;;  %7823 = vmatmul.mubr.msk.f32.gmra.mxu0 %vm601_vm2, %v10013_v12  ;;  %v1455_v58 = vadd.f32 %v7283_v25, %v9793_v62  ;;  %7668 = vmatprep.mubr.msk.f32.mxu1 %vm601_vm2, %v9417_v7  ;;  %v10033_v34 = vadd.f32 %v11621_v56, %v1452_v37  ;;  %11624 = vst [vmem:[#allocation58_spill] sm:$0xff] %v10040_v61  ;;  %v11625_v62 = vld [vmem:[#allocation18_spill] sm:$0xff]  ;;  %v4377_v43 = vrot.slane %v11629_v10, 4 }
 0x22c   :  { %7825 = vmatprep.mubr.msk.f32.mxu0 %vm601_vm2, %v11620_v27  ;;  %v1407_v24 = vpop.f32.mrf.mxu1  ;;  %v10035_v31 = vpop.f32.mrf.mxu0  ;;  %7876 = vmatpush3.msra.mxu0 %v6412_v5  ;;  %v4376_v25 = vrot.slane %v11625_v62, 4  ;;  %v10053_v5 = vsel %vm4339_vm6, %v4373_v2, %v4374_v26  ;;  %v4383_v62 = vrot.slane %v11631_v0, 4 }
 0x22d   :  { %11622 = vst [vmem:[#allocation63_spill] sm:$0xff] %v10035_v31  ;;  %v1454_v39 = vadd.f32 %v1407_v24, %v9808_v4  ;;  %v10044_v50 = vadd.f32 %v11626_v30, %v1455_v58  ;;  %v11628_v4 = vld [vmem:[#allocation19_spill] sm:$0xff]  ;;  %v11630_v58 = vld [vmem:[#allocation78_spill] sm:$0xff] }
 0x22e   :  { %v7286_v27 = vpop.f32.mrf.mxu1  ;;  %v10046_v33 = vpop.f32.mrf.mxu0  ;;  %7669 = vmatmul.mubr.msk.f32.gmra.mxu1 %vm601_vm2, %v9430_v21  ;;  %v4379_v37 = vrot.slane %v11628_v4, 4  ;;  %v11632_v30 = vld [vmem:[#allocation46_spill] sm:$0xff]  ;;  %v11634_v31 = vld [vmem:[#allocation79_spill] sm:$0xff] }
 0x22f   :  { %11627 = vst [vmem:[#allocation72_spill] sm:$0xff] %v10046_v33  ;;  %7826 = vmatmul.mubr.msk.f32.gmra.mxu0 %vm601_vm2, %v10040_v61  ;;  %v1457_v56 = vadd.f32 %v7286_v27, %v9816_v38  ;;  %7671 = vmatprep.mubr.msk.f32.mxu1 %vm601_vm2, %v9444_v52  ;;  %v10063_v24 = vadd.f32 %v11630_v58, %v1454_v39  ;;  %v4380_v2 = vrot.slane %v11632_v30, 4  ;;  %v11633_v27 = vld [vmem:[#allocation20_spill] sm:$0xff]  ;;  %v4386_v39 = vrot.slane %v11635_v32, 4 }
 0x230   :  { %7828 = vmatprep.mubr.msk.f32.mxu0 %vm601_vm2, %v10053_v5  ;;  %v1417_v26 = vpop.f32.mrf.mxu1  ;;  %v10067_v33 = vpop.f32.mrf.mxu0  ;;  %v10071_v38 = vsel %vm4339_vm6, %v4376_v25, %v4377_v43  ;;  %v4382_v10 = vrot.slane %v11633_v27, 4  ;;  %v11637_v25 = vld [vmem:[#allocation22_spill] sm:$0xff] }
 0x231   :  { %v1456_v4 = vadd.f32 %v1417_v26, %v9832_v14  ;;  %v10075_v61 = vadd.f32 %v11634_v31, %v1457_v56  ;;  %v10085_v14 = vsel %vm4339_vm6, %v4379_v37, %v4380_v2  ;;  %v4385_v43 = vrot.slane %v11637_v25, 4  ;;  %v11638_v31 = vld [vmem:[#allocation53_spill] sm:$0xff] }
 0x232   :  { %v7289_v58 = vpop.f32.mrf.mxu1  ;;  %v10078_v51 = vpop.f32.mrf.mxu0  ;;  %7672 = vmatmul.mubr.msk.f32.gmra.mxu1 %vm601_vm2, %v9456_v46  ;;  %v4590_v56 = vrot.slane %v11638_v31, 4  ;;  %v10101_v2 = vsel %vm4339_vm6, %v4382_v10, %v4383_v62 }
 0x233   :  { %11636 = vst [vmem:[#allocation32_spill] sm:$0xff] %v10078_v51  ;;  %7829 = vmatmul.mubr.msk.f32.gmra.mxu0 %vm601_vm2, %v10071_v38  ;;  %v1459_v0 = vadd.f32 %v7289_v58, %v9841_v8  ;;  %7674 = vmatprep.mubr.msk.f32.mxu1 %vm601_vm2, %v9467_v22  ;;  %v10094_v32 = vadd.f32 %v9633_v17, %v1456_v4  ;;  %v11639_v8 = vld [vmem:[#allocation25_spill] sm:$0xff] }
 0x234   :  { %7831 = vmatprep.mubr.msk.f32.mxu0 %vm601_vm2, %v10085_v14  ;;  %v1427_v30 = vpop.f32.mrf.mxu1  ;;  %v10097_v26 = vpop.f32.mrf.mxu0  ;;  %v4589_v27 = vrot.slane %v11639_v8, 4  ;;  %v10114_v17 = vsel %vm4339_vm6, %v4385_v43, %v4386_v39  ;;  %v11641_v8 = vld [vmem:[#allocation39_spill] sm:$0xff] }
 0x235   :  { %v1458_v37 = vadd.f32 %v1427_v30, %v9858_v55  ;;  %v10105_v58 = vadd.f32 %v9640_v16, %v1459_v0 }
 0x236   :  { %v7292_v25 = vpop.f32.mrf.mxu1  ;;  %v10107_v51 = vpop.f32.mrf.mxu0  ;;  %7675 = vmatmul.mubr.msk.f32.gmra.mxu1 %vm601_vm2, %v9647_v60  ;;  %v10128_v0 = vsel %vm4339_vm6, %v4589_v27, %v4590_v56 }
 0x237   :  { %7832 = vmatmul.mubr.msk.f32.gmra.mxu0 %vm601_vm2, %v10101_v2  ;;  %v1461_v55 = vadd.f32 %v7292_v25, %v9872_v54  ;;  %7717 = vmatprep.mubr.msk.f32.mxu1 %vm601_vm2, %v11585_v35  ;;  %v10122_v16 = vadd.f32 %v9656_v3, %v1458_v37  ;;  %v6354_v54 = vld [vmem:[%s11348_s3 + $0x90] sm:$0xff] }
 0x238   :  { %7834 = vmatprep.mubr.msk.f32.mxu0 %vm601_vm2, %v10114_v17  ;;  %v1437_v62 = vpop.f32.mrf.mxu1  ;;  %v10124_v4 = vpop.f32.mrf.mxu0 }
 0x239   :  { %v1460_v10 = vadd.f32 %v1437_v62, %v9890_v63  ;;  %v10134_v35 = vadd.f32 %v9669_v6, %v1461_v55  ;;  %v11642_v55 = vld [vmem:[#allocation13_spill] sm:$0xff] }
 0x23a   :  { %v7335_v39 = vpop.f32.mrf.mxu1  ;;  %v10136_v43 = vpop.f32.mrf.mxu0  ;;  %7718 = vmatmul.mubr.msk.f32.vlgmr.msra.gmra.mxu1 %vm601_vm2, %v9325_v40  ;;  %v4762_v62 = vrot.slane %v11642_v55, 4 }
 0x23b   :  { %7835 = vmatmul.mubr.msk.f32.gmra.mxu0 %vm601_vm2, %v10128_v0  ;;  %v1888_v3 = vadd.f32 %v7335_v39, %v9907_v44  ;;  %7774 = vmatpush3.msra.mxu1 %v9983_v42  ;;  %v10147_v63 = vadd.f32 %v9682_v29, %v1460_v10  ;;  %v6353_v44 = vld [vmem:[%s11348_s3 + $0x88] sm:$0xff] }
 0x23c   :  { %7720 = vmatprep.mubr.msk.f32.mxu1 %vm601_vm2, %v9338_v28  ;;  %7877 = vmatprep.mubr.msk.f32.mxu0 %vm601_vm2, %v9917_v15  ;;  %v1808_v6 = vpop.f32.mrf.mxu1  ;;  %v10151_v31 = vpop.f32.mrf.mxu0  ;;  %v11643_v10 = vld [vmem:[#allocation38_spill] sm:$0xff] }
 0x23d   :  { %7775 = vmatprep.subr.mxu1 %v6354_v54  ;;  %v1887_v40 = vadd.f32 %v1808_v6, %v9930_v11  ;;  %v10158_v42 = vadd.f32 %v9690_v45, %v1888_v3  ;;  %v11640_v11 = vld [vmem:[#allocation81_spill] sm:$0xff] }
 0x23e   :  { %7776 = vmatpush3.msra.mxu1 %v6354_v54  ;;  %v7338_v28 = vpop.f32.mrf.mxu1  ;;  %v10160_v29 = vpop.f32.mrf.mxu0 }
 0x23f   :  { %7721 = vmatmul.mubr.msk.f32.gmra.mxu1 %vm601_vm2, %v9355_v18  ;;  %7878 = vmatmul.mubr.msk.f32.vlgmr.msra.gmra.mxu0 %vm601_vm2, %v9936_v1  ;;  %v1890_v56 = vadd.f32 %v7338_v28, %v9946_v59  ;;  %v10172_v45 = vadd.f32 %v11640_v11, %v1887_v40  ;;  %v6352_v59 = vld [vmem:[%s11348_s3 + $0x80] sm:$0xff] }
 0x240   :  { %7723 = vmatprep.mubr.msk.f32.mxu1 %vm601_vm2, %v9371_v36  ;;  %7880 = vmatprep.mubr.msk.f32.mxu0 %vm601_vm2, %v9956_v53  ;;  %v1818_v30 = vpop.f32.mrf.mxu1  ;;  %v10174_v37 = vpop.f32.mrf.mxu0 }
 0x241   :  { %7777 = vmatprep.subr.mxu1 %v6353_v44  ;;  %v1889_v18 = vadd.f32 %v1818_v30, %v9969_v13  ;;  %v10181_v27 = vadd.f32 %v11641_v8, %v1890_v56  ;;  %v11647_v30 = vld [vmem:[#allocation55_spill] sm:$0xff] }
 0x242   :  { %7778 = vmatpush3.msra.mxu1 %v6353_v44  ;;  %v7341_v36 = vpop.f32.mrf.mxu1  ;;  %v10183_v25 = vpop.f32.mrf.mxu0  ;;  %v11646_v44 = vld [vmem:[#allocation14_spill] sm:$0xff] }
 0x243   :  { %7724 = vmatmul.mubr.msk.f32.gmra.mxu1 %vm601_vm2, %v9554_v48  ;;  %7881 = vmatmul.mubr.msk.f32.gmra.mxu0 %vm601_vm2, %v9975_v20  ;;  %v1892_v13 = vadd.f32 %v7341_v36, %v9986_v9  ;;  %v10196_v54 = vadd.f32 %v11643_v10, %v1889_v18  ;;  %v11645_v48 = vld [vmem:[#allocation49_spill] sm:$0xff]  ;;  %v4938_v28 = vrot.slane %v11646_v44, 4  ;;  %v4939_v18 = vrot.slane %v11647_v30, 4 }
 0x244   :  { %7726 = vmatprep.mubr.msk.f32.mxu1 %vm601_vm2, %v9574_v57  ;;  %7883 = vmatprep.mubr.msk.f32.mxu0 %vm601_vm2, %v9995_v41  ;;  %v1828_v39 = vpop.f32.mrf.mxu1  ;;  %v10198_v3 = vpop.f32.mrf.mxu0  ;;  %v4763_v6 = vrot.slane %v11645_v48, 4  ;;  %v10206_v57 = vld [vmem:[%s11348_s3 + $0x1d8] sm:$0xff] }
 0x245   :  { %11644 = vst [vmem:[#allocation8_spill] sm:$0xff] %v10198_v3  ;;  %7779 = vmatprep.subr.mxu1 %v6352_v59  ;;  %v1891_v40 = vadd.f32 %v1828_v39, %v10006_v19  ;;  %v10209_v9 = vadd.f32 %v9747_v47, %v1892_v13  ;;  %v11648_v47 = vld [vmem:[#allocation82_spill] sm:$0xff]  ;;  %v11665_v3 = vld [vmem:[#allocation57_spill] sm:$0xff] }
 0x246   :  { %7780 = vmatpush3.msra.mxu1 %v6352_v59  ;;  %v7344_v56 = vpop.f32.mrf.mxu1  ;;  %v10211_v11 = vpop.f32.mrf.mxu0  ;;  %v10218_v19 = vsel %vm4339_vm6, %v4762_v62, %v4763_v6  ;;  %v10234_v62 = vsel %vm4339_vm6, %v4938_v28, %v4939_v18 }
 0x247   :  { %7727 = vmatmul.mubr.msk.f32.gmra.mxu1 %vm601_vm2, %v9753_v23  ;;  %7884 = vmatmul.mubr.msk.f32.gmra.mxu0 %vm601_vm2, %v10013_v12  ;;  %v1894_v59 = vadd.f32 %v7344_v56, %v10017_v49  ;;  %v10227_v8 = vadd.f32 %v11648_v47, %v1891_v40  ;;  %11650 = vst [vmem:[#allocation73_spill] sm:$0xff] %v10234_v62  ;;  %v11651_v49 = vld [vmem:[#allocation83_spill] sm:$0xff] }
 0x248   :  { %7729 = vmatprep.mubr.msk.f32.mxu1 %vm601_vm2, %v9417_v7  ;;  %7886 = vmatprep.mubr.msk.f32.mxu0 %vm601_vm2, %v10218_v19  ;;  %v1838_v23 = vpop.f32.mrf.mxu1  ;;  %v10229_v36 = vpop.f32.mrf.mxu0 }
 0x249   :  { %11649 = vst [vmem:[#allocation59_spill] sm:$0xff] %v10229_v36  ;;  %7837 = vmatprep.subr.mxu1 %v10206_v57  ;;  %v1893_v55 = vadd.f32 %v1838_v23, %v10033_v34  ;;  %v10237_v13 = vadd.f32 %v11651_v49, %v1894_v59  ;;  %v11652_v34 = vld [vmem:[#allocation84_spill] sm:$0xff] }
 0x24a   :  { %v7347_v7 = vpop.f32.mrf.mxu1  ;;  %v10239_v10 = vpop.f32.mrf.mxu0 }
 0x24b   :  { %7730 = vmatmul.mubr.msk.f32.gmra.mxu1 %vm601_vm2, %v9430_v21  ;;  %7887 = vmatmul.mubr.msk.f32.gmra.mxu0 %vm601_vm2, %v10234_v62  ;;  %v1896_v39 = vadd.f32 %v7347_v7, %v10044_v50  ;;  %v10251_v48 = vadd.f32 %v11652_v34, %v1893_v55  ;;  %v11653_v21 = vld [vmem:[#allocation27_spill] sm:$0xff]  ;;  %v11654_v50 = vld [vmem:[#allocation66_spill] sm:$0xff]  ;;  %v11657_v7 = vld [vmem:[#allocation24_spill] sm:$0xff] }
 0x24c   :  { %7732 = vmatprep.mubr.msk.f32.mxu1 %vm601_vm2, %v9444_v52  ;;  %7889 = vmatprep.mubr.msk.f32.mxu0 %vm601_vm2, %v10053_v5  ;;  %v1848_v6 = vpop.f32.mrf.mxu1  ;;  %v10253_v40 = vpop.f32.mrf.mxu0  ;;  %v11658_v34 = vld [vmem:[#allocation54_spill] sm:$0xff] }
 0x24d   :  { %v1895_v44 = vadd.f32 %v1848_v6, %v10063_v24  ;;  %v10257_v28 = vadd.f32 %v11653_v21, %v1896_v39  ;;  %v4765_v39 = vrot.slane %v11657_v7, 4  ;;  %v4766_v6 = vrot.slane %v11658_v34, 4  ;;  %v11660_v21 = vld [vmem:[#allocation51_spill] sm:$0xff]  ;;  %v11663_v34 = vld [vmem:[#allocation29_spill] sm:$0xff] }
 0x24e   :  { %v7350_v56 = vpop.f32.mrf.mxu1  ;;  %v10259_v30 = vpop.f32.mrf.mxu0 }
 0x24f   :  { %7733 = vmatmul.mubr.msk.f32.gmra.mxu1 %vm601_vm2, %v9456_v46  ;;  %7890 = vmatmul.mubr.msk.f32.gmra.mxu0 %vm601_vm2, %v10071_v38  ;;  %v1898_v52 = vadd.f32 %v7350_v56, %v10075_v61  ;;  %v10271_v24 = vadd.f32 %v11654_v50, %v1895_v44  ;;  %v11655_v46 = vld [vmem:[#allocation50_spill] sm:$0xff]  ;;  %v11659_v44 = vld [vmem:[#allocation80_spill] sm:$0xff] }
 0x250   :  { %7735 = vmatprep.mubr.msk.f32.mxu1 %vm601_vm2, %v9467_v22  ;;  %7892 = vmatprep.mubr.msk.f32.mxu0 %vm601_vm2, %v10085_v14  ;;  %v1858_v18 = vpop.f32.mrf.mxu1  ;;  %v10273_v59 = vpop.f32.mrf.mxu0  ;;  %v11656_v22 = vld [vmem:[#allocation21_spill] sm:$0xff]  ;;  %v11661_v50 = vld [vmem:[#allocation26_spill] sm:$0xff] }
 0x251   :  { %v1897_v47 = vadd.f32 %v1858_v18, %v10094_v32  ;;  %v10277_v23 = vadd.f32 %v11655_v46, %v1898_v52  ;;  %v4340_v61 = vrot.slane %v11656_v22, 4  ;;  %v4341_v18 = vrot.slane %v11661_v50, 4  ;;  %v11662_v46 = vld [vmem:[#allocation56_spill] sm:$0xff] }
 0x252   :  { %v7353_v55 = vpop.f32.mrf.mxu1  ;;  %v10279_v49 = vpop.f32.mrf.mxu0  ;;  %v4942_v22 = vrot.slane %v11662_v46, 4 }
 0x253   :  { %7736 = vmatmul.mubr.msk.f32.gmra.mxu1 %vm601_vm2, %v9647_v60  ;;  %7893 = vmatmul.mubr.msk.f32.gmra.mxu0 %vm601_vm2, %v10101_v2  ;;  %v1900_v32 = vadd.f32 %v7353_v55, %v10105_v58  ;;  %v10294_v56 = vadd.f32 %v11660_v21, %v1897_v47  ;;  %v4941_v58 = vrot.slane %v11663_v34, 4  ;;  %v11664_v55 = vld [vmem:[#allocation67_spill] sm:$0xff]  ;;  %v4342_v47 = vsel %vm4339_vm6, %v4340_v61, %v4341_v18 }
 0x254   :  { %7738 = vmatprep.mubr.msk.f32.mxu1 %vm601_vm2, %v11659_v44  ;;  %7895 = vmatprep.mubr.msk.f32.mxu0 %vm601_vm2, %v10114_v17  ;;  %v1868_v60 = vpop.f32.mrf.mxu1  ;;  %v10296_v52 = vpop.f32.mrf.mxu0  ;;  %v10313_v21 = vsel %vm4339_vm6, %v4765_v39, %v4766_v6  ;;  %v11668_v39 = vld [vmem:[#allocation69_spill] sm:$0xff] }
 0x255   :  { %v1899_v7 = vadd.f32 %v1868_v60, %v10122_v16  ;;  %v10303_v36 = vadd.f32 %v11664_v55, %v1900_v32  ;;  %v11666_v32 = vld [vmem:[#allocation68_spill] sm:$0xff]  ;;  %v10326_v61 = vsel %vm4339_vm6, %v4941_v58, %v4942_v22  ;;  %v11670_v22 = vld [vmem:[#allocation70_spill] sm:$0xff] }
 0x256   :  { %v7356_v44 = vpop.f32.mrf.mxu1  ;;  %v10305_v62 = vpop.f32.mrf.mxu0  ;;  %11667 = vst [vmem:[#allocation33_spill] sm:$0xff] %v10326_v61  ;;  %v6393_v58 = vld [vmem:[%s11348_s3 + $0x1c8] sm:$0xff]  ;;  %v11671_v55 = vld [vmem:[#allocation60_spill] sm:$0xff] }
 0x257   :  { %7739 = vmatmul.mubr.msk.f32.gmra.mxu1 %vm601_vm2, %v11665_v3  ;;  %7896 = vmatmul.mubr.msk.f32.gmra.mxu0 %vm601_vm2, %v10128_v0  ;;  %v1902_v16 = vadd.f32 %v7356_v44, %v10134_v35  ;;  %v10320_v60 = vadd.f32 %v11666_v32, %v1899_v7  ;;  %v6394_v35 = vld [vmem:[%s11348_s3 + $0x1d0] sm:$0xff]  ;;  %v11669_v7 = vld [vmem:[#allocation5_spill] sm:$0xff] }
 0x258   :  { %7781 = vmatprep.mubr.msk.f32.mxu1 %vm601_vm2, %v4342_v47  ;;  %7898 = vmatprep.mubr.msk.f32.mxu0 %vm601_vm2, %v10313_v21  ;;  %v1878_v50 = vpop.f32.mrf.mxu1  ;;  %v10322_v3 = vpop.f32.mrf.mxu0 }
 0x259   :  { %v1901_v46 = vadd.f32 %v1878_v50, %v10147_v63  ;;  %v10332_v6 = vadd.f32 %v11668_v39, %v1902_v16 }
 0x25a   :  { %v7399_v18 = vpop.f32.mrf.mxu1  ;;  %v10334_v34 = vpop.f32.mrf.mxu0 }
 0x25b   :  { %7782 = vmatmul.mubr.msk.f32.vlgmr.msra.gmra.mxu1 %vm601_vm2, %v11669_v7  ;;  %7899 = vmatmul.mubr.msk.f32.gmra.mxu0 %vm601_vm2, %v10326_v61  ;;  %v2244_v63 = vadd.f32 %v7399_v18, %v10158_v42  ;;  %v10348_v44 = vadd.f32 %v11671_v55, %v1901_v46  ;;  %v6392_v42 = vld [vmem:[%s11348_s3 + $0x1c0] sm:$0xff] }
 0x25c   :  { %7838 = vmatpush3.msra.mxu1 %v10206_v57  ;;  %7784 = vmatprep.mubr.msk.f32.mxu1 %vm601_vm2, %v11670_v22  ;;  %v2164_v47 = vpop.f32.mrf.mxu1  ;;  %v10350_v16 = vpop.f32.mrf.mxu0  ;;  %v11673_v57 = vld [vmem:[#allocation30_spill] sm:$0xff] }
 0x25d   :  { %11672 = vst [vmem:[#allocation9_spill] sm:$0xff] %v10350_v16  ;;  %7839 = vmatprep.subr.mxu1 %v6394_v35  ;;  %v2243_v32 = vadd.f32 %v2164_v47, %v10172_v45  ;;  %v10357_v50 = vadd.f32 %v11673_v57, %v2244_v63  ;;  %v10369_v45 = vld [vmem:[%s11348_s3 + $0x318] sm:$0xff] }
 0x25e   :  { %7840 = vmatpush3.msra.mxu1 %v6394_v35  ;;  %v7402_v39 = vpop.f32.mrf.mxu1  ;;  %v10359_v18 = vpop.f32.mrf.mxu0  ;;  %v11675_v35 = vld [vmem:[#allocation6_spill] sm:$0xff]  ;;  %v11688_v16 = vld [vmem:[#allocation36_spill] sm:$0xff] }
 0x25f   :  { %11674 = vst [vmem:[#allocation62_spill] sm:$0xff] %v10359_v18  ;;  %7785 = vmatmul.mubr.msk.f32.gmra.mxu1 %vm601_vm2, %v9917_v15  ;;  %7841 = vmatprep.subr.mxu1 %v6393_v58  ;;  %v2246_v46 = vadd.f32 %v7402_v39, %v10181_v27  ;;  %v10372_v7 = vadd.f32 %v11675_v35, %v2243_v32  ;;  %v11677_v27 = vld [vmem:[#allocation16_spill] sm:$0xff]  ;;  %v11679_v35 = vld [vmem:[#allocation71_spill] sm:$0xff] }
 0x260   :  { %7787 = vmatprep.mubr.msk.f32.mxu1 %vm601_vm2, %v9936_v1  ;;  %7842 = vmatpush3.msra.mxu1 %v6393_v58  ;;  %v2174_v63 = vpop.f32.mrf.mxu1  ;;  %v10374_v55 = vpop.f32.mrf.mxu0 }
 0x261   :  { %11676 = vst [vmem:[#allocation74_spill] sm:$0xff] %v10374_v55  ;;  %7843 = vmatprep.subr.mxu1 %v6392_v42  ;;  %v2245_v47 = vadd.f32 %v2174_v63, %v10196_v54  ;;  %v10378_v57 = vadd.f32 %v11677_v27, %v2246_v46  ;;  %v11681_v63 = vld [vmem:[#allocation61_spill] sm:$0xff] }
 0x262   :  { %7844 = vmatpush3.msra.mxu1 %v6392_v42  ;;  %v7405_v39 = vpop.f32.mrf.mxu1  ;;  %v10380_v58 = vpop.f32.mrf.mxu0 }
 0x263   :  { %11678 = vst [vmem:[#allocation34_spill] sm:$0xff] %v10380_v58  ;;  %7788 = vmatmul.mubr.msk.f32.gmra.mxu1 %vm601_vm2, %v9956_v53  ;;  %7901 = vmatprep.subr.mxu1 %v10369_v45  ;;  %v2248_v32 = vadd.f32 %v7405_v39, %v10209_v9  ;;  %v10389_v61 = vadd.f32 %v11679_v35, %v2245_v47  ;;  %v11683_v39 = vld [vmem:[#allocation41_spill] sm:$0xff]  ;;  %v11684_v47 = vld [vmem:[#allocation7_spill] sm:$0xff] }
 0x264   :  { %7790 = vmatprep.mubr.msk.f32.mxu1 %vm601_vm2, %v9975_v20  ;;  %v2184_v54 = vpop.f32.mrf.mxu1  ;;  %v10391_v42 = vpop.f32.mrf.mxu0 }
 0x265   :  { %11680 = vst [vmem:[#allocation10_spill] sm:$0xff] %v10391_v42  ;;  %v2247_v46 = vadd.f32 %v2184_v54, %v10227_v8  ;;  %v10395_v27 = vadd.f32 %v11681_v63, %v2248_v32  ;;  %v11686_v32 = vld [vmem:[#allocation31_spill] sm:$0xff] }
 0x266   :  { %v7408_v58 = vpop.f32.mrf.mxu1  ;;  %v10397_v55 = vpop.f32.mrf.mxu0 }
 0x267   :  { %11682 = vst [vmem:[#allocation64_spill] sm:$0xff] %v10397_v55  ;;  %7791 = vmatmul.mubr.msk.f32.gmra.mxu1 %vm601_vm2, %v9995_v41  ;;  %v2250_v9 = vadd.f32 %v7408_v58, %v10237_v13  ;;  %v10405_v35 = vadd.f32 %v11684_v47, %v2247_v46  ;;  %v11689_v58 = vld [vmem:[#allocation58_spill] sm:$0xff]  ;;  %v11690_v46 = vld [vmem:[#allocation63_spill] sm:$0xff] }
 0x268   :  { %7793 = vmatprep.mubr.msk.f32.mxu1 %vm601_vm2, %v11683_v39  ;;  %v2194_v42 = vpop.f32.mrf.mxu1  ;;  %v10407_v18 = vpop.f32.mrf.mxu0 }
 0x269   :  { %11685 = vst [vmem:[#allocation75_spill] sm:$0xff] %v10407_v18  ;;  %v2249_v8 = vadd.f32 %v2194_v42, %v10251_v48  ;;  %v10411_v54 = vadd.f32 %v11686_v32, %v2250_v9  ;;  %v11691_v42 = vld [vmem:[#allocation72_spill] sm:$0xff] }
 0x26a   :  { %v7411_v63 = vpop.f32.mrf.mxu1  ;;  %v10413_v55 = vpop.f32.mrf.mxu0 }
 0x26b   :  { %11687 = vst [vmem:[#allocation35_spill] sm:$0xff] %v10413_v55  ;;  %7794 = vmatmul.mubr.msk.f32.gmra.mxu1 %vm601_vm2, %v11688_v16  ;;  %v2252_v13 = vadd.f32 %v7411_v63, %v10257_v28  ;;  %v10421_v39 = vadd.f32 %v11690_v46, %v2249_v8 }
 0x26c   :  { %7796 = vmatprep.mubr.msk.f32.mxu1 %vm601_vm2, %v11689_v58  ;;  %v2204_v47 = vpop.f32.mrf.mxu1  ;;  %v10423_v18 = vpop.f32.mrf.mxu0 }
 0x26d   :  { %v2251_v48 = vadd.f32 %v2204_v47, %v10271_v24  ;;  %v10427_v9 = vadd.f32 %v11691_v42, %v2252_v13  ;;  %v11692_v13 = vld [vmem:[#allocation32_spill] sm:$0xff] }
 0x26e   :  { %v7414_v32 = vpop.f32.mrf.mxu1  ;;  %v10429_v55 = vpop.f32.mrf.mxu0 }
 0x26f   :  { %7797 = vmatmul.mubr.msk.f32.gmra.mxu1 %vm601_vm2, %v10053_v5  ;;  %v2254_v28 = vadd.f32 %v7414_v32, %v10277_v23  ;;  %v10437_v16 = vadd.f32 %v10067_v33, %v2251_v48 }
 0x270   :  { %7799 = vmatprep.mubr.msk.f32.mxu1 %vm601_vm2, %v10071_v38  ;;  %v2214_v8 = vpop.f32.mrf.mxu1  ;;  %v10439_v63 = vpop.f32.mrf.mxu0 }
 0x271   :  { %v2253_v24 = vadd.f32 %v2214_v8, %v10294_v56  ;;  %v10443_v46 = vadd.f32 %v11692_v13, %v2254_v28 }
 0x272   :  { %v7417_v47 = vpop.f32.mrf.mxu1  ;;  %v10445_v42 = vpop.f32.mrf.mxu0 }
 0x273   :  { %7800 = vmatmul.mubr.msk.f32.gmra.mxu1 %vm601_vm2, %v10085_v14  ;;  %v2256_v23 = vadd.f32 %v7417_v47, %v10303_v36  ;;  %v10453_v33 = vadd.f32 %v10097_v26, %v2253_v24 }
 0x274   :  { %7802 = vmatprep.mubr.msk.f32.mxu1 %vm601_vm2, %v10101_v2  ;;  %v2224_v48 = vpop.f32.mrf.mxu1  ;;  %v10455_v32 = vpop.f32.mrf.mxu0 }
 0x275   :  { %v2255_v56 = vadd.f32 %v2224_v48, %v10320_v60  ;;  %v10459_v28 = vadd.f32 %v10107_v51, %v2256_v23  ;;  %v6434_v60 = vld [vmem:[%s11348_s3 + $0x310] sm:$0xff] }
 0x276   :  { %v7420_v8 = vpop.f32.mrf.mxu1  ;;  %v10461_v13 = vpop.f32.mrf.mxu0 }
 0x277   :  { %7803 = vmatmul.mubr.msk.f32.gmra.mxu1 %vm601_vm2, %v10114_v17  ;;  %v2258_v36 = vadd.f32 %v7420_v8, %v10332_v6  ;;  %v10469_v26 = vadd.f32 %v10124_v4, %v2255_v56 }
 0x278   :  { %7845 = vmatprep.mubr.msk.f32.mxu1 %vm601_vm2, %v11670_v22  ;;  %v2234_v24 = vpop.f32.mrf.mxu1  ;;  %v10471_v47 = vpop.f32.mrf.mxu0  ;;  %v6433_v22 = vld [vmem:[%s11348_s3 + $0x308] sm:$0xff] }
 0x279   :  { %v2257_v51 = vadd.f32 %v2234_v24, %v10348_v44  ;;  %v10478_v23 = vadd.f32 %v10136_v43, %v2258_v36 }
 0x27a   :  { %v7463_v48 = vpop.f32.mrf.mxu1  ;;  %v10480_v6 = vpop.f32.mrf.mxu0 }
 0x27b   :  { %7846 = vmatmul.mubr.msk.f32.vlgmr.msra.gmra.mxu1 %vm601_vm2, %v9917_v15  ;;  %v2669_v4 = vadd.f32 %v7463_v48, %v10357_v50  ;;  %v10492_v43 = vadd.f32 %v10151_v31, %v2257_v51  ;;  %v6432_v50 = vld [vmem:[%s11348_s3 + $0x300] sm:$0xff]  ;;  %s7962_s3 = smov [#allocation2]  }
 0x27c   :  { %7902 = vmatpush3.msra.mxu1 %v10369_v45  ;;  %7848 = vmatprep.mubr.msk.f32.mxu1 %vm601_vm2, %v9936_v1  ;;  %v2589_v44 = vpop.f32.mrf.mxu1  ;;  %v10494_v56 = vpop.f32.mrf.mxu0  ;;  %s5898_s29 = sshll.u32 %s7962_s3, 4  ;;  %s5899_s29 = int_to_ptr.vmem [resolvable:$true] %s5898_s29 }
 0x27d   :  { %7903 = vmatprep.subr.mxu1 %v6434_v60  ;;  %v10497_v15 = vadd.f32 %v2589_v44, %v10372_v7  ;;  %v10503_v45 = vadd.f32 %v10160_v29, %v2669_v4  ;;  %s7939_s30 = scalar_lea.vmem %s5899_s29, 32  ;;  %p7944_p1 = scmp.lt.s32.totalorder %s5899_s29, %s5899_s29 }
 0x27e   :  { %7904 = vmatpush3.msra.mxu1 %v6434_v60  ;;  %v7466_v8 = vpop.f32.mrf.mxu1  ;;  %v10505_v36 = vpop.f32.mrf.mxu0  ;;  %p7940_p0 = scmp.ne.s32.totalorder %s5899_s29, %s7939_s30  ;;  %p7945_p2 = scmp.lt.s32.totalorder %s7939_s30, %s7939_s30 }
 0x27f   :  { %7849 = vmatmul.mubr.msk.f32.gmra.mxu1 %vm601_vm2, %v9956_v53  ;;  %7905 = vmatprep.subr.mxu1 %v6433_v22  ;;  %v2671_v31 = vadd.f32 %v7466_v8, %v10378_v57 }
 0x280   :  { %7851 = vmatprep.mubr.msk.f32.mxu1 %vm601_vm2, %v9975_v20  ;;  %7906 = vmatpush3.msra.mxu1 %v6433_v22  ;;  %v2599_v7 = vpop.f32.mrf.mxu1  ;;  %v10512_v24 = vpop.f32.mrf.mxu0  ;;  %p7946_p3 = por %p7945_p2, %p7944_p1 }
 0x281   :  { %7907 = vmatprep.subr.mxu1 %v6432_v50  ;;  %v10515_v29 = vadd.f32 %v2599_v7, %v10389_v61  ;;  %v10518_v51 = vadd.f32 %v10183_v25, %v2671_v31 }
 0x282   :  { %7908 = vmatpush3.msra.mxu1 %v6432_v50  ;;  %v7469_v60 = vpop.f32.mrf.mxu1  ;;  %v10520_v48 = vpop.f32.mrf.mxu0  ;;  %p7947_p4 = pnand %p7946_p3, %p7940_p0 }
 0x283   :  { %7852 = vmatmul.mubr.msk.f32.gmra.mxu1 %vm601_vm2, %v9995_v41  ;;  %v2673_v57 = vadd.f32 %v7469_v60, %v10395_v27 }
 0x284   :  { %7854 = vmatprep.mubr.msk.f32.mxu1 %vm601_vm2, %v10013_v12  ;;  %v2609_v4 = vpop.f32.mrf.mxu1  ;;  %v10527_v22 = vpop.f32.mrf.mxu0 }
 0x285   :  { %v10530_v61 = vadd.f32 %v2609_v4, %v10405_v35  ;;  %v10533_v25 = vadd.f32 %v10211_v11, %v2673_v57 }
 0x286   :  { %v7472_v44 = vpop.f32.mrf.mxu1  ;;  %v10535_v50 = vpop.f32.mrf.mxu0 }
 0x287   :  { %7855 = vmatmul.mubr.msk.f32.gmra.mxu1 %vm601_vm2, %v10218_v19  ;;  %v2675_v27 = vadd.f32 %v7472_v44, %v10411_v54 }
 0x288   :  { %7857 = vmatprep.mubr.msk.f32.mxu1 %vm601_vm2, %v11689_v58  ;;  %v2619_v8 = vpop.f32.mrf.mxu1  ;;  %v10542_v31 = vpop.f32.mrf.mxu0 }
 0x289   :  { %v2674_v35 = vadd.f32 %v2619_v8, %v10421_v39  ;;  %v10546_v7 = vadd.f32 %v10239_v10, %v2675_v27 }
 0x28a   :  { %v7475_v11 = vpop.f32.mrf.mxu1  ;;  %v10548_v60 = vpop.f32.mrf.mxu0 }
 0x28b   :  { %7858 = vmatmul.mubr.msk.f32.gmra.mxu1 %vm601_vm2, %v10053_v5  ;;  %v2677_v57 = vadd.f32 %v7475_v11, %v10427_v9  ;;  %v10556_v54 = vadd.f32 %v10253_v40, %v2674_v35 }
 0x28c   :  { %7860 = vmatprep.mubr.msk.f32.mxu1 %vm601_vm2, %v10071_v38  ;;  %v2629_v58 = vpop.f32.mrf.mxu1  ;;  %v10558_v4 = vpop.f32.mrf.mxu0 }
 0x28d   :  { %v2676_v10 = vadd.f32 %v2629_v58, %v10437_v16  ;;  %v10562_v39 = vadd.f32 %v10259_v30, %v2677_v57 }
 0x28e   :  { %v7478_v44 = vpop.f32.mrf.mxu1  ;;  %v10564_v27 = vpop.f32.mrf.mxu0 }
 0x28f   :  { %7861 = vmatmul.mubr.msk.f32.gmra.mxu1 %vm601_vm2, %v10085_v14  ;;  %v2679_v5 = vadd.f32 %v7478_v44, %v10443_v46  ;;  %v10572_v40 = vadd.f32 %v10273_v59, %v2676_v10 }
 0x290   :  { %7863 = vmatprep.mubr.msk.f32.mxu1 %vm601_vm2, %v10101_v2  ;;  %v2639_v9 = vpop.f32.mrf.mxu1  ;;  %v10574_v8 = vpop.f32.mrf.mxu0 }
 0x291   :  { %v2678_v30 = vadd.f32 %v2639_v9, %v10453_v33  ;;  %v10578_v16 = vadd.f32 %v10279_v49, %v2679_v5 }
 0x292   :  { %v7481_v35 = vpop.f32.mrf.mxu1  ;;  %v10580_v11 = vpop.f32.mrf.mxu0 }
 0x293   :  { %7864 = vmatmul.mubr.msk.f32.gmra.mxu1 %vm601_vm2, %v10114_v17  ;;  %v2681_v46 = vadd.f32 %v7481_v35, %v10459_v28  ;;  %v10588_v59 = vadd.f32 %v10296_v52, %v2678_v30 }
 0x294   :  { %7866 = vmatprep.mubr.msk.f32.mxu1 %vm601_vm2, %v10128_v0  ;;  %v2649_v57 = vpop.f32.mrf.mxu1  ;;  %v10590_v58 = vpop.f32.mrf.mxu0 }
 0x295   :  { %v2680_v49 = vadd.f32 %v2649_v57, %v10469_v26  ;;  %v10594_v33 = vadd.f32 %v10305_v62, %v2681_v46 }
 0x296   :  { %v7484_v10 = vpop.f32.mrf.mxu1  ;;  %v10596_v44 = vpop.f32.mrf.mxu0 }
 0x297   :  { %7867 = vmatmul.mubr.msk.f32.gmra.mxu1 %vm601_vm2, %v10313_v21  ;;  %v2683_v28 = vadd.f32 %v7484_v10, %v10478_v23  ;;  %v10604_v52 = vadd.f32 %v10322_v3, %v2680_v49  ;;  %v11693_v3 = vld [vmem:[#allocation9_spill] sm:$0xff]  ;;  %v11694_v49 = vld [vmem:[#allocation62_spill] sm:$0xff] }
 0x298   :  { %7909 = vmatprep.mubr.msk.f32.mxu1 %vm601_vm2, %v9936_v1  ;;  %v2659_v5 = vpop.f32.mrf.mxu1  ;;  %v10606_v9 = vpop.f32.mrf.mxu0  ;;  %v2844_v1 = vadd.f32 %v10174_v37, %v10497_v15  ;;  %v11695_v37 = vld [vmem:[#allocation8_spill] sm:$0xff] }
 0x299   :  { %v2682_v62 = vadd.f32 %v2659_v5, %v10492_v43  ;;  %v10610_v26 = vadd.f32 %v10334_v34, %v2683_v28  ;;  %v2846_v15 = vadd.f32 %v11695_v37, %v10515_v29  ;;  %v11699_v29 = vld [vmem:[#allocation59_spill] sm:$0xff] }
 0x29a   :  { %v7527_v30 = vpop.f32.mrf.mxu1  ;;  %v10612_v35 = vpop.f32.mrf.mxu0 }
 0x29b   :  { %7910 = vmatmul.mubr.msk.f32.vlgmr.msra.gmra.mxu1 %vm601_vm2, %v9956_v53  ;;  %v3021_v23 = vadd.f32 %v7527_v30, %v10503_v45  ;;  %v10622_v46 = vadd.f32 %v11693_v3, %v2682_v62  ;;  %v11696_v45 = vld [vmem:[#allocation74_spill] sm:$0xff] }
 0x29c   :  { %7912 = vmatprep.mubr.msk.f32.mxu1 %vm601_vm2, %v9975_v20  ;;  %v2941_v43 = vpop.f32.mrf.mxu1  ;;  %v10624_v34 = vpop.f32.mrf.mxu0 }
 0x29d   :  { %v3020_v57 = vadd.f32 %v2941_v43, %v2844_v1  ;;  %v10627_v10 = vadd.f32 %v11694_v49, %v3021_v23  ;;  %v11697_v1 = vld [vmem:[#allocation34_spill] sm:$0xff] }
 0x29e   :  { %v7530_v28 = vpop.f32.mrf.mxu1  ;;  %v10629_v53 = vpop.f32.mrf.mxu0  ;;  %v11700_v49 = vld [vmem:[#allocation10_spill] sm:$0xff] }
 0x29f   :  { %7913 = vmatmul.mubr.msk.f32.gmra.mxu1 %vm601_vm2, %v9995_v41  ;;  %v3023_v20 = vadd.f32 %v7530_v28, %v10518_v51  ;;  %v10639_v5 = vadd.f32 %v11696_v45, %v3020_v57  ;;  %v11698_v51 = vld [vmem:[#allocation73_spill] sm:$0xff]  ;;  %v2848_v57 = vadd.f32 %v11699_v29, %v10530_v61  ;;  %v11701_v45 = vld [vmem:[#allocation64_spill] sm:$0xff]  ;;  %v11703_v61 = vld [vmem:[#allocation75_spill] sm:$0xff] }
 0x2a0   :  { %7915 = vmatprep.mubr.msk.f32.mxu1 %vm601_vm2, %v10013_v12  ;;  %v2951_v62 = vpop.f32.mrf.mxu1  ;;  %v10641_v30 = vpop.f32.mrf.mxu0 }
 0x2a1   :  { %v3022_v23 = vadd.f32 %v2951_v62, %v2846_v15  ;;  %v10644_v3 = vadd.f32 %v11697_v1, %v3023_v20 }
 0x2a2   :  { %v7533_v43 = vpop.f32.mrf.mxu1  ;;  %v10646_v41 = vpop.f32.mrf.mxu0 }
 0x2a3   :  { %7916 = vmatmul.mubr.msk.f32.gmra.mxu1 %vm601_vm2, %v10218_v19  ;;  %v3025_v12 = vadd.f32 %v7533_v43, %v10533_v25  ;;  %v10656_v28 = vadd.f32 %v11700_v49, %v3022_v23  ;;  %v11702_v25 = vld [vmem:[#allocation42_spill] sm:$0xff] }
 0x2a4   :  { %7918 = vmatprep.mubr.msk.f32.mxu1 %vm601_vm2, %v11698_v51  ;;  %v2961_v37 = vpop.f32.mrf.mxu1  ;;  %v10658_v20 = vpop.f32.mrf.mxu0 }
 0x2a5   :  { %v3024_v15 = vadd.f32 %v2961_v37, %v2848_v57  ;;  %v10661_v62 = vadd.f32 %v11701_v45, %v3025_v12  ;;  %v11704_v57 = vld [vmem:[#allocation35_spill] sm:$0xff] }
 0x2a6   :  { %v7536_v1 = vpop.f32.mrf.mxu1  ;;  %v10663_v19 = vpop.f32.mrf.mxu0 }
 0x2a7   :  { %7919 = vmatmul.mubr.msk.f32.gmra.mxu1 %vm601_vm2, %v11702_v25  ;;  %v3027_v43 = vadd.f32 %v7536_v1, %v10546_v7  ;;  %v10671_v23 = vadd.f32 %v11703_v61, %v3024_v15 }
 0x2a8   :  { %7921 = vmatprep.mubr.msk.f32.mxu1 %vm601_vm2, %v10071_v38  ;;  %v2971_v51 = vpop.f32.mrf.mxu1  ;;  %v10673_v29 = vpop.f32.mrf.mxu0 }
 0x2a9   :  { %v3026_v12 = vadd.f32 %v2971_v51, %v10556_v54  ;;  %v10677_v49 = vadd.f32 %v11704_v57, %v3027_v43 }
 0x2aa   :  { %v7539_v37 = vpop.f32.mrf.mxu1  ;;  %v10679_v45 = vpop.f32.mrf.mxu0 }
 0x2ab   :  { %7922 = vmatmul.mubr.msk.f32.gmra.mxu1 %vm601_vm2, %v10085_v14  ;;  %v3029_v7 = vadd.f32 %v7539_v37, %v10562_v39  ;;  %v3202_v38 = vadd.f32 %v10423_v18, %v3026_v12 }
 0x2ac   :  { %7924 = vmatprep.mubr.msk.f32.mxu1 %vm601_vm2, %v10101_v2  ;;  %v2981_v15 = vpop.f32.mrf.mxu1  ;;  %v10687_v1 = vpop.f32.mrf.mxu0 }
 0x2ad   :  { %v3028_v54 = vadd.f32 %v2981_v15, %v10572_v40  ;;  %v3205_v25 = vadd.f32 %v10429_v55, %v3029_v7  ;;  %v11706_v15 = vld [vmem:[#allocation52_spill] sm:$0xff] }
 0x2ae   :  { %v7542_v43 = vpop.f32.mrf.mxu1  ;;  %v10691_v61 = vpop.f32.mrf.mxu0 }
 0x2af   :  { %7925 = vmatmul.mubr.msk.f32.gmra.mxu1 %vm601_vm2, %v10114_v17  ;;  %v3031_v14 = vadd.f32 %v7542_v43, %v10578_v16  ;;  %v3204_v2 = vadd.f32 %v10439_v63, %v3028_v54  ;;  %v11705_v16 = vld [vmem:[#allocation33_spill] sm:$0xff] }
 0x2b0   :  { %7927 = vmatprep.mubr.msk.f32.mxu1 %vm601_vm2, %v10128_v0  ;;  %v2991_v18 = vpop.f32.mrf.mxu1  ;;  %v10699_v39 = vpop.f32.mrf.mxu0 }
 0x2b1   :  { %v3030_v40 = vadd.f32 %v2991_v18, %v10588_v59  ;;  %v3207_v55 = vadd.f32 %v10445_v42, %v3031_v14 }
 0x2b2   :  { %v7545_v51 = vpop.f32.mrf.mxu1  ;;  %v10703_v12 = vpop.f32.mrf.mxu0 }
 0x2b3   :  { %7928 = vmatmul.mubr.msk.f32.gmra.mxu1 %vm601_vm2, %v10313_v21  ;;  %v3033_v17 = vadd.f32 %v7545_v51, %v10594_v33  ;;  %v3206_v0 = vadd.f32 %v10455_v32, %v3030_v40 }
 0x2b4   :  { %7930 = vmatprep.mubr.msk.f32.mxu1 %vm601_vm2, %v11705_v16  ;;  %v3001_v63 = vpop.f32.mrf.mxu1  ;;  %v10711_v57 = vpop.f32.mrf.mxu0 }
 0x2b5   :  { %v3032_v59 = vadd.f32 %v3001_v63, %v10604_v52  ;;  %v3209_v42 = vadd.f32 %v10461_v13, %v3033_v17 }
 0x2b6   :  { %v7548_v37 = vpop.f32.mrf.mxu1  ;;  %v10715_v7 = vpop.f32.mrf.mxu0 }
 0x2b7   :  { %7931 = vmatmul.mubr.msk.f32.gmra.mxu1 %vm601_vm2, %v11706_v15  ;;  %v3035_v21 = vadd.f32 %v7548_v37, %v10610_v26  ;;  %v3208_v33 = vadd.f32 %v10471_v47, %v3032_v59 }
 0x2b8   :  { %v3011_v54 = vpop.f32.mrf.mxu1  ;;  %v10721_v43 = vpop.f32.mrf.mxu0 }
 0x2b9   :  { %v3034_v32 = vadd.f32 %v3011_v54, %v10622_v46  ;;  %v3211_v14 = vadd.f32 %v10480_v6, %v3035_v21 }
 0x2ba   :  { %v7591_v52 = vpop.f32.mrf.mxu1  ;;  %v10725_v18 = vpop.f32.mrf.mxu0 }
 0x2bb   :  { %v3373_v13 = vadd.f32 %v7591_v52, %v10627_v10  ;;  %v3210_v40 = vadd.f32 %v10494_v56, %v3034_v32 }
 0x2bc   :  { %v3293_v51 = vpop.f32.mrf.mxu1  ;;  %v10729_v17 = vpop.f32.mrf.mxu0 }
 0x2bd   :  { %v3372_v26 = vadd.f32 %v3293_v51, %v10639_v5  ;;  %v3620_v47 = vadd.f32 %v10505_v36, %v3373_v13 }
 0x2be   :  { %v7594_v16 = vpop.f32.mrf.mxu1  ;;  %v10733_v63 = vpop.f32.mrf.mxu0 }
 0x2bf   :  { %v3375_v46 = vadd.f32 %v7594_v16, %v10644_v3  ;;  %v3619_v6 = vadd.f32 %v10512_v24, %v3372_v26 }
 0x2c0   :  { %v3303_v59 = vpop.f32.mrf.mxu1  ;;  %v10737_v37 = vpop.f32.mrf.mxu0 }
 0x2c1   :  { %v3374_v10 = vadd.f32 %v3303_v59, %v10656_v28  ;;  %v3622_v56 = vadd.f32 %v10520_v48, %v3375_v46 }
 0x2c2   :  { %v7597_v15 = vpop.f32.mrf.mxu1  ;;  %v10742_v5 = vpop.f32.mrf.mxu0 }
 0x2c3   :  { %v3377_v21 = vadd.f32 %v7597_v15, %v10661_v62  ;;  %v3621_v36 = vadd.f32 %v10527_v22, %v3374_v10 }
 0x2c4   :  { %v3313_v54 = vpop.f32.mrf.mxu1  ;;  %v10747_v52 = vpop.f32.mrf.mxu0 }
 0x2c5   :  { %v3376_v32 = vadd.f32 %v3313_v54, %v10671_v23  ;;  %v3624_v3 = vadd.f32 %v10535_v50, %v3377_v21 }
 0x2c6   :  { %v7600_v24 = vpop.f32.mrf.mxu1  ;;  %v10752_v16 = vpop.f32.mrf.mxu0 }
 0x2c7   :  { %v3379_v13 = vadd.f32 %v7600_v24, %v10677_v49  ;;  %v3623_v28 = vadd.f32 %v10542_v31, %v3376_v32 }
 0x2c8   :  { %v3323_v48 = vpop.f32.mrf.mxu1  ;;  %v10756_v15 = vpop.f32.mrf.mxu0 }
 0x2c9   :  { %v3378_v51 = vadd.f32 %v3323_v48, %v3202_v38  ;;  %v3626_v62 = vadd.f32 %v10548_v60, %v3379_v13 }
 0x2ca   :  { %v7603_v26 = vpop.f32.mrf.mxu1  ;;  %v10760_v32 = vpop.f32.mrf.mxu0 }
 0x2cb   :  { %v3381_v22 = vadd.f32 %v7603_v26, %v3205_v25  ;;  %v3625_v46 = vadd.f32 %v10558_v4, %v3378_v51 }
 0x2cc   :  { %v3333_v23 = vpop.f32.mrf.mxu1  ;;  %v10764_v48 = vpop.f32.mrf.mxu0 }
 0x2cd   :  { %v3380_v59 = vadd.f32 %v3333_v23, %v3204_v2  ;;  %v3628_v50 = vadd.f32 %v10564_v27, %v3381_v22 }
 0x2ce   :  { %v7606_v10 = vpop.f32.mrf.mxu1  ;;  %v10768_v22 = vpop.f32.mrf.mxu0 }
 0x2cf   :  { %v3383_v49 = vadd.f32 %v7606_v10, %v3207_v55  ;;  %v3627_v31 = vadd.f32 %v10574_v8, %v3380_v59 }
 0x2d0   :  { %v3343_v21 = vpop.f32.mrf.mxu1  ;;  %v10772_v10 = vpop.f32.mrf.mxu0 }
 0x2d1   :  { %v3382_v38 = vadd.f32 %v3343_v21, %v3206_v0  ;;  %v3630_v60 = vadd.f32 %v10580_v11, %v3383_v49 }
 0x2d2   :  { %v7609_v54 = vpop.f32.mrf.mxu1 }
 0x2d3   :  { %v3385_v25 = vadd.f32 %v7609_v54, %v3209_v42  ;;  %v3629_v4 = vadd.f32 %v10590_v58, %v3382_v38  ;;  %v10778_v38 = vpop.f32.mrf.mxu0 }
 0x2d4   :  { %v3353_v24 = vpop.f32.mrf.mxu1 }
 0x2d5   :  { %v3384_v2 = vadd.f32 %v3353_v24, %v3208_v33  ;;  %v3632_v27 = vadd.f32 %v10596_v44, %v3385_v25  ;;  %v10786_v25 = vpop.f32.mrf.mxu0 }
 0x2d6   :  { %v7612_v13 = vpop.f32.mrf.mxu1 }
 0x2d7   :  { %v3387_v55 = vadd.f32 %v7612_v13, %v3211_v14  ;;  %v3631_v8 = vadd.f32 %v10606_v9, %v3384_v2 }
 0x2d8   :  { %v3363_v51 = vpop.f32.mrf.mxu1 }
 0x2d9   :  { %v3386_v0 = vadd.f32 %v3363_v51, %v3210_v40  ;;  %v3634_v11 = vadd.f32 %v10612_v35, %v3387_v55 }
 0x2da   :  { %v7655_v26 = vpop.f32.mrf.mxu1 }
 0x2db   :  { %v3796_v42 = vadd.f32 %v7655_v26, %v3620_v47  ;;  %v3633_v58 = vadd.f32 %v10624_v34, %v3386_v0 }
 0x2dc   :  { %v3716_v23 = vpop.f32.mrf.mxu1 }
 0x2dd   :  { %v3795_v33 = vadd.f32 %v3716_v23, %v3619_v6  ;;  %v3972_v44 = vadd.f32 %v10629_v53, %v3796_v42 }
 0x2de   :  { %v7658_v59 = vpop.f32.mrf.mxu1 }
 0x2df   :  { %v3798_v14 = vadd.f32 %v7658_v59, %v3622_v56  ;;  %v3971_v9 = vadd.f32 %v10641_v30, %v3795_v33 }
 0x2e0   :  { %v3726_v49 = vpop.f32.mrf.mxu1 }
 0x2e1   :  { %v3797_v40 = vadd.f32 %v3726_v49, %v3621_v36  ;;  %v10776_v35 = vadd.f32 %v10646_v41, %v3798_v14 }
 0x2e2   :  { %v7661_v21 = vpop.f32.mrf.mxu1 }
 0x2e3   :  { %v3800_v47 = vadd.f32 %v7661_v21, %v3624_v3  ;;  %v10781_v34 = vadd.f32 %v10658_v20, %v3797_v40  ;;  %v10794_v20 = vpop.f32.mrf.mxu0 }
 0x2e4   :  { %v3736_v6 = vpop.f32.mrf.mxu1 }
 0x2e5   :  { %v3799_v53 = vadd.f32 %v3736_v6, %v3623_v28  ;;  %v10784_v54 = vadd.f32 %v10663_v19, %v3800_v47 }
 0x2e6   :  { %v7664_v56 = vpop.f32.mrf.mxu1 }
 0x2e7   :  { %v3802_v30 = vadd.f32 %v7664_v56, %v3626_v62  ;;  %v10789_v36 = vadd.f32 %v10673_v29, %v3799_v53  ;;  %v10802_v29 = vpop.f32.mrf.mxu0  ;;  %v5404_v53 = vld [vmem:[%s11350_s5 + $0x68] sm:$0xff]  ;;  %v5403_v56 = vld [vmem:[%s11350_s5 + $0x60] sm:$0xff] }
 0x2e8   :  { %v3746_v41 = vpop.f32.mrf.mxu1 }
 0x2e9   :  { %v3801_v24 = vadd.f32 %v3746_v41, %v3625_v46  ;;  %v10792_v2 = vadd.f32 %v10679_v45, %v3802_v30 }
 0x2ea   :  { %v7667_v3 = vpop.f32.mrf.mxu1 }
 0x2eb   :  { %v3804_v13 = vadd.f32 %v7667_v3, %v3628_v50  ;;  %v10797_v28 = vadd.f32 %v10687_v1, %v3801_v24  ;;  %v10810_v1 = vpop.f32.mrf.mxu0 }
 0x2ec   :  { %v3756_v19 = vpop.f32.mrf.mxu1 }
 0x2ed   :  { %v3803_v55 = vadd.f32 %v3756_v19, %v3627_v31  ;;  %v10800_v51 = vadd.f32 %v10691_v61, %v3804_v13 }
 0x2ee   :  { %v7670_v62 = vpop.f32.mrf.mxu1 }
 0x2ef   :  { %v3806_v0 = vadd.f32 %v7670_v62, %v3630_v60  ;;  %v10805_v46 = vadd.f32 %v10699_v39, %v3803_v55  ;;  %v10818_v39 = vpop.f32.mrf.mxu0 }
 0x2f0   :  { %v3766_v45 = vpop.f32.mrf.mxu1 }
 0x2f1   :  { %v3805_v26 = vadd.f32 %v3766_v45, %v3629_v4  ;;  %v10808_v42 = vadd.f32 %v10703_v12, %v3806_v0 }
 0x2f2   :  { %v7673_v50 = vpop.f32.mrf.mxu1 }
 0x2f3   :  { %v3808_v23 = vadd.f32 %v7673_v50, %v3632_v27  ;;  %v10813_v31 = vadd.f32 %v10711_v57, %v3805_v26  ;;  %v10826_v57 = vpop.f32.mrf.mxu0  ;;  %v5401_v50 = vld [vmem:[%s11350_s5 + $0x50] sm:$0xff] }
 0x2f4   :  { %v3776_v61 = vpop.f32.mrf.mxu1 }
 0x2f5   :  { %v3807_v33 = vadd.f32 %v3776_v61, %v3631_v8  ;;  %v10816_v59 = vadd.f32 %v10715_v7, %v3808_v23  ;;  %v6468_v7 = vld [vmem:[%s11350_s5 + $0xf8] sm:$0xff]  ;;  %v10858_v41 = vpop.f32.mrf.mxu0  ;;  %v6462_v23 = vld [vmem:[%s11350_s5 + $0xc8] sm:$0xff]  ;;  %v6461_v61 = vld [vmem:[%s11350_s5 + $0xc0] sm:$0xff] }
 0x2f6   :  { %v7676_v60 = vpop.f32.mrf.mxu1  ;;  %5447 = vmatprep.subr.mxu0 %v6468_v7 }
 0x2f7   :  { %v3810_v14 = vadd.f32 %v7676_v60, %v3634_v11  ;;  %v10821_v4 = vadd.f32 %v10721_v43, %v3807_v33  ;;  %v6467_v43 = vld [vmem:[%s11350_s5 + $0xf0] sm:$0xff]  ;;  %v10868_v55 = vpop.f32.mrf.mxu0 }
 0x2f8   :  { %v3786_v12 = vpop.f32.mrf.mxu1  ;;  %5448 = vmatpush1.msra.mxu0 %v6467_v43  ;;  %v5398_v43 = vld [vmem:[%s11350_s5 + $0x38] sm:$0xff] }
 0x2f9   :  { %v3809_v49 = vadd.f32 %v3786_v12, %v3633_v58  ;;  %v10824_v40 = vadd.f32 %v10725_v18, %v3810_v14  ;;  %v5406_v18 = vld [vmem:[%s11350_s5 + $0x78] sm:$0xff]  ;;  %v6466_v58 = vld [vmem:[%s11350_s5 + $0xe8] sm:$0xff] }
 0x2fa   :  { %v7719_v27 = vpop.f32.mrf.mxu1  ;;  %5523 = vmatprep.subr.mxu1 %v5406_v18  ;;  %5449 = vmatprep.subr.mxu0 %v6466_v58  ;;  %v5395_v58 = vld [vmem:[%s11350_s5 + $0x20] sm:$0xff] }
 0x2fb   :  { %v4148_v21 = vadd.f32 %v7719_v27, %v3972_v44  ;;  %v10829_v8 = vadd.f32 %v10729_v17, %v3809_v49  ;;  %v5405_v17 = vld [vmem:[%s11350_s5 + $0x70] sm:$0xff]  ;;  %v6465_v44 = vld [vmem:[%s11350_s5 + $0xe0] sm:$0xff] }
 0x2fc   :  { %v4068_v11 = vpop.f32.mrf.mxu1  ;;  %5524 = vmatpush1.msra.mxu1 %v5405_v17  ;;  %5450 = vmatpush1.msra.mxu0 %v6465_v44  ;;  %v6456_v44 = vld [vmem:[%s11350_s5 + $0x98] sm:$0xff] }
 0x2fd   :  { %v4147_v47 = vadd.f32 %v4068_v11, %v3971_v9  ;;  %v10850_v6 = vadd.f32 %v10733_v63, %v4148_v21  ;;  %5525 = vmatprep.subr.mxu1 %v5404_v53  ;;  %v6457_v11 = vld [vmem:[%s11350_s5 + $0xa0] sm:$0xff] }
 0x2fe   :  { %5526 = vmatpush1.msra.mxu1 %v5403_v56  ;;  %v6455_v56 = vld [vmem:[%s11350_s5 + $0x90] sm:$0xff] }
 0x2ff   :  { %v7722_v30 = vpop.f32.mrf.mxu1  ;;  %v10862_v63 = vadd.f32 %v10737_v37, %v4147_v47 }
 0x300   :  { %v4150_v9 = vadd.f32 %v7722_v30, %v10776_v35  ;;  %v5394_v30 = vld [vmem:[%s11350_s5 + $0x18] sm:$0xff] }
 0x301   :  { %v4078_v24 = vpop.f32.mrf.mxu1 }
 0x302   :  { %v4149_v3 = vadd.f32 %v4078_v24, %v10781_v34  ;;  %v10866_v13 = vadd.f32 %v10742_v5, %v4150_v9  ;;  %v6464_v5 = vld [vmem:[%s11350_s5 + $0xd8] sm:$0xff]  ;;  %v6463_v34 = vld [vmem:[%s11350_s5 + $0xd0] sm:$0xff] }
 0x303   :  { %v7725_v19 = vpop.f32.mrf.mxu1  ;;  %5451 = vmatprep.subr.mxu0 %v6464_v5  ;;  %v5393_v9 = vld [vmem:[%s11350_s5 + $0x10] sm:$0xff] }
 0x304   :  { %v4152_v62 = vadd.f32 %v7725_v19, %v10784_v54  ;;  %v10872_v0 = vadd.f32 %v10747_v52, %v4149_v3  ;;  %v5402_v52 = vld [vmem:[%s11350_s5 + $0x58] sm:$0xff]  ;;  %v10887_v54 = vpop.f32.mrf.mxu0  ;;  %5452 = vmatpush1.msra.mxu0 %v6463_v34  ;;  %v5392_v3 = vld [vmem:[%s11350_s5 + $0x8] sm:$0xff] }
 0x305   :  { %v4088_v35 = vpop.f32.mrf.mxu1  ;;  %5527 = vmatprep.subr.mxu1 %v5402_v52  ;;  %5453 = vmatprep.subr.mxu0 %v6462_v23  ;;  %v6503_v34 = vld [vmem:[%s11350_s5 + $0x1f8] sm:$0xff]  ;;  %v11444_v23 = vmov 0.0  }
 0x306   :  { %v4151_v37 = vadd.f32 %v4088_v35, %v10789_v36  ;;  %v10876_v45 = vadd.f32 %v10752_v16, %v4152_v62  ;;  %5528 = vmatpush1.msra.mxu1 %v5401_v50  ;;  %5454 = vmatpush1.msra.mxu0 %v6461_v61  ;;  %v10912_v49 = vpop.f32.mrf.mxu0  ;;  %v6453_v62 = vld [vmem:[%s11350_s5 + $0x80] sm:$0xff] }
 0x307   :  { %v7728_v26 = vpop.f32.mrf.mxu1  ;;  %v5391_v35 = vld [vmem:[%s11350_s5] sm:$0xff]  ;;  %5495 = vmatprep.mubr.f32.mxu0 %v11444_v23  ;;  %5571 = vmatprep.mubr.f32.mxu1 %v11444_v23 }
 0x308   :  { %v4154_v36 = vadd.f32 %v7728_v26, %v10792_v2  ;;  %v10891_v16 = vadd.f32 %v10756_v15, %v4151_v37  ;;  %v5400_v15 = vld [vmem:[%s11350_s5 + $0x48] sm:$0xff]  ;;  %v5399_v2 = vld [vmem:[%s11350_s5 + $0x40] sm:$0xff]  ;;  %v10950_v47 = vpop.f32.mrf.mxu0 }
 0x309   :  { %v4098_v33 = vpop.f32.mrf.mxu1  ;;  %5529 = vmatprep.subr.mxu1 %v5400_v15 }
 0x30a   :  { %v4153_v60 = vadd.f32 %v4098_v33, %v10797_v28  ;;  %v10910_v14 = vadd.f32 %v10760_v32, %v4154_v36  ;;  %5530 = vmatpush1.msra.mxu1 %v5399_v2  ;;  %v6460_v28 = vld [vmem:[%s11350_s5 + $0xb8] sm:$0xff]  ;;  %v6459_v32 = vld [vmem:[%s11350_s5 + $0xb0] sm:$0xff]  ;;  %v10979_v26 = vpop.f32.mrf.mxu0 }
 0x30b   :  { %v7731_v12 = vpop.f32.mrf.mxu1  ;;  %5455 = vmatprep.subr.mxu0 %v6460_v28  ;;  %5531 = vmatprep.subr.mxu1 %v5398_v43 }
 0x30c   :  { %v10915_v27 = vadd.f32 %v7731_v12, %v10800_v51  ;;  %v10918_v21 = vadd.f32 %v10764_v48, %v4153_v60  ;;  %v5397_v48 = vld [vmem:[%s11350_s5 + $0x30] sm:$0xff]  ;;  %v6458_v51 = vld [vmem:[%s11350_s5 + $0xa8] sm:$0xff]  ;;  %5456 = vmatpush1.msra.mxu0 %v6459_v32  ;;  %v10992_v61 = vpop.f32.mrf.mxu0 }
 0x30d   :  { %v4108_v7 = vpop.f32.mrf.mxu1  ;;  %5532 = vmatpush1.msra.mxu1 %v5397_v48  ;;  %5457 = vmatprep.subr.mxu0 %v6458_v51 }
 0x30e   :  { %v10930_v18 = vadd.f32 %v4108_v7, %v10805_v46  ;;  %v5396_v46 = vld [vmem:[%s11350_s5 + $0x28] sm:$0xff]  ;;  %5458 = vmatpush1.msra.mxu0 %v6457_v11  ;;  %v10998_v12 = vpop.f32.mrf.mxu0 }
 0x30f   :  { %v7734_v17 = vpop.f32.mrf.mxu1  ;;  %5533 = vmatprep.subr.mxu1 %v5396_v46  ;;  %5459 = vmatprep.subr.mxu0 %v6456_v44 }
 0x310   :  { %v10953_v53 = vadd.f32 %v7734_v17, %v10808_v42  ;;  %5534 = vmatpush1.msra.mxu1 %v5395_v58  ;;  %v6454_v42 = vld [vmem:[%s11350_s5 + $0x88] sm:$0xff]  ;;  %5460 = vmatpush1.msra.mxu0 %v6455_v56  ;;  %v11003_v51 = vpop.f32.mrf.mxu0 }
 0x311   :  { %v4118_v24 = vpop.f32.mrf.mxu1  ;;  %5535 = vmatprep.subr.mxu1 %v5394_v30  ;;  %5461 = vmatprep.subr.mxu0 %v6454_v42 }
 0x312   :  { %v10971_v19 = vadd.f32 %v4118_v24, %v10813_v31  ;;  %5536 = vmatpush1.msra.mxu1 %v5393_v9  ;;  %v6486_v31 = vld [vmem:[%s11350_s5 + $0x178] sm:$0xff]  ;;  %5462 = vmatpush1.msra.mxu0 %v6453_v62 }
 0x313   :  { %v7737_v37 = vpop.f32.mrf.mxu1  ;;  %5537 = vmatprep.subr.mxu1 %v5392_v3  ;;  %5616 = vmatprep.subr.mxu0 %v6486_v31 }
 0x314   :  { %v4160_v5 = vadd.f32 %v7737_v37, %v10816_v59  ;;  %5538 = vmatpush1.msra.mxu1 %v5391_v35 }
 0x315   :  { %v4128_v52 = vpop.f32.mrf.mxu1  ;;  %5711 = vmatprep.subr.mxu1 %v6503_v34 }
 0x316   :  { %v4159_v36 = vadd.f32 %v4128_v52, %v10821_v4  ;;  %v4336_v50 = vadd.f32 %v10794_v20, %v4160_v5 }
 0x317   :  { %v7740_v59 = vpop.f32.mrf.mxu1 }
 0x318   :  { %v4162_v33 = vadd.f32 %v7740_v59, %v10824_v40  ;;  %v4335_v15 = vadd.f32 %v10802_v29, %v4159_v36 }
 0x319   :  { %v4138_v2 = vpop.f32.mrf.mxu1 }
 0x31a   :  { %v4161_v60 = vadd.f32 %v4138_v2, %v10829_v8  ;;  %v4338_v4 = vadd.f32 %v10810_v1, %v4162_v33  ;;  %v11007_v1 = vpop.f32.mrf.mxu0 }
 0x31b   :  { %v7783_v20 = vpop.f32.mrf.mxu1 }
 0x31c   :  { %v4571_v7 = vadd.f32 %v7783_v20, %v10850_v6  ;;  %v4337_v28 = vadd.f32 %v10818_v39, %v4161_v60  ;;  %v11013_v58 = vpop.f32.mrf.mxu0 }
 0x31d   :  { %v4491_v32 = vpop.f32.mrf.mxu1 }
 0x31e   :  { %v4570_v43 = vadd.f32 %v4491_v32, %v10862_v63  ;;  %v11021_v56 = vpop.f32.mrf.mxu0 }
 0x31f   :  { %v7786_v48 = vpop.f32.mrf.mxu1  ;;  %11707 = vst [vmem:[#allocation11_spill] sm:$0xff] %v11021_v56 }
 0x320   :  { %v4573_v29 = vadd.f32 %v7786_v48, %v10866_v13  ;;  %v11027_v9 = vpop.f32.mrf.mxu0  ;;  %v4746_v23 = vadd.f32 %v10858_v41, %v4570_v43  ;;  %v4332_v43 = vadd.f32 %v10768_v22, %v10915_v27 }
 0x321   :  { %v4501_v40 = vpop.f32.mrf.mxu1  ;;  %11708 = vst [vmem:[#allocation65_spill] sm:$0xff] %v11027_v9 }
 0x322   :  { %v4572_v8 = vadd.f32 %v4501_v40, %v10872_v0  ;;  %v11031_v42 = vpop.f32.mrf.mxu0 }
 0x323   :  { %v7789_v11 = vpop.f32.mrf.mxu1  ;;  %11709 = vst [vmem:[#allocation37_spill] sm:$0xff] %v11031_v42 }
 0x324   :  { %v4575_v17 = vadd.f32 %v7789_v11, %v10876_v45  ;;  %v11037_v35 = vpop.f32.mrf.mxu0  ;;  %v4748_v9 = vadd.f32 %v10887_v54, %v4572_v8 }
 0x325   :  { %v4511_v46 = vpop.f32.mrf.mxu1  ;;  %11712 = vst [vmem:[#allocation48_spill] sm:$0xff] %v11037_v35 }
 0x326   :  { %v11011_v6 = vadd.f32 %v4511_v46, %v10891_v16  ;;  %v7879_v52 = vpop.f32.mrf.mxu0 }
 0x327   :  { %v7792_v39 = vpop.f32.mrf.mxu1 }
 0x328   :  { %v11016_v63 = vadd.f32 %v7792_v39, %v10910_v14  ;;  %v5019_v33 = vpop.f32.mrf.mxu0 }
 0x329   :  { %v4521_v44 = vpop.f32.mrf.mxu1 }
 0x32a   :  { %v11019_v13 = vadd.f32 %v4521_v44, %v10918_v21 }
 0x32b   :  { %v7795_v0 = vpop.f32.mrf.mxu1 }
 0x32d   :  { %v11023_v30 = vpop.f32.mrf.mxu1 }
 0x32f   :  { %v11025_v45 = vpop.f32.mrf.mxu1 }
 0x331   :  { %v11029_v16 = vpop.f32.mrf.mxu1 }
 0x333   :  { %v7801_v24 = vpop.f32.mrf.mxu1 }
 0x334   :  { %v11033_v14 = vadd.f32 %v7801_v24, %v4336_v50  ;;  %v7882_v50 = vpop.f32.mrf.mxu0 }
 0x335   :  { %v4551_v3 = vpop.f32.mrf.mxu1 }
 0x336   :  { %11710 = vst [vmem:[#allocation23_spill] sm:$0xff] %v11033_v14  ;;  %v11035_v62 = vadd.f32 %v4551_v3, %v4335_v15  ;;  %v5029_v15 = vpop.f32.mrf.mxu0  ;;  %v4747_v3 = vadd.f32 %v10826_v57, %v4571_v7 }
 0x337   :  { %v7804_v21 = vpop.f32.mrf.mxu1 }
 0x338   :  { %11711 = vst [vmem:[#allocation12_spill] sm:$0xff] %v11035_v62  ;;  %v11039_v37 = vadd.f32 %v7804_v21, %v4338_v4  ;;  %v7885_v11 = vpop.f32.mrf.mxu0 }
 0x339   :  { %v4561_v5 = vpop.f32.mrf.mxu1 }
 0x33a   :  { %11713 = vst [vmem:[#allocation28_spill] sm:$0xff] %v11039_v37  ;;  %v11041_v31 = vadd.f32 %v4561_v5, %v4337_v28  ;;  %v5039_v28 = vpop.f32.mrf.mxu0  ;;  %v4749_v37 = vadd.f32 %v10868_v55, %v4573_v29  ;;  %v11073_v55 = vld [vmem:[%s11349_s4] ss:$0 sm:$0xff]  ;;  %v4750_v29 = vadd.f32 %v10950_v47, %v11011_v6  ;;  %v4333_v47 = vadd.f32 %v10786_v25, %v10971_v19 }
 0x33b   :  { %v7847_v34 = vpop.f32.mrf.mxu1  ;;  %v4753_v6 = vadd.f32 %v10979_v26, %v11016_v63 }
 0x33c   :  { %11714 = vst [vmem:[#allocation15_spill] sm:$0xff] %v11041_v31  ;;  %v11053_v24 = vpop.f32.mrf.mxu0  ;;  %v4923_v5 = vadd.f32 %v7847_v34, %v4747_v3  ;;  %v4751_v34 = vadd.f32 %v10912_v49, %v4575_v17  ;;  %v4331_v49 = vadd.f32 %v10772_v10, %v10930_v18 }
 0x33d   :  { %v4843_v36 = vpop.f32.mrf.mxu1 }
 0x33e   :  { %v11061_v31 = vpop.f32.mrf.mxu0  ;;  %v4922_v42 = vadd.f32 %v4843_v36, %v4746_v23  ;;  %v5099_v56 = vadd.f32 %v7879_v52, %v4923_v5  ;;  %v4578_v10 = vadd.f32 %v11023_v30, %v4331_v49  ;;  %v4580_v30 = vadd.f32 %v11029_v16, %v4333_v47 }
 0x33f   :  { %v7850_v59 = vpop.f32.mrf.mxu1 }
 0x340   :  { %v7891_v7 = vpop.f32.mrf.mxu0  ;;  %v5098_v41 = vadd.f32 %v5019_v33, %v4922_v42 }
 0x341   :  { %v4853_v2 = vpop.f32.mrf.mxu1 }
 0x342   :  { %v4924_v14 = vadd.f32 %v4853_v2, %v4748_v9  ;;  %v5059_v42 = vpop.f32.mrf.mxu0 }
 0x343   :  { %v7853_v60 = vpop.f32.mrf.mxu1 }
 0x344   :  { %v4927_v23 = vadd.f32 %v7853_v60, %v4751_v34 }
 0x345   :  { %v4863_v20 = vpop.f32.mrf.mxu1 }
 0x346   :  { %v4926_v22 = vadd.f32 %v4863_v20, %v4750_v29  ;;  %v5103_v33 = vadd.f32 %v7885_v11, %v4927_v23  ;;  %v7894_v20 = vpop.f32.mrf.mxu0 }
 0x347   :  { %v7856_v32 = vpop.f32.mrf.mxu1 }
 0x348   :  { %v4929_v60 = vadd.f32 %v7856_v32, %v4753_v6  ;;  %v5102_v63 = vadd.f32 %v5039_v28, %v4926_v22  ;;  %v4754_v32 = vadd.f32 %v11003_v51, %v4578_v10 }
 0x349   :  { %v4873_v48 = vpop.f32.mrf.mxu1 }
 0x34b   :  { %v11043_v40 = vpop.f32.mrf.mxu1 }
 0x34d   :  { %v11045_v4 = vpop.f32.mrf.mxu1 }
 0x34e   :  { %v4930_v28 = vadd.f32 %v11045_v4, %v4754_v32 }
 0x34f   :  { %v11047_v46 = vpop.f32.mrf.mxu1 }
 0x350   :  { %v5106_v49 = vadd.f32 %v5059_v42, %v4930_v28 }
 0x351   :  { %v11049_v39 = vpop.f32.mrf.mxu1 }
 0x353   :  { %v11051_v44 = vpop.f32.mrf.mxu1 }
 0x354   :  { %11715 = vst [vmem:[#allocation17_spill] sm:$0xff] %v11051_v44  ;;  %v4925_v44 = vadd.f32 %v7850_v59, %v4749_v37  ;;  %v4579_v37 = vadd.f32 %v7795_v0, %v4332_v43  ;;  %v4334_v59 = vadd.f32 %v10778_v38, %v10953_v53 }
 0x355   :  { %v11056_v21 = vpop.f32.mrf.mxu1 }
 0x356   :  { %v5101_v9 = vadd.f32 %v7882_v50, %v4925_v44  ;;  %v4581_v2 = vadd.f32 %v11025_v45, %v4334_v59  ;;  %v4752_v50 = vadd.f32 %v10992_v61, %v11019_v13  ;;  %v4755_v38 = vadd.f32 %v10998_v12, %v4579_v37 }
 0x357   :  { %v11059_v35 = vpop.f32.mrf.mxu1  ;;  %v5105_v13 = vadd.f32 %v11053_v24, %v4929_v60 }
 0x358   :  { %v4931_v45 = vadd.f32 %v11043_v40, %v4755_v38  ;;  %v4757_v12 = vadd.f32 %v11007_v1, %v4581_v2  ;;  %v4756_v40 = vadd.f32 %v11013_v58, %v4580_v30  ;;  %v11716_v58 = vld [vmem:[#allocation23_spill] sm:$0xff]  ;;  %v11721_v38 = vld [vmem:[#allocation28_spill] sm:$0xff] }
 0x359   :  { %v11065_v62 = vpop.f32.mrf.mxu1  ;;  %v11724_v30 = vld [vmem:[#allocation48_spill] sm:$0xff] }
 0x35a   :  { %v4933_v1 = vadd.f32 %v11047_v46, %v4757_v12  ;;  %v4932_v23 = vadd.f32 %v11049_v39, %v4756_v40 }
 0x35b   :  { %v7911_v57 = vpop.f32.mrf.mxu1  ;;  %v11720_v6 = vld [vmem:[#allocation17_spill] sm:$0xff] }
 0x35c   :  { %v5275_v3 = vadd.f32 %v7911_v57, %v5099_v56  ;;  %v5100_v56 = vadd.f32 %v5029_v15, %v4924_v14  ;;  %v4928_v15 = vadd.f32 %v4873_v48, %v4752_v50  ;;  %v5069_v57 = vpop.f32.mrf.mxu0  ;;  %v5109_v47 = vadd.f32 %v7894_v20, %v4933_v1  ;;  %v11723_v20 = vld [vmem:[#allocation15_spill] sm:$0xff] }
 0x35d   :  { %v5195_v54 = vpop.f32.mrf.mxu1  ;;  %v5108_v42 = vadd.f32 %v5069_v57, %v4932_v23 }
 0x35e   :  { %v5274_v8 = vadd.f32 %v5195_v54, %v5098_v41  ;;  %v5298_v27 = vadd.f32 %v11073_v55, %v5275_v3  ;;  %v5104_v3 = vadd.f32 %v11061_v31, %v4928_v15  ;;  %v5107_v54 = vadd.f32 %v7891_v7, %v4931_v45  ;;  %v11719_v7 = vld [vmem:[#allocation65_spill] sm:$0xff] }
 0x35f   :  { %v7914_v17 = vpop.f32.mrf.mxu1  ;;  %v4760_v15 = vadd.f32 %v11724_v30, %v11723_v20 }
 0x360   :  { %v5297_v52 = vadd.f32 %v11073_v55, %v5274_v8  ;;  %v5277_v36 = vadd.f32 %v7914_v17, %v5101_v9  ;;  %v7897_v9 = vpop.f32.mrf.mxu0  ;;  %v11717_v17 = vld [vmem:[#allocation11_spill] sm:$0xff] }
 0x361   :  { %v5205_v0 = vpop.f32.mrf.mxu1 }
 0x362   :  { %v5313_v18 = vmax.f32 %v5297_v52, %v5298_v27  ;;  %v5276_v14 = vadd.f32 %v5205_v0, %v5100_v56  ;;  %v5300_v25 = vadd.f32 %v11073_v55, %v5277_v36  ;;  %v4759_v56 = vadd.f32 %v11717_v17, %v11716_v58  ;;  %v11718_v52 = vld [vmem:[#allocation12_spill] sm:$0xff] }
 0x363   :  { %v7917_v53 = vpop.f32.mrf.mxu1  ;;  %v4758_v36 = vadd.f32 %v11719_v7, %v11718_v52 }
 0x364   :  { %v5299_v19 = vadd.f32 %v11073_v55, %v5276_v14  ;;  %v5279_v26 = vadd.f32 %v7917_v53, %v5103_v33  ;;  %v4935_v0 = vadd.f32 %v11720_v6, %v4759_v56  ;;  %v5079_v14 = vpop.f32.mrf.mxu0  ;;  %v11722_v53 = vld [vmem:[#allocation37_spill] sm:$0xff] }
 0x365   :  { %v5215_v11 = vpop.f32.mrf.mxu1  ;;  %v4934_v33 = vadd.f32 %v11056_v21, %v4758_v36 }
 0x366   :  { %v5315_v44 = vmax.f32 %v5299_v19, %v5300_v25  ;;  %v5278_v61 = vadd.f32 %v5215_v11, %v5102_v63  ;;  %v5302_v16 = vadd.f32 %v11073_v55, %v5279_v26  ;;  %v4761_v25 = vadd.f32 %v11722_v53, %v11721_v38  ;;  %v7900_v12 = vpop.f32.mrf.mxu0 }
 0x367   :  { %v7920_v5 = vpop.f32.mrf.mxu1  ;;  %v5111_v21 = vadd.f32 %v7897_v9, %v4935_v0  ;;  %v5110_v28 = vadd.f32 %v5079_v14, %v4934_v33 }
 0x368   :  { %v5317_v34 = vmax.f32 %v5313_v18, %v5315_v44  ;;  %v5301_v48 = vadd.f32 %v11073_v55, %v5278_v61  ;;  %v5281_v51 = vadd.f32 %v7920_v5, %v5105_v13  ;;  %v4937_v44 = vadd.f32 %v11059_v35, %v4761_v25 }
 0x369   :  { %v5225_v41 = vpop.f32.mrf.mxu1  ;;  %v4936_v13 = vadd.f32 %v11065_v62, %v4760_v15 }
 0x36a   :  { %v5326_v43 = vsel %vm5325_vm7, %v5317_v34, -inf  ;;  %v5319_v24 = vmax.f32 %v5301_v48, %v5302_v16  ;;  %v5343_v4 = vsel %vm5342_vm8, %v5317_v34, -inf  ;;  %v5280_v29 = vadd.f32 %v5225_v41, %v5104_v3 }
 0x36b   :  { %v7923_v8 = vpop.f32.mrf.mxu1  ;;  %v5327_v31 = vrot.slane %v5326_v43, 4  ;;  %v5304_v22 = vadd.f32 %v11073_v55, %v5281_v51  ;;  %v5344_v39 = vrot.slane %v5343_v4, 4  ;;  %v5113_v23 = vadd.f32 %v7900_v12, %v4937_v44 }
 0x36c   :  { %v5283_v37 = vadd.f32 %v7923_v8, %v5107_v54  ;;  %v5303_v46 = vadd.f32 %v11073_v55, %v5280_v29 }
 0x36d   :  { %v5235_v27 = vpop.f32.mrf.mxu1  ;;  %v5328_v19 = vmax.f32 %v5326_v43, %v5327_v31  ;;  %v5345_v11 = vmax.f32 %v5343_v4, %v5344_v39  ;;  %v5089_v43 = vpop.f32.mrf.mxu0 }
 0x36e   :  { %v5282_v59 = vadd.f32 %v5235_v27, %v5106_v49  ;;  %v5321_v10 = vmax.f32 %v5303_v46, %v5304_v22  ;;  %v5306_v2 = vadd.f32 %v11073_v55, %v5283_v37  ;;  %v5112_v9 = vadd.f32 %v5089_v43, %v4936_v13 }
 0x36f   :  { %v7926_v18 = vpop.f32.mrf.mxu1  ;;  %v5329_v34 = vrot.slane %v5328_v19, 2  ;;  %v5346_v3 = vrot.slane %v5345_v11, 2 }
 0x370   :  { %v5305_v60 = vadd.f32 %v11073_v55, %v5282_v59  ;;  %v5285_v50 = vadd.f32 %v7926_v18, %v5109_v47  ;;  %v5323_v26 = vmax.f32 %v5319_v24, %v5321_v10 }
 0x371   :  { %v5245_v63 = vpop.f32.mrf.mxu1  ;;  %v5330_v4 = vmax.f32 %v5328_v19, %v5329_v34  ;;  %v5347_v49 = vmax.f32 %v5345_v11, %v5346_v3  ;;  %v6502_v34 = vld [vmem:[%s11350_s5 + $0x1f0] sm:$0xff]  ;;  %v6484_v3 = vld [vmem:[%s11350_s5 + $0x168] sm:$0xff] }
 0x372   :  { %v5314_v45 = vmax.f32 %v5305_v60, %v5306_v2  ;;  %v5284_v32 = vadd.f32 %v5245_v63, %v5108_v42  ;;  %v5308_v5 = vadd.f32 %v11073_v55, %v5285_v50  ;;  %v5359_v16 = vsel %vm5325_vm7, %v5323_v26, -inf }
 0x373   :  { %v7929_v61 = vpop.f32.mrf.mxu1  ;;  %v5375_v48 = vsel %vm5342_vm8, %v5323_v26, -inf  ;;  %v5360_v24 = vrot.slane %v5359_v16, 4  ;;  %v5331_v59 = vrot.slane %v5330_v4, 1  ;;  %v5348_v47 = vrot.slane %v5347_v49, 1 }
 0x374   :  { %v5307_v57 = vadd.f32 %v11073_v55, %v5284_v32  ;;  %v5287_v40 = vadd.f32 %v7929_v61, %v5111_v21  ;;  %v5376_v54 = vrot.slane %v5375_v48, 4 }
 0x375   :  { %v5255_v51 = vpop.f32.mrf.mxu1  ;;  %v5361_v27 = vmax.f32 %v5359_v16, %v5360_v24  ;;  %v5332_v50 = vmax.f32 %v5330_v4, %v5331_v59  ;;  %v5349_v38 = vmax.f32 %v5347_v49, %v5348_v47  ;;  %v6498_v4 = vld [vmem:[%s11350_s5 + $0x1d0] sm:$0xff] }
 0x376   :  { %v5316_v41 = vmax.f32 %v5307_v57, %v5308_v5  ;;  %v5286_v35 = vadd.f32 %v5255_v51, %v5110_v28  ;;  %v5310_v29 = vadd.f32 %v11073_v55, %v5287_v40  ;;  %v5377_v52 = vmax.f32 %v5375_v48, %v5376_v54  ;;  %v6485_v28 = vld [vmem:[%s11350_s5 + $0x170] sm:$0xff]  ;;  %v6482_v54 = vld [vmem:[%s11350_s5 + $0x158] sm:$0xff] }
 0x377   :  { %v7932_v1 = vpop.f32.mrf.mxu1  ;;  %v5362_v42 = vrot.slane %v5361_v27, 2  ;;  %v5340_v32 = vmax.f32 %v5332_v50, 0.0  ;;  %v5357_v44 = vmax.f32 %v5349_v38, 0.0  ;;  %v6490_v50 = vld [vmem:[%s11350_s5 + $0x190] sm:$0xff]  ;;  %v6472_v38 = vld [vmem:[%s11350_s5 + $0x108] sm:$0xff] }
 0x378   :  { %v5318_v62 = vmax.f32 %v5314_v45, %v5316_v41  ;;  %v5309_v8 = vadd.f32 %v11073_v55, %v5286_v35  ;;  %v5289_v56 = vadd.f32 %v7932_v1, %v5113_v23  ;;  %v5378_v14 = vrot.slane %v5377_v52, 2  ;;  %v6501_v41 = vld [vmem:[%s11350_s5 + $0x1e8] sm:$0xff]  ;;  %v6483_v35 = vld [vmem:[%s11350_s5 + $0x160] sm:$0xff]  ;;  %v6481_v23 = vld [vmem:[%s11350_s5 + $0x150] sm:$0xff] }
 0x379   :  { %v5265_v37 = vpop.f32.mrf.mxu1  ;;  %v5363_v26 = vmax.f32 %v5361_v27, %v5362_v42  ;;  %v6500_v1 = vld [vmem:[%s11350_s5 + $0x1e0] sm:$0xff]  ;;  %v6474_v42 = vld [vmem:[%s11350_s5 + $0x118] sm:$0xff] }
 0x37a   :  { %v5333_v58 = vsel %vm5325_vm7, %v5318_v62, -inf  ;;  %v5350_v17 = vsel %vm5342_vm8, %v5318_v62, -inf  ;;  %v5320_v46 = vmax.f32 %v5309_v8, %v5310_v29  ;;  %v5288_v7 = vadd.f32 %v5265_v37, %v5112_v9  ;;  %v6499_v62 = vld [vmem:[%s11350_s5 + $0x1d8] sm:$0xff]  ;;  %v6480_v9 = vld [vmem:[%s11350_s5 + $0x148] sm:$0xff] }
 0x37b   :  { %v5334_v31 = vrot.slane %v5333_v58, 4  ;;  %v5351_v22 = vrot.slane %v5350_v17, 4  ;;  %v5312_v6 = vadd.f32 %v11073_v55, %v5289_v56  ;;  %v5379_v63 = vmax.f32 %v5377_v52, %v5378_v14  ;;  %v6497_v37 = vld [vmem:[%s11350_s5 + $0x1c8] sm:$0xff]  ;;  %v6496_v56 = vld [vmem:[%s11350_s5 + $0x1c0] sm:$0xff]  ;;  %v6477_v52 = vld [vmem:[%s11350_s5 + $0x130] sm:$0xff] }
 0x37c   :  { %v5311_v0 = vadd.f32 %v11073_v55, %v5288_v7  ;;  %v5364_v5 = vrot.slane %v5363_v26, 1  ;;  %v6494_v7 = vld [vmem:[%s11350_s5 + $0x1b0] sm:$0xff]  ;;  %v6491_v14 = vld [vmem:[%s11350_s5 + $0x198] sm:$0xff] }
 0x37d   :  { %v5335_v36 = vmax.f32 %v5333_v58, %v5334_v31  ;;  %v5352_v39 = vmax.f32 %v5350_v17, %v5351_v22  ;;  %v5380_v57 = vrot.slane %v5379_v63, 1  ;;  %v6479_v17 = vld [vmem:[%s11350_s5 + $0x140] sm:$0xff]  ;;  %v6478_v31 = vld [vmem:[%s11350_s5 + $0x138] sm:$0xff] }
 0x37e   :  { %v5322_v33 = vmax.f32 %v5311_v0, %v5312_v6  ;;  %v5365_v49 = vmax.f32 %v5363_v26, %v5364_v5  ;;  %v6495_v22 = vld [vmem:[%s11350_s5 + $0x1b8] sm:$0xff]  ;;  %v11725_v26 = vmov 0.0   ;;  %v5786_v5 = vld [vmem:[%s11352_s7 + $0x10] sm:$0xff] }
 0x37f   :  { %v5336_v10 = vrot.slane %v5335_v36, 2  ;;  %v5353_v18 = vrot.slane %v5352_v39, 2  ;;  %v5381_v58 = vmax.f32 %v5379_v63, %v5380_v57  ;;  %v5799_v63 = vld [vmem:[%s11352_s7 + $0x78] sm:$0xff]  ;;  %v5785_v57 = vld [vmem:[%s11352_s7 + $0x8] sm:$0xff] }
 0x380   :  { %v5324_v53 = vmax.f32 %v5320_v46, %v5322_v33  ;;  %v5373_v59 = vmax.f32 %v5365_v49, 0.0 }
 0x381   :  { %v5337_v2 = vmax.f32 %v5335_v36, %v5336_v10  ;;  %v5354_v60 = vmax.f32 %v5352_v39, %v5353_v18  ;;  %v6476_v36 = vld [vmem:[%s11350_s5 + $0x128] sm:$0xff]  ;;  %v5389_v6 = vmax.f32 %v5381_v58, 0.0  ;;  %v6475_v10 = vld [vmem:[%s11350_s5 + $0x120] sm:$0xff] }
 0x382   :  { %v5366_v20 = vsel %vm5325_vm7, %v5324_v53, -inf  ;;  %v5382_v30 = vsel %vm5342_vm8, %v5324_v53, -inf  ;;  %v6493_v39 = vld [vmem:[%s11350_s5 + $0x1a8] sm:$0xff]  ;;  %v6492_v18 = vld [vmem:[%s11350_s5 + $0x1a0] sm:$0xff] }
 0x383   :  { %v5338_v25 = vrot.slane %v5337_v2, 1  ;;  %v5355_v19 = vrot.slane %v5354_v60, 1  ;;  %v5367_v11 = vrot.slane %v5366_v20, 4  ;;  %v5383_v45 = vrot.slane %v5382_v30, 4  ;;  %v6489_v53 = vld [vmem:[%s11350_s5 + $0x188] sm:$0xff] }
 0x385   :  { %v5339_v15 = vmax.f32 %v5337_v2, %v5338_v25  ;;  %v5356_v55 = vmax.f32 %v5354_v60, %v5355_v19  ;;  %v5368_v12 = vmax.f32 %v5366_v20, %v5367_v11  ;;  %v5384_v13 = vmax.f32 %v5382_v30, %v5383_v45  ;;  %v6473_v60 = vld [vmem:[%s11350_s5 + $0x110] sm:$0xff]  ;;  %v6471_v25 = vld [vmem:[%s11350_s5 + $0x100] sm:$0xff]  ;;  %v5797_v30 = vld [vmem:[%s11352_s7 + $0x68] sm:$0xff] }
 0x386   :  { %v6488_v19 = vld [vmem:[%s11350_s5 + $0x180] sm:$0xff]  ;;  %v5798_v20 = vld [vmem:[%s11352_s7 + $0x70] sm:$0xff]  ;;  %v5793_v45 = vld [vmem:[%s11352_s7 + $0x48] sm:$0xff] }
 0x387   :  { %v5341_v21 = vmax.f32 %v5339_v15, 0.0  ;;  %v5358_v61 = vmax.f32 %v5356_v55, 0.0  ;;  %v5369_v16 = vrot.slane %v5368_v12, 2  ;;  %v5385_v48 = vrot.slane %v5384_v13, 2  ;;  %v5796_v15 = vld [vmem:[%s11352_s7 + $0x60] sm:$0xff]  ;;  %v5795_v55 = vld [vmem:[%s11352_s7 + $0x58] sm:$0xff] }
 0x388   :  { %v5794_v11 = vld [vmem:[%s11352_s7 + $0x50] sm:$0xff] }
 0x389   :  { %v5427_v40 = vsel %vm5426_vm9, %v5358_v61, %v5357_v44  ;;  %v5504_v51 = vsel %vm5426_vm9, %v5341_v21, %v5340_v32  ;;  %v5370_v43 = vmax.f32 %v5368_v12, %v5369_v16  ;;  %v5386_v24 = vmax.f32 %v5384_v13, %v5385_v48  ;;  %v5792_v32 = vld [vmem:[%s11352_s7 + $0x40] sm:$0xff]  ;;  %v5791_v44 = vld [vmem:[%s11352_s7 + $0x38] sm:$0xff]  ;;  %v5790_v21 = vld [vmem:[%s11352_s7 + $0x30] sm:$0xff] }
 0x38a   :  { %6469 = vmatmul.mubr.msk.f32.vlgmr.msra.gmra.mxu0 %vm5428_vm10, %v5427_v40  ;;  %6470 = vmatmul.mubr.msk.f32.vlgmr.msra.gmra.mxu1 %vm5428_vm10, %v5504_v51  ;;  %v5789_v61 = vld [vmem:[%s11352_s7 + $0x28] sm:$0xff]  ;;  %v5788_v12 = vld [vmem:[%s11352_s7 + $0x20] sm:$0xff]  ;;  %v5787_v13 = vld [vmem:[%s11352_s7 + $0x18] sm:$0xff] }
 0x38b   :  { %5617 = vmatpush1.msra.mxu0 %v6485_v28  ;;  %5712 = vmatpush1.msra.mxu1 %v6502_v34  ;;  %v5371_v29 = vrot.slane %v5370_v43, 1  ;;  %v5387_v8 = vrot.slane %v5386_v24, 1  ;;  %v5784_v28 = vld [vmem:[%s11352_s7] sm:$0xff]  ;;  %v5807_v16 = vld [vmem:[%s11352_s7 + $0xb8] sm:$0xff]  ;;  %v5806_v48 = vld [vmem:[%s11352_s7 + $0xb0] sm:$0xff] }
 0x38c   :  { %5618 = vmatprep.subr.mxu0 %v6484_v3  ;;  %5713 = vmatprep.subr.mxu1 %v6501_v41  ;;  %v5808_v34 = vld [vmem:[%s11352_s7 + $0xc0] sm:$0xff]  ;;  %v5805_v40 = vld [vmem:[%s11352_s7 + $0xa8] sm:$0xff]  ;;  %v5803_v3 = vld [vmem:[%s11352_s7 + $0x98] sm:$0xff] }
 0x38d   :  { %5619 = vmatpush1.msra.mxu0 %v6483_v35  ;;  %5714 = vmatpush1.msra.mxu1 %v6500_v1  ;;  %v5372_v46 = vmax.f32 %v5370_v43, %v5371_v29  ;;  %v5388_v27 = vmax.f32 %v5386_v24, %v5387_v8  ;;  %v5804_v51 = vld [vmem:[%s11352_s7 + $0xa0] sm:$0xff]  ;;  %v5802_v41 = vld [vmem:[%s11352_s7 + $0x90] sm:$0xff]  ;;  %v5801_v35 = vld [vmem:[%s11352_s7 + $0x88] sm:$0xff]  ;;  %v5770_v43 = vlaneseq }
 0x38e   :  { %5620 = vmatprep.subr.mxu0 %v6482_v54  ;;  %5715 = vmatprep.subr.mxu1 %v6499_v62  ;;  %v5800_v1 = vld [vmem:[%s11352_s7 + $0x80] sm:$0xff] }
 0x38f   :  { %5621 = vmatpush1.msra.mxu0 %v6481_v23  ;;  %5716 = vmatpush1.msra.mxu1 %v6498_v4  ;;  %v5374_v47 = vmax.f32 %v5372_v46, 0.0  ;;  %v5390_v0 = vmax.f32 %v5388_v27, 0.0  ;;  %v5771_v62 = vshrl.u32 %v5770_v43, 7 }
 0x390   :  { %5622 = vmatprep.subr.mxu0 %v6480_v9  ;;  %5717 = vmatprep.subr.mxu1 %v6497_v37  ;;  %v5768_v9 = vld [vmem:[%s11351_s6] sm:$0x3] }
 0x391   :  { %5623 = vmatpush1.msra.mxu0 %v6479_v17  ;;  %5718 = vmatpush1.msra.mxu1 %v6496_v56  ;;  %v5597_v33 = vsel %vm5426_vm9, %v5374_v47, %v5373_v59  ;;  %v5692_v2 = vsel %vm5426_vm9, %v5390_v0, %v5389_v6  ;;  %v5772_v29 = vsub.s32 0, %v5771_v62  ;;  %v5776_v37 = vsub.s32 1, %v5771_v62  ;;  %v6505_v0 = vld [vmem:[%s11353_s8] ss:$0 sm:$0xff] }
 0x392   :  { %5624 = vmatprep.subr.mxu0 %v6478_v31  ;;  %5719 = vmatprep.subr.mxu1 %v6495_v22 }
 0x393   :  { %5625 = vmatpush1.msra.mxu0 %v6477_v52  ;;  %5720 = vmatpush1.msra.mxu1 %v6494_v7  ;;  %v5773_v31 = vrot.slane %v5768_v9, %v5772_v29  ;;  %v5777_v52 = vrot.slane %v5768_v9, %v5776_v37 }
 0x394   :  { %5626 = vmatprep.subr.mxu0 %v6476_v36  ;;  %5721 = vmatprep.subr.mxu1 %v6493_v39 }
 0x395   :  { %5627 = vmatpush1.msra.mxu0 %v6475_v10  ;;  %5722 = vmatpush1.msra.mxu1 %v6492_v18 }
 0x396   :  { %5628 = vmatprep.subr.mxu0 %v6474_v42  ;;  %5723 = vmatprep.subr.mxu1 %v6491_v14 }
 0x397   :  { %5629 = vmatpush1.msra.mxu0 %v6473_v60  ;;  %5724 = vmatpush1.msra.mxu1 %v6490_v50 }
 0x398   :  { %5630 = vmatprep.subr.mxu0 %v6472_v38  ;;  %5725 = vmatprep.subr.mxu1 %v6489_v53 }
 0x399   :  { %5631 = vmatpush1.msra.mxu0 %v6471_v25  ;;  %5664 = vmatprep.mubr.f32.mxu0 %v11725_v26 }
 0x39a   :  { %5726 = vmatpush1.msra.mxu1 %v6488_v19  ;;  %5759 = vmatprep.mubr.f32.mxu1 %v11725_v26 }
 0x39b   :  { %6487 = vmatmul.mubr.msk.f32.vlgmr.msra.gmra.mxu0 %vm5428_vm10, %v5597_v33  ;;  %6504 = vmatmul.mubr.msk.f32.vlgmr.msra.gmra.mxu1 %vm5428_vm10, %v5692_v2 }
 0x39c   :  { %5820 = vmatprep.subr.mxu0 %v11725_v26 }
 0x39d   :  { %5821 = vmatpush1.msra.mxu0 %v5799_v63 }
 0x39e   :  { %5822 = vmatprep.subr.mxu0 %v11725_v26 }
 0x39f   :  { %5823 = vmatpush1.msra.mxu0 %v5798_v20 }
 0x3a0   :  { %5824 = vmatprep.subr.mxu0 %v11725_v26 }
 0x3a1   :  { %5825 = vmatpush1.msra.mxu0 %v5797_v30 }
 0x3a2   :  { %5826 = vmatprep.subr.mxu0 %v11725_v26 }
 0x3a3   :  { %5827 = vmatpush1.msra.mxu0 %v5796_v15 }
 0x3a4   :  { %5828 = vmatprep.subr.mxu0 %v11725_v26 }
 0x3a5   :  { %5829 = vmatpush1.msra.mxu0 %v5795_v55 }
 0x3a6   :  { %5830 = vmatprep.subr.mxu0 %v11725_v26 }
 0x3a7   :  { %5831 = vmatpush1.msra.mxu0 %v5794_v11 }
 0x3a8   :  { %5832 = vmatprep.subr.mxu0 %v11725_v26 }
 0x3a9   :  { %5833 = vmatpush1.msra.mxu0 %v5793_v45 }
 0x3aa   :  { %5834 = vmatprep.subr.mxu0 %v11725_v26 }
 0x3ab   :  { %5835 = vmatpush1.msra.mxu0 %v5792_v32 }
 0x3ac   :  { %5836 = vmatprep.subr.mxu0 %v11725_v26 }
 0x3ad   :  { %5837 = vmatpush1.msra.mxu0 %v5791_v44 }
 0x3ae   :  { %5838 = vmatprep.subr.mxu0 %v11725_v26 }
 0x3af   :  { %5839 = vmatpush1.msra.mxu0 %v5790_v21 }
 0x3b0   :  { %5840 = vmatprep.subr.mxu0 %v11725_v26 }
 0x3b1   :  { %5841 = vmatpush1.msra.mxu0 %v5789_v61 }
 0x3b2   :  { %5842 = vmatprep.subr.mxu0 %v11725_v26 }
 0x3b3   :  { %5843 = vmatpush1.msra.mxu0 %v5788_v12 }
 0x3b4   :  { %5844 = vmatprep.subr.mxu0 %v11725_v26 }
 0x3b5   :  { %5845 = vmatpush1.msra.mxu0 %v5787_v13 }
 0x3b6   :  { %5846 = vmatprep.subr.mxu0 %v11725_v26 }
 0x3b7   :  { %5847 = vmatpush1.msra.mxu0 %v5786_v5 }
 0x3b8   :  { %5848 = vmatprep.subr.mxu0 %v11725_v26 }
 0x3b9   :  { %5849 = vmatpush1.msra.mxu0 %v5785_v57 }
 0x3ba   :  { %5850 = vmatprep.subr.mxu0 %v11725_v26 }
 0x3bb   :  { %5851 = vmatpush1.msra.mxu0 %v5784_v28 }
 0x3bc   :  { %5866 = vmatprep.subr.mxu0 %v11725_v26 }
 0x3bd   :  { %5867 = vmatpush2.msra.mxu0 %v5808_v34 }
 0x3be   :  { %5868 = vmatprep.subr.mxu0 %v11725_v26 }
 0x3bf   :  { %5869 = vmatpush2.msra.mxu0 %v5807_v16 }
 0x3c0   :  { %5870 = vmatprep.subr.mxu0 %v11725_v26 }
 0x3c1   :  { %5871 = vmatpush2.msra.mxu0 %v5806_v48 }
 0x3c2   :  { %5872 = vmatprep.subr.mxu0 %v11725_v26 }
 0x3c3   :  { %5873 = vmatpush2.msra.mxu0 %v5805_v40 }
 0x3c4   :  { %5874 = vmatprep.subr.mxu0 %v11725_v26 }
 0x3c5   :  { %5875 = vmatpush2.msra.mxu0 %v5804_v51 }
 0x3c6   :  { %5876 = vmatprep.subr.mxu0 %v11725_v26 }
 0x3c7   :  { %5877 = vmatpush2.msra.mxu0 %v5803_v3 }
 0x3c8   :  { %5878 = vmatprep.subr.mxu0 %v11725_v26 }
 0x3c9   :  { %5879 = vmatpush2.msra.mxu0 %v5802_v41 }
 0x3ca   :  { %5880 = vmatprep.subr.mxu0 %v11725_v26 }
 0x3cb   :  { %5881 = vmatpush2.msra.mxu0 %v5801_v35 }
 0x3cc   :  { %5882 = vmatprep.subr.mxu0 %v11725_v26 }
 0x3cd   :  { %5883 = vmatpush2.msra.mxu0 %v5800_v1 }
 0x44a   :  { %v5497_v24 = vpop.f32.mrf.mxu0  ;;  %v5573_v54 = vpop.f32.mrf.mxu1 }
 0x44b   :  { %v5574_v8 = vadd.f32 %v5573_v54, %v5497_v24 }
 0x44c   :  { %v5499_v23 = vpop.f32.mrf.mxu0  ;;  %v5575_v4 = vpop.f32.mrf.mxu1 }
 0x44d   :  { %v5576_v17 = vadd.f32 %v5575_v4, %v5499_v23 }
 0x45b   :  { %v5666_v49 = vpop.f32.mrf.mxu0  ;;  %v5761_v58 = vpop.f32.mrf.mxu1 }
 0x45c   :  { %v5671_v56 = vadd.f32 %v5666_v49, %v5574_v8 }
 0x45d   :  { %v5668_v22 = vpop.f32.mrf.mxu0  ;;  %v5763_v7 = vpop.f32.mrf.mxu1 }
 0x45e   :  { %v5766_v46 = vadd.f32 %v5761_v58, %v5671_v56  ;;  %v5672_v27 = vadd.f32 %v5668_v22, %v5576_v17 }
 0x460   :  { %v5767_v36 = vadd.f32 %v5763_v7, %v5672_v27  ;;  %v5780_v39 = vadd.f32 %v5773_v31, %v5766_v46 }
 0x462   :  { %v5781_v59 = vadd.f32 %v5777_v52, %v5767_v36  ;;  %v5782_v6 = vmax.f32 %v5780_v39, 0.0 }
 0x464   :  { %v5783_v47 = vmax.f32 %v5781_v59, 0.0 }
 0x466   :  { %6506 = vmatprep.mubr.msk.f32.mxu0 %vm5816_vm11, %v5783_v47 }
 0x467   :  { %5885 = vmatmul.mubr.f32.vlgmr.msra.gmra.mxu0 %v5782_v6 }
 0x527   :  { %v5886_v10 = vpop.f32.mrf.mxu0 }
 0x528   :  { %v5887_v18 = vadd.f32 %v6505_v0, %v5886_v10 }
 0x529   :  { %v5888_v42 = vpop.f32.mrf.mxu0 }
 0x52a   :  { %5891 = vst.msk [vmem:[#allocation2] sm:$0x3] %vm5890_vm12, %v5887_v18 }
 0x52b   :  { %7950 = shalt.err (!%p7947_p4)
}
 0x52c   :  { %5901 = dma.vmem_to_hbm [thread:$0]  %s5899_s29, 32, %s11354_s9, [#allocation3]  }
 0x52d   :  { %7959 = dma.done.wait [#allocation3], 32  }
 0x52e   :  { %7960 = vsyncadd [#allocation3], 4294967264 }
 0x52f   :  { %5905 = vsyncpa [#allocation3], 1 }

</bundles_post_ra>
